<compile_context>
chip_gen: v7x
topology: tpu7x:2x2x1
jax: 0.10.0
libtpu: 0.0.40
codegen_flags: <defaults>
</compile_context>

<pallas_src>
import functools
import math

import jax
import jax.numpy as jnp
from jax.experimental import pallas as pl
from jax.experimental.pallas import tpu as pltpu


# ----------------------------------------------------------------------------
# Pallas kernel: one post-norm TransformerEncoderLayer (MHA + FFN).
# Grid = (batch, num_query_tiles); q-tile axis is innermost.
# ----------------------------------------------------------------------------
def _encoder_layer_kernel(
    xq_ref, xkv_ref, bias_ref,
    wqkv_ref, bqkv_ref, wo_ref, bo_ref,
    g1_ref, beta1_ref, w1_ref, b1_ref, w2_ref, b2_ref, g2_ref, beta2_ref,
    o_ref, qkv_scratch,
    *, num_heads, layer_norm_eps):
    f32 = jnp.float32
    bf16 = jnp.bfloat16

    tq, D = o_ref.shape            # query-tile rows, model dim
    S = xkv_ref.shape[0]           # full sequence length (keys)
    Dh = D // num_heads

    # Fused QKV projection for the whole sequence, computed once per batch row
    # (q-tile grid axis is innermost, so the scratch stays valid for all tiles
    # of this batch element).  Weights arrive pre-transposed, pre-scaled (the
    # 1/sqrt(Dh) factor is folded into the Q block) and in bf16.  The scratch
    # itself is bf16: every consumer is an MXU operand that would be cast to
    # bf16 anyway, so this only saves VMEM capacity and read bandwidth.
    @pl.when(pl.program_id(1) == 0)
    def _():
        xk = xkv_ref[...].astype(bf16)                       # (S, D)
        qkv_scratch[...] = (
            jnp.dot(xk, wqkv_ref[...], preferred_element_type=f32)
            + bqkv_ref[...]).astype(bf16)                    # (S, 3D) bf16

    key_bias = bias_ref[...]                                 # (1, S): 0 / -1e30
    x_q = xq_ref[...]                                        # (tq, D) f32

    row0 = pl.multiple_of(pl.program_id(1) * tq, tq)
    q_all = qkv_scratch[pl.ds(row0, tq), pl.ds(0, D)]        # (tq, D) bf16
    k_all = qkv_scratch[:, pl.ds(D, D)]                      # (S, D)  bf16
    v_all = qkv_scratch[:, pl.ds(2 * D, D)]                  # (S, D)  bf16

    # Per-head attention.  No K transpose (contract on the last dim of both
    # operands) and no narrow scratch stores: each head's context is folded
    # directly into the output-projection accumulator.
    acc = jnp.zeros((tq, D), f32)
    for h in range(num_heads):
        sl = slice(h * Dh, (h + 1) * Dh)
        qh = q_all[:, sl]                                    # (tq, Dh) bf16
        kh = k_all[:, sl]                                    # (S, Dh)  bf16
        vh = v_all[:, sl]                                    # (S, Dh)  bf16

        s = jnp.einsum("qd,kd->qk", qh, kh,
                       preferred_element_type=f32) + key_bias
        s = s - jnp.max(s, axis=-1, keepdims=True)
        p = jnp.exp(s)
        p = p * pl.reciprocal(jnp.sum(p, axis=-1, keepdims=True), approx=True)

        ctx = jnp.dot(p.astype(bf16), vh,
                      preferred_element_type=f32)            # (tq, Dh)
        acc = acc + jnp.dot(ctx.astype(bf16), wo_ref[sl, :],
                            preferred_element_type=f32)      # (tq, D)
    attn = acc + bo_ref[...]

    def _ln(y, g, b):
        mu = jnp.mean(y, axis=-1, keepdims=True)
        var = jnp.mean((y - mu) ** 2, axis=-1, keepdims=True)
        return (y - mu) * jax.lax.rsqrt(var + layer_norm_eps) * g + b

    # Post-norm (norm_first=False): x = LN1(x + attn); x = LN2(x + FFN(x))
    h1 = _ln(x_q + attn, g1_ref[...], beta1_ref[...])

    f = jnp.dot(h1.astype(bf16), w1_ref[...],
                preferred_element_type=f32) + b1_ref[...]
    f = jnp.maximum(f, 0.0)                                  # activation='relu'
    f = jnp.dot(f.astype(bf16), w2_ref[...],
                preferred_element_type=f32) + b2_ref[...]
    o_ref[...] = _ln(h1 + f, g2_ref[...], beta2_ref[...])


def _encoder_layer(x, key_bias, kp, *, num_heads, eps, block_q=128):
    B, S, D = x.shape
    tq = block_q if (S % block_q == 0) else S
    n_q = S // tq

    def wspec(arr):
        nd = arr.ndim
        return pl.BlockSpec(arr.shape, lambda b, q, _nd=nd: (0,) * _nd)

    weights = [kp["wqkv"], kp["bqkv"], kp["wo"], kp["bo"],
               kp["g1"], kp["beta1"], kp["w1"], kp["b1"],
               kp["w2"], kp["b2"], kp["g2"], kp["beta2"]]

    kernel = functools.partial(
        _encoder_layer_kernel, num_heads=num_heads, layer_norm_eps=eps)

    return pl.pallas_call(
        kernel,
        out_shape=jax.ShapeDtypeStruct((B, S, D), jnp.float32),
        grid_spec=pltpu.PrefetchScalarGridSpec(
            num_scalar_prefetch=0,
            grid=(B, n_q),
            in_specs=[
                # query rows of x (residual path), tiled over the sequence
                pl.BlockSpec((pl.Squeezed(), tq, D), lambda b, q: (b, q, 0)),
                # full-sequence x for the fused QKV projection (block index is
                # constant over the q-tile axis -> fetched once per batch row)
                pl.BlockSpec((pl.Squeezed(), S, D), lambda b, q: (b, 0, 0)),
                # additive key-padding bias (0 valid / -1e30 padded)
                pl.BlockSpec((pl.Squeezed(), 1, S), lambda b, q: (b, 0, 0)),
            ] + [wspec(w) for w in weights],
            out_specs=pl.BlockSpec((pl.Squeezed(), tq, D),
                                   lambda b, q: (b, q, 0)),
            scratch_shapes=[pltpu.VMEM((S, 3 * D), jnp.bfloat16)],
        ),
        compiler_params=pltpu.CompilerParams(
            dimension_semantics=("parallel", "arbitrary"),
            vmem_limit_bytes=64 * 1024 * 1024),
    )(x, x, key_bias, *weights)


# ----------------------------------------------------------------------------
# Glue: positional features, parameter init/prep, full forward, reference.
# ----------------------------------------------------------------------------
def _sinusoidal_positional_features(seq_len, dim,
                                    min_timescale=1.0, max_timescale=1.0e4):
    # AllenNLP-style add_positional_features (plain-JAX glue).
    num_timescales = dim // 2
    positions = jnp.arange(seq_len, dtype=jnp.float32)
    timescale_idx = jnp.arange(num_timescales, dtype=jnp.float32)
    log_inc = math.log(max_timescale / min_timescale) / max(num_timescales - 1, 1)
    inv_timescales = min_timescale * jnp.exp(timescale_idx * -log_inc)
    scaled = positions[:, None] * inv_timescales[None, :]
    feats = jnp.concatenate([jnp.sin(scaled), jnp.cos(scaled)], axis=1)
    if dim % 2 == 1:
        feats = jnp.concatenate([feats, jnp.zeros((seq_len, 1))], axis=1)
    return feats[None, :, :]


def _apply_positional(x, positional_encoding, positional_embedding):
    if positional_encoding == "sinusoidal":
        return x + _sinusoidal_positional_features(x.shape[1], x.shape[2])
    if positional_encoding == "embedding":
        pos_ids = jnp.arange(x.shape[1])
        return x + positional_embedding[pos_ids][None, :, :]
    return x


def init_params(key, num_layers, d_model, ff_dim):
    def xavier(k, shape):
        limit = math.sqrt(6.0 / (shape[0] + shape[1]))
        return jax.random.uniform(k, shape, jnp.float32, -limit, limit)

    params = []
    for i in range(num_layers):
        keys = jax.random.split(jax.random.fold_in(key, i), 4)
        # PyTorch in_proj_weight is (3D, D) used as x @ W.T; pre-transpose.
        in_proj = xavier(keys[0], (3 * d_model, d_model))
        params.append(dict(
            wq=in_proj[0:d_model].T,
            wk=in_proj[d_model:2 * d_model].T,
            wv=in_proj[2 * d_model:3 * d_model].T,
            bq=jnp.zeros((1, d_model)), bk=jnp.zeros((1, d_model)),
            bv=jnp.zeros((1, d_model)),
            wo=xavier(keys[1], (d_model, d_model)).T, bo=jnp.zeros((1, d_model)),
            g1=jnp.ones((1, d_model)), beta1=jnp.zeros((1, d_model)),
            w1=xavier(keys[2], (ff_dim, d_model)).T, b1=jnp.zeros((1, ff_dim)),
            w2=xavier(keys[3], (d_model, ff_dim)).T, b2=jnp.zeros((1, d_model)),
            g2=jnp.ones((1, d_model)), beta2=jnp.zeros((1, d_model)),
        ))
    return params


def _prep_layer(p, *, num_heads):
    """Fuse QKV (with the 1/sqrt(Dh) scale folded into the Q block, matching
    PyTorch's q-scaling) and cast matmul weights to bf16 (MXU inputs); keep
    biases, LayerNorm parameters and all statistics in f32."""
    d_model = p["wq"].shape[0]
    scale = 1.0 / math.sqrt(d_model // num_heads)
    wqkv = jnp.concatenate([p["wq"] * scale, p["wk"], p["wv"]], axis=1)  # (D, 3D)
    bqkv = jnp.concatenate([p["bq"] * scale, p["bk"], p["bv"]], axis=1)  # (1, 3D)
    return dict(
        wqkv=wqkv.astype(jnp.bfloat16), bqkv=bqkv,
        wo=p["wo"].astype(jnp.bfloat16), bo=p["bo"],
        g1=p["g1"], beta1=p["beta1"],
        w1=p["w1"].astype(jnp.bfloat16), b1=p["b1"],
        w2=p["w2"].astype(jnp.bfloat16), b2=p["b2"],
        g2=p["g2"], beta2=p["beta2"])


def transformer_seq2seq_encoder(inputs, mask, layer_params, *, num_heads,
                                layer_norm_eps=1e-5, positional_encoding=None,
                                positional_embedding=None, block_q=128):
    x = _apply_positional(inputs.astype(jnp.float32),
                          positional_encoding, positional_embedding)
    assert x.shape[-1] % num_heads == 0
    # mask: True = valid token (same convention as the PyTorch module); the
    # module flips it to a key-padding mask, here it becomes an additive bias.
    # NOTE: rows whose keys are ALL padded get a uniform softmax (not NaN as
    # PyTorch would produce) — intentional.
    key_bias = jnp.where(mask, 0.0, -1e30).astype(jnp.float32)[:, None, :]
    for p in layer_params:
        kp = _prep_layer(p, num_heads=num_heads)
        x = _encoder_layer(x, key_bias, kp, num_heads=num_heads,
                           eps=layer_norm_eps, block_q=block_q)
    return x


def _reference_forward(inputs, mask, layer_params, *, num_heads, eps=1e-5,
                       positional_encoding=None, positional_embedding=None):
    """Plain-JAX reference with the same mixed-precision policy as the kernel
    (bf16 matmul operands, f32 accumulation / softmax / LayerNorm)."""
    bf16, f32 = jnp.bfloat16, jnp.float32
    x = _apply_positional(inputs.astype(f32),
                          positional_encoding, positional_embedding)
    B, S, D = x.shape
    Dh = D // num_heads
    bias = jnp.where(mask, 0.0, -1e30)[:, None, None, :]

    def mm(a, b):
        return jnp.einsum("...ij,jk->...ik", a.astype(bf16), b.astype(bf16),
                          preferred_element_type=f32)

    def ln(y, g, b):
        mu = y.mean(-1, keepdims=True)
        var = ((y - mu) ** 2).mean(-1, keepdims=True)
        return (y - mu) * jax.lax.rsqrt(var + eps) * g + b

    for p in layer_params:
        q = (mm(x, p["wq"]) + p["bq"]).reshape(B, S, num_heads, Dh).transpose(0, 2, 1, 3)
        k = (mm(x, p["wk"]) + p["bk"]).reshape(B, S, num_heads, Dh).transpose(0, 2, 1, 3)
        v = (mm(x, p["wv"]) + p["bv"]).reshape(B, S, num_heads, Dh).transpose(0, 2, 1, 3)
        s = jnp.einsum("bhqd,bhkd->bhqk", q.astype(bf16), k.astype(bf16),
                       preferred_element_type=f32) / math.sqrt(Dh) + bias
        a = jax.nn.softmax(s, axis=-1)
        o = jnp.einsum("bhqk,bhkd->bhqd", a.astype(bf16), v.astype(bf16),
                       preferred_element_type=f32)
        o = o.transpose(0, 2, 1, 3).reshape(B, S, D)
        attn = mm(o, p["wo"]) + p["bo"]
        h1 = ln(x + attn, p["g1"], p["beta1"])
        f = jnp.maximum(mm(h1, p["w1"]) + p["b1"], 0.0)
        f = mm(f, p["w2"]) + p["b2"]
        x = ln(h1 + f, p["g2"], p["beta2"])
    return x


if __name__ == "__main__":
    # Small but lane-aligned demo shapes (D, Dff multiples of 128; S mult of 8).
    B, S, D = 2, 64, 128
    NUM_HEADS = 8
    FF_DIM = 256
    NUM_LAYERS = 2
    BLOCK_Q = 32

    key = jax.random.PRNGKey(0)
    k_in, k_par = jax.random.split(key)
    inputs = jax.random.normal(k_in, (B, S, D), dtype=jnp.float32)
    lengths = jnp.array([S, S - 20])
    mask = jnp.arange(S)[None, :] < lengths[:, None]        # True = valid token

    params = init_params(k_par, NUM_LAYERS, D, FF_DIM)

    out = transformer_seq2seq_encoder(
        inputs, mask, params, num_heads=NUM_HEADS, layer_norm_eps=1e-5,
        positional_encoding="sinusoidal", block_q=BLOCK_Q)
    out = jax.block_until_ready(out)

    ref = _reference_forward(
        inputs, mask, params, num_heads=NUM_HEADS, eps=1e-5,
        positional_encoding="sinusoidal")

    assert out.shape == (B, S, D)
    max_err = float(jnp.max(jnp.abs(out - ref)))
    assert bool(jnp.allclose(out, ref, atol=2e-2, rtol=2e-2)), (
        f"mismatch vs reference (max abs err {max_err})")
    print("KERNEL_OK")
</pallas_src>

<mosaic_0001>
module attributes {stable_mosaic.version = 11 : i64} {
  func.func @_encoder_layer_kernel(%arg0: i32, %arg1: i32, %arg2: memref<1x32x128xf32, #tpu.memory_space<vmem>>, %arg3: memref<1x64x128xf32, #tpu.memory_space<vmem>>, %arg4: memref<1x1x64xf32, #tpu.memory_space<vmem>>, %arg5: memref<128x384xbf16, #tpu.memory_space<vmem>>, %arg6: memref<1x384xf32, #tpu.memory_space<vmem>>, %arg7: memref<128x128xbf16, #tpu.memory_space<vmem>>, %arg8: memref<1x128xf32, #tpu.memory_space<vmem>>, %arg9: memref<1x128xf32, #tpu.memory_space<vmem>>, %arg10: memref<1x128xf32, #tpu.memory_space<vmem>>, %arg11: memref<128x256xbf16, #tpu.memory_space<vmem>>, %arg12: memref<1x256xf32, #tpu.memory_space<vmem>>, %arg13: memref<256x128xbf16, #tpu.memory_space<vmem>>, %arg14: memref<1x128xf32, #tpu.memory_space<vmem>>, %arg15: memref<1x128xf32, #tpu.memory_space<vmem>>, %arg16: memref<1x128xf32, #tpu.memory_space<vmem>>, %arg17: memref<1x32x128xf32, #tpu.memory_space<vmem>>, %arg18: memref<64x384xbf16, #tpu.memory_space<vmem>>) attributes {dimension_semantics = [#tpu.dimension_semantics<parallel>, #tpu.dimension_semantics<arbitrary>], iteration_bounds = array<i64: 2, 2>, scalar_prefetch = 0 : i64, scratch_operands = 1 : i64, tpu.core_type = #tpu.core_type<tc>, window_params = [{transform_indices = @transform_0, window_bounds = array<i64: 1, 32, 128>}, {transform_indices = @transform_1, window_bounds = array<i64: 1, 64, 128>}, {transform_indices = @transform_2, window_bounds = array<i64: 1, 1, 64>}, {pipeline_mode = #tpu.pipeline_mode<synchronous>, transform_indices = @transform_3, window_bounds = array<i64: 128, 384>}, {pipeline_mode = #tpu.pipeline_mode<synchronous>, transform_indices = @transform_4, window_bounds = array<i64: 1, 384>}, {pipeline_mode = #tpu.pipeline_mode<synchronous>, transform_indices = @transform_5, window_bounds = array<i64: 128, 128>}, {pipeline_mode = #tpu.pipeline_mode<synchronous>, transform_indices = @transform_6, window_bounds = array<i64: 1, 128>}, {pipeline_mode = #tpu.pipeline_mode<synchronous>, transform_indices = @transform_7, window_bounds = array<i64: 1, 128>}, {pipeline_mode = #tpu.pipeline_mode<synchronous>, transform_indices = @transform_8, window_bounds = array<i64: 1, 128>}, {pipeline_mode = #tpu.pipeline_mode<synchronous>, transform_indices = @transform_9, window_bounds = array<i64: 128, 256>}, {pipeline_mode = #tpu.pipeline_mode<synchronous>, transform_indices = @transform_10, window_bounds = array<i64: 1, 256>}, {pipeline_mode = #tpu.pipeline_mode<synchronous>, transform_indices = @transform_11, window_bounds = array<i64: 256, 128>}, {pipeline_mode = #tpu.pipeline_mode<synchronous>, transform_indices = @transform_12, window_bounds = array<i64: 1, 128>}, {pipeline_mode = #tpu.pipeline_mode<synchronous>, transform_indices = @transform_13, window_bounds = array<i64: 1, 128>}, {pipeline_mode = #tpu.pipeline_mode<synchronous>, transform_indices = @transform_14, window_bounds = array<i64: 1, 128>}, {transform_indices = @transform_15, window_bounds = array<i64: 1, 32, 128>}]} {
    %c0_i32 = arith.constant 0 : i32
    %0 = arith.cmpi eq, %arg1, %c0_i32 : i32
    %1 = arith.extui %0 : i1 to i32
    %c0_i32_0 = arith.constant 0 : i32
    %2 = arith.cmpi ne, %1, %c0_i32_0 : i32
    scf.if %2 {
      %c0_92 = arith.constant 0 : index
      %c0_93 = arith.constant 0 : index
      %c0_94 = arith.constant 0 : index
      %260 = vector.load %arg3[%c0_92, %c0_93, %c0_94] : memref<1x64x128xf32, #tpu.memory_space<vmem>>, vector<1x64x128xf32>
      %261 = vector.shape_cast %260 : vector<1x64x128xf32> to vector<64x128xf32>
      %262 = arith.truncf %261 : vector<64x128xf32> to vector<64x128xbf16>
      %c0_95 = arith.constant 0 : index
      %c0_96 = arith.constant 0 : index
      %263 = vector.load %arg5[%c0_95, %c0_96] : memref<128x384xbf16, #tpu.memory_space<vmem>>, vector<128x384xbf16>
      %cst_97 = arith.constant dense<0.000000e+00> : vector<64x384xf32>
      %264 = tpu.matmul %262, %263, %cst_97 {dimension_numbers = #tpu.dot_dimension_numbers<[1], [0], [0], [1], [0, 0, 1, 1], [], []>} : vector<64x128xbf16>, vector<128x384xbf16>, vector<64x384xf32> -> vector<64x384xf32>
      %c0_98 = arith.constant 0 : index
      %c0_99 = arith.constant 0 : index
      %265 = vector.load %arg6[%c0_98, %c0_99] : memref<1x384xf32, #tpu.memory_space<vmem>>, vector<1x384xf32>
      %266 = vector.broadcast %265 : vector<1x384xf32> to vector<64x384xf32>
      %267 = arith.addf %264, %266 : vector<64x384xf32>
      %268 = arith.truncf %267 : vector<64x384xf32> to vector<64x384xbf16>
      %c0_100 = arith.constant 0 : index
      %c0_101 = arith.constant 0 : index
      %269 = vector.load %arg18[%c0_100, %c0_101] : memref<64x384xbf16, #tpu.memory_space<vmem>>, vector<64x384xbf16>
      tpu.vector_store %arg18[%c0_100, %c0_101], %268 {strides = array<i32>} : memref<64x384xbf16, #tpu.memory_space<vmem>>, vector<64x384xbf16>,
    } else {
    }
    %c0 = arith.constant 0 : index
    %c0_1 = arith.constant 0 : index
    %c0_2 = arith.constant 0 : index
    %3 = vector.load %arg4[%c0, %c0_1, %c0_2] : memref<1x1x64xf32, #tpu.memory_space<vmem>>, vector<1x1x64xf32>
    %4 = vector.shape_cast %3 : vector<1x1x64xf32> to vector<1x64xf32>
    %c0_3 = arith.constant 0 : index
    %c0_4 = arith.constant 0 : index
    %c0_5 = arith.constant 0 : index
    %5 = vector.load %arg2[%c0_3, %c0_4, %c0_5] : memref<1x32x128xf32, #tpu.memory_space<vmem>>, vector<1x32x128xf32>
    %6 = vector.shape_cast %5 : vector<1x32x128xf32> to vector<32x128xf32>
    %c32_i32 = arith.constant 32 : i32
    %7 = arith.muli %arg1, %c32_i32 : i32
    %8 = tpu.assume_multiple %7, 32 : i32
    %9 = arith.index_cast %8 : i32 to index
    %c0_6 = arith.constant 0 : index
    %10 = vector.load %arg18[%9, %c0_6] : memref<64x384xbf16, #tpu.memory_space<vmem>>, vector<32x128xbf16>
    %c0_7 = arith.constant 0 : index
    %c128 = arith.constant 128 : index
    %11 = vector.load %arg18[%c0_7, %c128] : memref<64x384xbf16, #tpu.memory_space<vmem>>, vector<64x128xbf16>
    %c0_8 = arith.constant 0 : index
    %c256 = arith.constant 256 : index
    %12 = vector.load %arg18[%c0_8, %c256] : memref<64x384xbf16, #tpu.memory_space<vmem>>, vector<64x128xbf16>
    %cst = arith.constant 0.000000e+00 : f32
    %13 = vector.broadcast %cst : f32 to vector<32x128xf32>
    %14 = vector.extract_strided_slice %10 {offsets = [0, 0], sizes = [32, 16], strides = [1, 1]} : vector<32x128xbf16> to vector<32x16xbf16>
    %15 = vector.extract_strided_slice %11 {offsets = [0, 0], sizes = [64, 16], strides = [1, 1]} : vector<64x128xbf16> to vector<64x16xbf16>
    %16 = vector.extract_strided_slice %12 {offsets = [0, 0], sizes = [64, 16], strides = [1, 1]} : vector<64x128xbf16> to vector<64x16xbf16>
    "tpu.trace_start"() <{level = 10 : i32, message = "qd,kd->qk"}> : () -> ()
    %cst_9 = arith.constant dense<0.000000e+00> : vector<32x64xf32>
    %17 = tpu.matmul %14, %15, %cst_9 {dimension_numbers = #tpu.dot_dimension_numbers<[1], [1], [0], [0], [0, 0, 1, 0], [], []>} : vector<32x16xbf16>, vector<64x16xbf16>, vector<32x64xf32> -> vector<32x64xf32>
    "tpu.trace_stop"() : () -> ()
    %18 = vector.broadcast %4 : vector<1x64xf32> to vector<32x64xf32>
    %19 = arith.addf %17, %18 : vector<32x64xf32>
    %cst_10 = arith.constant dense<0xFF800000> : vector<32xf32>
    %20 = vector.multi_reduction <maximumf>, %19, %cst_10 [1] : vector<32x64xf32> to vector<32xf32>
    %21 = vector.shape_cast %20 : vector<32xf32> to vector<32x1xf32>
    %22 = vector.broadcast %21 : vector<32x1xf32> to vector<32x64xf32>
    %23 = arith.subf %19, %22 : vector<32x64xf32>
    %24 = math.exp %23 : vector<32x64xf32>
    %cst_11 = arith.constant dense<0.000000e+00> : vector<32xf32>
    %25 = vector.multi_reduction <add>, %24, %cst_11 [1] : vector<32x64xf32> to vector<32xf32>
    %26 = vector.shape_cast %25 : vector<32xf32> to vector<32x1xf32>
    %27 = tpu.reciprocal %26 {approx = true} : vector<32x1xf32> -> vector<32x1xf32>
    %28 = vector.broadcast %27 : vector<32x1xf32> to vector<32x64xf32>
    %29 = arith.mulf %24, %28 : vector<32x64xf32>
    %30 = arith.truncf %29 : vector<32x64xf32> to vector<32x64xbf16>
    %cst_12 = arith.constant dense<0.000000e+00> : vector<32x16xf32>
    %31 = tpu.matmul %30, %16, %cst_12 {dimension_numbers = #tpu.dot_dimension_numbers<[1], [0], [0], [1], [0, 0, 1, 1], [], []>} : vector<32x64xbf16>, vector<64x16xbf16>, vector<32x16xf32> -> vector<32x16xf32>
    %32 = arith.truncf %31 : vector<32x16xf32> to vector<32x16xbf16>
    %c0_13 = arith.constant 0 : index
    %c0_14 = arith.constant 0 : index
    %33 = vector.load %arg7[%c0_13, %c0_14] : memref<128x128xbf16, #tpu.memory_space<vmem>>, vector<16x128xbf16>
    %cst_15 = arith.constant dense<0.000000e+00> : vector<32x128xf32>
    %34 = tpu.matmul %32, %33, %cst_15 {dimension_numbers = #tpu.dot_dimension_numbers<[1], [0], [0], [1], [0, 0, 1, 1], [], []>} : vector<32x16xbf16>, vector<16x128xbf16>, vector<32x128xf32> -> vector<32x128xf32>
    %35 = arith.addf %13, %34 : vector<32x128xf32>
    %36 = vector.extract_strided_slice %10 {offsets = [0, 16], sizes = [32, 16], strides = [1, 1]} : vector<32x128xbf16> to vector<32x16xbf16>
    %37 = vector.extract_strided_slice %11 {offsets = [0, 16], sizes = [64, 16], strides = [1, 1]} : vector<64x128xbf16> to vector<64x16xbf16>
    %38 = vector.extract_strided_slice %12 {offsets = [0, 16], sizes = [64, 16], strides = [1, 1]} : vector<64x128xbf16> to vector<64x16xbf16>
    "tpu.trace_start"() <{level = 10 : i32, message = "qd,kd->qk"}> : () -> ()
    %cst_16 = arith.constant dense<0.000000e+00> : vector<32x64xf32>
    %39 = tpu.matmul %36, %37, %cst_16 {dimension_numbers = #tpu.dot_dimension_numbers<[1], [1], [0], [0], [0, 0, 1, 0], [], []>} : vector<32x16xbf16>, vector<64x16xbf16>, vector<32x64xf32> -> vector<32x64xf32>
    "tpu.trace_stop"() : () -> ()
    %40 = vector.broadcast %4 : vector<1x64xf32> to vector<32x64xf32>
    %41 = arith.addf %39, %40 : vector<32x64xf32>
    %cst_17 = arith.constant dense<0xFF800000> : vector<32xf32>
    %42 = vector.multi_reduction <maximumf>, %41, %cst_17 [1] : vector<32x64xf32> to vector<32xf32>
    %43 = vector.shape_cast %42 : vector<32xf32> to vector<32x1xf32>
    %44 = vector.broadcast %43 : vector<32x1xf32> to vector<32x64xf32>
    %45 = arith.subf %41, %44 : vector<32x64xf32>
    %46 = math.exp %45 : vector<32x64xf32>
    %cst_18 = arith.constant dense<0.000000e+00> : vector<32xf32>
    %47 = vector.multi_reduction <add>, %46, %cst_18 [1] : vector<32x64xf32> to vector<32xf32>
    %48 = vector.shape_cast %47 : vector<32xf32> to vector<32x1xf32>
    %49 = tpu.reciprocal %48 {approx = true} : vector<32x1xf32> -> vector<32x1xf32>
    %50 = vector.broadcast %49 : vector<32x1xf32> to vector<32x64xf32>
    %51 = arith.mulf %46, %50 : vector<32x64xf32>
    %52 = arith.truncf %51 : vector<32x64xf32> to vector<32x64xbf16>
    %cst_19 = arith.constant dense<0.000000e+00> : vector<32x16xf32>
    %53 = tpu.matmul %52, %38, %cst_19 {dimension_numbers = #tpu.dot_dimension_numbers<[1], [0], [0], [1], [0, 0, 1, 1], [], []>} : vector<32x64xbf16>, vector<64x16xbf16>, vector<32x16xf32> -> vector<32x16xf32>
    %54 = arith.truncf %53 : vector<32x16xf32> to vector<32x16xbf16>
    %c16 = arith.constant 16 : index
    %c0_20 = arith.constant 0 : index
    %55 = vector.load %arg7[%c16, %c0_20] : memref<128x128xbf16, #tpu.memory_space<vmem>>, vector<16x128xbf16>
    %cst_21 = arith.constant dense<0.000000e+00> : vector<32x128xf32>
    %56 = tpu.matmul %54, %55, %cst_21 {dimension_numbers = #tpu.dot_dimension_numbers<[1], [0], [0], [1], [0, 0, 1, 1], [], []>} : vector<32x16xbf16>, vector<16x128xbf16>, vector<32x128xf32> -> vector<32x128xf32>
    %57 = arith.addf %35, %56 : vector<32x128xf32>
    %58 = vector.extract_strided_slice %10 {offsets = [0, 32], sizes = [32, 16], strides = [1, 1]} : vector<32x128xbf16> to vector<32x16xbf16>
    %59 = vector.extract_strided_slice %11 {offsets = [0, 32], sizes = [64, 16], strides = [1, 1]} : vector<64x128xbf16> to vector<64x16xbf16>
    %60 = vector.extract_strided_slice %12 {offsets = [0, 32], sizes = [64, 16], strides = [1, 1]} : vector<64x128xbf16> to vector<64x16xbf16>
    "tpu.trace_start"() <{level = 10 : i32, message = "qd,kd->qk"}> : () -> ()
    %cst_22 = arith.constant dense<0.000000e+00> : vector<32x64xf32>
    %61 = tpu.matmul %58, %59, %cst_22 {dimension_numbers = #tpu.dot_dimension_numbers<[1], [1], [0], [0], [0, 0, 1, 0], [], []>} : vector<32x16xbf16>, vector<64x16xbf16>, vector<32x64xf32> -> vector<32x64xf32>
    "tpu.trace_stop"() : () -> ()
    %62 = vector.broadcast %4 : vector<1x64xf32> to vector<32x64xf32>
    %63 = arith.addf %61, %62 : vector<32x64xf32>
    %cst_23 = arith.constant dense<0xFF800000> : vector<32xf32>
    %64 = vector.multi_reduction <maximumf>, %63, %cst_23 [1] : vector<32x64xf32> to vector<32xf32>
    %65 = vector.shape_cast %64 : vector<32xf32> to vector<32x1xf32>
    %66 = vector.broadcast %65 : vector<32x1xf32> to vector<32x64xf32>
    %67 = arith.subf %63, %66 : vector<32x64xf32>
    %68 = math.exp %67 : vector<32x64xf32>
    %cst_24 = arith.constant dense<0.000000e+00> : vector<32xf32>
    %69 = vector.multi_reduction <add>, %68, %cst_24 [1] : vector<32x64xf32> to vector<32xf32>
    %70 = vector.shape_cast %69 : vector<32xf32> to vector<32x1xf32>
    %71 = tpu.reciprocal %70 {approx = true} : vector<32x1xf32> -> vector<32x1xf32>
    %72 = vector.broadcast %71 : vector<32x1xf32> to vector<32x64xf32>
    %73 = arith.mulf %68, %72 : vector<32x64xf32>
    %74 = arith.truncf %73 : vector<32x64xf32> to vector<32x64xbf16>
    %cst_25 = arith.constant dense<0.000000e+00> : vector<32x16xf32>
    %75 = tpu.matmul %74, %60, %cst_25 {dimension_numbers = #tpu.dot_dimension_numbers<[1], [0], [0], [1], [0, 0, 1, 1], [], []>} : vector<32x64xbf16>, vector<64x16xbf16>, vector<32x16xf32> -> vector<32x16xf32>
    %76 = arith.truncf %75 : vector<32x16xf32> to vector<32x16xbf16>
    %c32 = arith.constant 32 : index
    %c0_26 = arith.constant 0 : index
    %77 = vector.load %arg7[%c32, %c0_26] : memref<128x128xbf16, #tpu.memory_space<vmem>>, vector<16x128xbf16>
    %cst_27 = arith.constant dense<0.000000e+00> : vector<32x128xf32>
    %78 = tpu.matmul %76, %77, %cst_27 {dimension_numbers = #tpu.dot_dimension_numbers<[1], [0], [0], [1], [0, 0, 1, 1], [], []>} : vector<32x16xbf16>, vector<16x128xbf16>, vector<32x128xf32> -> vector<32x128xf32>
    %79 = arith.addf %57, %78 : vector<32x128xf32>
    %80 = vector.extract_strided_slice %10 {offsets = [0, 48], sizes = [32, 16], strides = [1, 1]} : vector<32x128xbf16> to vector<32x16xbf16>
    %81 = vector.extract_strided_slice %11 {offsets = [0, 48], sizes = [64, 16], strides = [1, 1]} : vector<64x128xbf16> to vector<64x16xbf16>
    %82 = vector.extract_strided_slice %12 {offsets = [0, 48], sizes = [64, 16], strides = [1, 1]} : vector<64x128xbf16> to vector<64x16xbf16>
    "tpu.trace_start"() <{level = 10 : i32, message = "qd,kd->qk"}> : () -> ()
    %cst_28 = arith.constant dense<0.000000e+00> : vector<32x64xf32>
    %83 = tpu.matmul %80, %81, %cst_28 {dimension_numbers = #tpu.dot_dimension_numbers<[1], [1], [0], [0], [0, 0, 1, 0], [], []>} : vector<32x16xbf16>, vector<64x16xbf16>, vector<32x64xf32> -> vector<32x64xf32>
    "tpu.trace_stop"() : () -> ()
    %84 = vector.broadcast %4 : vector<1x64xf32> to vector<32x64xf32>
    %85 = arith.addf %83, %84 : vector<32x64xf32>
    %cst_29 = arith.constant dense<0xFF800000> : vector<32xf32>
    %86 = vector.multi_reduction <maximumf>, %85, %cst_29 [1] : vector<32x64xf32> to vector<32xf32>
    %87 = vector.shape_cast %86 : vector<32xf32> to vector<32x1xf32>
    %88 = vector.broadcast %87 : vector<32x1xf32> to vector<32x64xf32>
    %89 = arith.subf %85, %88 : vector<32x64xf32>
    %90 = math.exp %89 : vector<32x64xf32>
    %cst_30 = arith.constant dense<0.000000e+00> : vector<32xf32>
    %91 = vector.multi_reduction <add>, %90, %cst_30 [1] : vector<32x64xf32> to vector<32xf32>
    %92 = vector.shape_cast %91 : vector<32xf32> to vector<32x1xf32>
    %93 = tpu.reciprocal %92 {approx = true} : vector<32x1xf32> -> vector<32x1xf32>
    %94 = vector.broadcast %93 : vector<32x1xf32> to vector<32x64xf32>
    %95 = arith.mulf %90, %94 : vector<32x64xf32>
    %96 = arith.truncf %95 : vector<32x64xf32> to vector<32x64xbf16>
    %cst_31 = arith.constant dense<0.000000e+00> : vector<32x16xf32>
    %97 = tpu.matmul %96, %82, %cst_31 {dimension_numbers = #tpu.dot_dimension_numbers<[1], [0], [0], [1], [0, 0, 1, 1], [], []>} : vector<32x64xbf16>, vector<64x16xbf16>, vector<32x16xf32> -> vector<32x16xf32>
    %98 = arith.truncf %97 : vector<32x16xf32> to vector<32x16xbf16>
    %c48 = arith.constant 48 : index
    %c0_32 = arith.constant 0 : index
    %99 = vector.load %arg7[%c48, %c0_32] : memref<128x128xbf16, #tpu.memory_space<vmem>>, vector<16x128xbf16>
    %cst_33 = arith.constant dense<0.000000e+00> : vector<32x128xf32>
    %100 = tpu.matmul %98, %99, %cst_33 {dimension_numbers = #tpu.dot_dimension_numbers<[1], [0], [0], [1], [0, 0, 1, 1], [], []>} : vector<32x16xbf16>, vector<16x128xbf16>, vector<32x128xf32> -> vector<32x128xf32>
    %101 = arith.addf %79, %100 : vector<32x128xf32>
    %102 = vector.extract_strided_slice %10 {offsets = [0, 64], sizes = [32, 16], strides = [1, 1]} : vector<32x128xbf16> to vector<32x16xbf16>
    %103 = vector.extract_strided_slice %11 {offsets = [0, 64], sizes = [64, 16], strides = [1, 1]} : vector<64x128xbf16> to vector<64x16xbf16>
    %104 = vector.extract_strided_slice %12 {offsets = [0, 64], sizes = [64, 16], strides = [1, 1]} : vector<64x128xbf16> to vector<64x16xbf16>
    "tpu.trace_start"() <{level = 10 : i32, message = "qd,kd->qk"}> : () -> ()
    %cst_34 = arith.constant dense<0.000000e+00> : vector<32x64xf32>
    %105 = tpu.matmul %102, %103, %cst_34 {dimension_numbers = #tpu.dot_dimension_numbers<[1], [1], [0], [0], [0, 0, 1, 0], [], []>} : vector<32x16xbf16>, vector<64x16xbf16>, vector<32x64xf32> -> vector<32x64xf32>
    "tpu.trace_stop"() : () -> ()
    %106 = vector.broadcast %4 : vector<1x64xf32> to vector<32x64xf32>
    %107 = arith.addf %105, %106 : vector<32x64xf32>
    %cst_35 = arith.constant dense<0xFF800000> : vector<32xf32>
    %108 = vector.multi_reduction <maximumf>, %107, %cst_35 [1] : vector<32x64xf32> to vector<32xf32>
    %109 = vector.shape_cast %108 : vector<32xf32> to vector<32x1xf32>
    %110 = vector.broadcast %109 : vector<32x1xf32> to vector<32x64xf32>
    %111 = arith.subf %107, %110 : vector<32x64xf32>
    %112 = math.exp %111 : vector<32x64xf32>
    %cst_36 = arith.constant dense<0.000000e+00> : vector<32xf32>
    %113 = vector.multi_reduction <add>, %112, %cst_36 [1] : vector<32x64xf32> to vector<32xf32>
    %114 = vector.shape_cast %113 : vector<32xf32> to vector<32x1xf32>
    %115 = tpu.reciprocal %114 {approx = true} : vector<32x1xf32> -> vector<32x1xf32>
    %116 = vector.broadcast %115 : vector<32x1xf32> to vector<32x64xf32>
    %117 = arith.mulf %112, %116 : vector<32x64xf32>
    %118 = arith.truncf %117 : vector<32x64xf32> to vector<32x64xbf16>
    %cst_37 = arith.constant dense<0.000000e+00> : vector<32x16xf32>
    %119 = tpu.matmul %118, %104, %cst_37 {dimension_numbers = #tpu.dot_dimension_numbers<[1], [0], [0], [1], [0, 0, 1, 1], [], []>} : vector<32x64xbf16>, vector<64x16xbf16>, vector<32x16xf32> -> vector<32x16xf32>
    %120 = arith.truncf %119 : vector<32x16xf32> to vector<32x16xbf16>
    %c64 = arith.constant 64 : index
    %c0_38 = arith.constant 0 : index
    %121 = vector.load %arg7[%c64, %c0_38] : memref<128x128xbf16, #tpu.memory_space<vmem>>, vector<16x128xbf16>
    %cst_39 = arith.constant dense<0.000000e+00> : vector<32x128xf32>
    %122 = tpu.matmul %120, %121, %cst_39 {dimension_numbers = #tpu.dot_dimension_numbers<[1], [0], [0], [1], [0, 0, 1, 1], [], []>} : vector<32x16xbf16>, vector<16x128xbf16>, vector<32x128xf32> -> vector<32x128xf32>
    %123 = arith.addf %101, %122 : vector<32x128xf32>
    %124 = vector.extract_strided_slice %10 {offsets = [0, 80], sizes = [32, 16], strides = [1, 1]} : vector<32x128xbf16> to vector<32x16xbf16>
    %125 = vector.extract_strided_slice %11 {offsets = [0, 80], sizes = [64, 16], strides = [1, 1]} : vector<64x128xbf16> to vector<64x16xbf16>
    %126 = vector.extract_strided_slice %12 {offsets = [0, 80], sizes = [64, 16], strides = [1, 1]} : vector<64x128xbf16> to vector<64x16xbf16>
    "tpu.trace_start"() <{level = 10 : i32, message = "qd,kd->qk"}> : () -> ()
    %cst_40 = arith.constant dense<0.000000e+00> : vector<32x64xf32>
    %127 = tpu.matmul %124, %125, %cst_40 {dimension_numbers = #tpu.dot_dimension_numbers<[1], [1], [0], [0], [0, 0, 1, 0], [], []>} : vector<32x16xbf16>, vector<64x16xbf16>, vector<32x64xf32> -> vector<32x64xf32>
    "tpu.trace_stop"() : () -> ()
    %128 = vector.broadcast %4 : vector<1x64xf32> to vector<32x64xf32>
    %129 = arith.addf %127, %128 : vector<32x64xf32>
    %cst_41 = arith.constant dense<0xFF800000> : vector<32xf32>
    %130 = vector.multi_reduction <maximumf>, %129, %cst_41 [1] : vector<32x64xf32> to vector<32xf32>
    %131 = vector.shape_cast %130 : vector<32xf32> to vector<32x1xf32>
    %132 = vector.broadcast %131 : vector<32x1xf32> to vector<32x64xf32>
    %133 = arith.subf %129, %132 : vector<32x64xf32>
    %134 = math.exp %133 : vector<32x64xf32>
    %cst_42 = arith.constant dense<0.000000e+00> : vector<32xf32>
    %135 = vector.multi_reduction <add>, %134, %cst_42 [1] : vector<32x64xf32> to vector<32xf32>
    %136 = vector.shape_cast %135 : vector<32xf32> to vector<32x1xf32>
    %137 = tpu.reciprocal %136 {approx = true} : vector<32x1xf32> -> vector<32x1xf32>
    %138 = vector.broadcast %137 : vector<32x1xf32> to vector<32x64xf32>
    %139 = arith.mulf %134, %138 : vector<32x64xf32>
    %140 = arith.truncf %139 : vector<32x64xf32> to vector<32x64xbf16>
    %cst_43 = arith.constant dense<0.000000e+00> : vector<32x16xf32>
    %141 = tpu.matmul %140, %126, %cst_43 {dimension_numbers = #tpu.dot_dimension_numbers<[1], [0], [0], [1], [0, 0, 1, 1], [], []>} : vector<32x64xbf16>, vector<64x16xbf16>, vector<32x16xf32> -> vector<32x16xf32>
    %142 = arith.truncf %141 : vector<32x16xf32> to vector<32x16xbf16>
    %c80 = arith.constant 80 : index
    %c0_44 = arith.constant 0 : index
    %143 = vector.load %arg7[%c80, %c0_44] : memref<128x128xbf16, #tpu.memory_space<vmem>>, vector<16x128xbf16>
    %cst_45 = arith.constant dense<0.000000e+00> : vector<32x128xf32>
    %144 = tpu.matmul %142, %143, %cst_45 {dimension_numbers = #tpu.dot_dimension_numbers<[1], [0], [0], [1], [0, 0, 1, 1], [], []>} : vector<32x16xbf16>, vector<16x128xbf16>, vector<32x128xf32> -> vector<32x128xf32>
    %145 = arith.addf %123, %144 : vector<32x128xf32>
    %146 = vector.extract_strided_slice %10 {offsets = [0, 96], sizes = [32, 16], strides = [1, 1]} : vector<32x128xbf16> to vector<32x16xbf16>
    %147 = vector.extract_strided_slice %11 {offsets = [0, 96], sizes = [64, 16], strides = [1, 1]} : vector<64x128xbf16> to vector<64x16xbf16>
    %148 = vector.extract_strided_slice %12 {offsets = [0, 96], sizes = [64, 16], strides = [1, 1]} : vector<64x128xbf16> to vector<64x16xbf16>
    "tpu.trace_start"() <{level = 10 : i32, message = "qd,kd->qk"}> : () -> ()
    %cst_46 = arith.constant dense<0.000000e+00> : vector<32x64xf32>
    %149 = tpu.matmul %146, %147, %cst_46 {dimension_numbers = #tpu.dot_dimension_numbers<[1], [1], [0], [0], [0, 0, 1, 0], [], []>} : vector<32x16xbf16>, vector<64x16xbf16>, vector<32x64xf32> -> vector<32x64xf32>
    "tpu.trace_stop"() : () -> ()
    %150 = vector.broadcast %4 : vector<1x64xf32> to vector<32x64xf32>
    %151 = arith.addf %149, %150 : vector<32x64xf32>
    %cst_47 = arith.constant dense<0xFF800000> : vector<32xf32>
    %152 = vector.multi_reduction <maximumf>, %151, %cst_47 [1] : vector<32x64xf32> to vector<32xf32>
    %153 = vector.shape_cast %152 : vector<32xf32> to vector<32x1xf32>
    %154 = vector.broadcast %153 : vector<32x1xf32> to vector<32x64xf32>
    %155 = arith.subf %151, %154 : vector<32x64xf32>
    %156 = math.exp %155 : vector<32x64xf32>
    %cst_48 = arith.constant dense<0.000000e+00> : vector<32xf32>
    %157 = vector.multi_reduction <add>, %156, %cst_48 [1] : vector<32x64xf32> to vector<32xf32>
    %158 = vector.shape_cast %157 : vector<32xf32> to vector<32x1xf32>
    %159 = tpu.reciprocal %158 {approx = true} : vector<32x1xf32> -> vector<32x1xf32>
    %160 = vector.broadcast %159 : vector<32x1xf32> to vector<32x64xf32>
    %161 = arith.mulf %156, %160 : vector<32x64xf32>
    %162 = arith.truncf %161 : vector<32x64xf32> to vector<32x64xbf16>
    %cst_49 = arith.constant dense<0.000000e+00> : vector<32x16xf32>
    %163 = tpu.matmul %162, %148, %cst_49 {dimension_numbers = #tpu.dot_dimension_numbers<[1], [0], [0], [1], [0, 0, 1, 1], [], []>} : vector<32x64xbf16>, vector<64x16xbf16>, vector<32x16xf32> -> vector<32x16xf32>
    %164 = arith.truncf %163 : vector<32x16xf32> to vector<32x16xbf16>
    %c96 = arith.constant 96 : index
    %c0_50 = arith.constant 0 : index
    %165 = vector.load %arg7[%c96, %c0_50] : memref<128x128xbf16, #tpu.memory_space<vmem>>, vector<16x128xbf16>
    %cst_51 = arith.constant dense<0.000000e+00> : vector<32x128xf32>
    %166 = tpu.matmul %164, %165, %cst_51 {dimension_numbers = #tpu.dot_dimension_numbers<[1], [0], [0], [1], [0, 0, 1, 1], [], []>} : vector<32x16xbf16>, vector<16x128xbf16>, vector<32x128xf32> -> vector<32x128xf32>
    %167 = arith.addf %145, %166 : vector<32x128xf32>
    %168 = vector.extract_strided_slice %10 {offsets = [0, 112], sizes = [32, 16], strides = [1, 1]} : vector<32x128xbf16> to vector<32x16xbf16>
    %169 = vector.extract_strided_slice %11 {offsets = [0, 112], sizes = [64, 16], strides = [1, 1]} : vector<64x128xbf16> to vector<64x16xbf16>
    %170 = vector.extract_strided_slice %12 {offsets = [0, 112], sizes = [64, 16], strides = [1, 1]} : vector<64x128xbf16> to vector<64x16xbf16>
    "tpu.trace_start"() <{level = 10 : i32, message = "qd,kd->qk"}> : () -> ()
    %cst_52 = arith.constant dense<0.000000e+00> : vector<32x64xf32>
    %171 = tpu.matmul %168, %169, %cst_52 {dimension_numbers = #tpu.dot_dimension_numbers<[1], [1], [0], [0], [0, 0, 1, 0], [], []>} : vector<32x16xbf16>, vector<64x16xbf16>, vector<32x64xf32> -> vector<32x64xf32>
    "tpu.trace_stop"() : () -> ()
    %172 = vector.broadcast %4 : vector<1x64xf32> to vector<32x64xf32>
    %173 = arith.addf %171, %172 : vector<32x64xf32>
    %cst_53 = arith.constant dense<0xFF800000> : vector<32xf32>
    %174 = vector.multi_reduction <maximumf>, %173, %cst_53 [1] : vector<32x64xf32> to vector<32xf32>
    %175 = vector.shape_cast %174 : vector<32xf32> to vector<32x1xf32>
    %176 = vector.broadcast %175 : vector<32x1xf32> to vector<32x64xf32>
    %177 = arith.subf %173, %176 : vector<32x64xf32>
    %178 = math.exp %177 : vector<32x64xf32>
    %cst_54 = arith.constant dense<0.000000e+00> : vector<32xf32>
    %179 = vector.multi_reduction <add>, %178, %cst_54 [1] : vector<32x64xf32> to vector<32xf32>
    %180 = vector.shape_cast %179 : vector<32xf32> to vector<32x1xf32>
    %181 = tpu.reciprocal %180 {approx = true} : vector<32x1xf32> -> vector<32x1xf32>
    %182 = vector.broadcast %181 : vector<32x1xf32> to vector<32x64xf32>
    %183 = arith.mulf %178, %182 : vector<32x64xf32>
    %184 = arith.truncf %183 : vector<32x64xf32> to vector<32x64xbf16>
    %cst_55 = arith.constant dense<0.000000e+00> : vector<32x16xf32>
    %185 = tpu.matmul %184, %170, %cst_55 {dimension_numbers = #tpu.dot_dimension_numbers<[1], [0], [0], [1], [0, 0, 1, 1], [], []>} : vector<32x64xbf16>, vector<64x16xbf16>, vector<32x16xf32> -> vector<32x16xf32>
    %186 = arith.truncf %185 : vector<32x16xf32> to vector<32x16xbf16>
    %c112 = arith.constant 112 : index
    %c0_56 = arith.constant 0 : index
    %187 = vector.load %arg7[%c112, %c0_56] : memref<128x128xbf16, #tpu.memory_space<vmem>>, vector<16x128xbf16>
    %cst_57 = arith.constant dense<0.000000e+00> : vector<32x128xf32>
    %188 = tpu.matmul %186, %187, %cst_57 {dimension_numbers = #tpu.dot_dimension_numbers<[1], [0], [0], [1], [0, 0, 1, 1], [], []>} : vector<32x16xbf16>, vector<16x128xbf16>, vector<32x128xf32> -> vector<32x128xf32>
    %189 = arith.addf %167, %188 : vector<32x128xf32>
    %c0_58 = arith.constant 0 : index
    %c0_59 = arith.constant 0 : index
    %190 = vector.load %arg8[%c0_58, %c0_59] : memref<1x128xf32, #tpu.memory_space<vmem>>, vector<1x128xf32>
    %191 = vector.broadcast %190 : vector<1x128xf32> to vector<32x128xf32>
    %192 = arith.addf %189, %191 : vector<32x128xf32>
    %193 = arith.addf %6, %192 : vector<32x128xf32>
    %c0_60 = arith.constant 0 : index
    %c0_61 = arith.constant 0 : index
    %194 = vector.load %arg9[%c0_60, %c0_61] : memref<1x128xf32, #tpu.memory_space<vmem>>, vector<1x128xf32>
    %c0_62 = arith.constant 0 : index
    %c0_63 = arith.constant 0 : index
    %195 = vector.load %arg10[%c0_62, %c0_63] : memref<1x128xf32, #tpu.memory_space<vmem>>, vector<1x128xf32>
    %cst_64 = arith.constant dense<0.000000e+00> : vector<32xf32>
    %196 = vector.multi_reduction <add>, %193, %cst_64 [1] : vector<32x128xf32> to vector<32xf32>
    %197 = vector.shape_cast %196 : vector<32xf32> to vector<32x1xf32>
    %cst_65 = arith.constant 1.280000e+02 : f32
    %198 = vector.broadcast %cst_65 : f32 to vector<32x1xf32>
    %199 = arith.divf %197, %198 : vector<32x1xf32>
    %200 = vector.broadcast %199 : vector<32x1xf32> to vector<32x128xf32>
    %201 = arith.subf %193, %200 : vector<32x128xf32>
    %202 = arith.mulf %201, %201 : vector<32x128xf32>
    %cst_66 = arith.constant dense<0.000000e+00> : vector<32xf32>
    %203 = vector.multi_reduction <add>, %202, %cst_66 [1] : vector<32x128xf32> to vector<32xf32>
    %204 = vector.shape_cast %203 : vector<32xf32> to vector<32x1xf32>
    %cst_67 = arith.constant 1.280000e+02 : f32
    %205 = vector.broadcast %cst_67 : f32 to vector<32x1xf32>
    %206 = arith.divf %204, %205 : vector<32x1xf32>
    %207 = vector.broadcast %199 : vector<32x1xf32> to vector<32x128xf32>
    %208 = arith.subf %193, %207 : vector<32x128xf32>
    %cst_68 = arith.constant 9.99999974E-6 : f32
    %209 = vector.broadcast %cst_68 : f32 to vector<32x1xf32>
    %210 = arith.addf %206, %209 : vector<32x1xf32>
    %211 = math.rsqrt %210 : vector<32x1xf32>
    %212 = vector.broadcast %211 : vector<32x1xf32> to vector<32x128xf32>
    %213 = arith.mulf %208, %212 : vector<32x128xf32>
    %214 = vector.broadcast %194 : vector<1x128xf32> to vector<32x128xf32>
    %215 = arith.mulf %213, %214 : vector<32x128xf32>
    %216 = vector.broadcast %195 : vector<1x128xf32> to vector<32x128xf32>
    %217 = arith.addf %215, %216 : vector<32x128xf32>
    %218 = arith.truncf %217 : vector<32x128xf32> to vector<32x128xbf16>
    %c0_69 = arith.constant 0 : index
    %c0_70 = arith.constant 0 : index
    %219 = vector.load %arg11[%c0_69, %c0_70] : memref<128x256xbf16, #tpu.memory_space<vmem>>, vector<128x256xbf16>
    %cst_71 = arith.constant dense<0.000000e+00> : vector<32x256xf32>
    %220 = tpu.matmul %218, %219, %cst_71 {dimension_numbers = #tpu.dot_dimension_numbers<[1], [0], [0], [1], [0, 0, 1, 1], [], []>} : vector<32x128xbf16>, vector<128x256xbf16>, vector<32x256xf32> -> vector<32x256xf32>
    %c0_72 = arith.constant 0 : index
    %c0_73 = arith.constant 0 : index
    %221 = vector.load %arg12[%c0_72, %c0_73] : memref<1x256xf32, #tpu.memory_space<vmem>>, vector<1x256xf32>
    %222 = vector.broadcast %221 : vector<1x256xf32> to vector<32x256xf32>
    %223 = arith.addf %220, %222 : vector<32x256xf32>
    %cst_74 = arith.constant 0.000000e+00 : f32
    %224 = vector.broadcast %cst_74 : f32 to vector<32x256xf32>
    %225 = arith.maximumf %223, %224 : vector<32x256xf32>
    %226 = arith.truncf %225 : vector<32x256xf32> to vector<32x256xbf16>
    %c0_75 = arith.constant 0 : index
    %c0_76 = arith.constant 0 : index
    %227 = vector.load %arg13[%c0_75, %c0_76] : memref<256x128xbf16, #tpu.memory_space<vmem>>, vector<256x128xbf16>
    %cst_77 = arith.constant dense<0.000000e+00> : vector<32x128xf32>
    %228 = tpu.matmul %226, %227, %cst_77 {dimension_numbers = #tpu.dot_dimension_numbers<[1], [0], [0], [1], [0, 0, 1, 1], [], []>} : vector<32x256xbf16>, vector<256x128xbf16>, vector<32x128xf32> -> vector<32x128xf32>
    %c0_78 = arith.constant 0 : index
    %c0_79 = arith.constant 0 : index
    %229 = vector.load %arg14[%c0_78, %c0_79] : memref<1x128xf32, #tpu.memory_space<vmem>>, vector<1x128xf32>
    %230 = vector.broadcast %229 : vector<1x128xf32> to vector<32x128xf32>
    %231 = arith.addf %228, %230 : vector<32x128xf32>
    %232 = arith.addf %217, %231 : vector<32x128xf32>
    %c0_80 = arith.constant 0 : index
    %c0_81 = arith.constant 0 : index
    %233 = vector.load %arg15[%c0_80, %c0_81] : memref<1x128xf32, #tpu.memory_space<vmem>>, vector<1x128xf32>
    %c0_82 = arith.constant 0 : index
    %c0_83 = arith.constant 0 : index
    %234 = vector.load %arg16[%c0_82, %c0_83] : memref<1x128xf32, #tpu.memory_space<vmem>>, vector<1x128xf32>
    %cst_84 = arith.constant dense<0.000000e+00> : vector<32xf32>
    %235 = vector.multi_reduction <add>, %232, %cst_84 [1] : vector<32x128xf32> to vector<32xf32>
    %236 = vector.shape_cast %235 : vector<32xf32> to vector<32x1xf32>
    %cst_85 = arith.constant 1.280000e+02 : f32
    %237 = vector.broadcast %cst_85 : f32 to vector<32x1xf32>
    %238 = arith.divf %236, %237 : vector<32x1xf32>
    %239 = vector.broadcast %238 : vector<32x1xf32> to vector<32x128xf32>
    %240 = arith.subf %232, %239 : vector<32x128xf32>
    %241 = arith.mulf %240, %240 : vector<32x128xf32>
    %cst_86 = arith.constant dense<0.000000e+00> : vector<32xf32>
    %242 = vector.multi_reduction <add>, %241, %cst_86 [1] : vector<32x128xf32> to vector<32xf32>
    %243 = vector.shape_cast %242 : vector<32xf32> to vector<32x1xf32>
    %cst_87 = arith.constant 1.280000e+02 : f32
    %244 = vector.broadcast %cst_87 : f32 to vector<32x1xf32>
    %245 = arith.divf %243, %244 : vector<32x1xf32>
    %246 = vector.broadcast %238 : vector<32x1xf32> to vector<32x128xf32>
    %247 = arith.subf %232, %246 : vector<32x128xf32>
    %cst_88 = arith.constant 9.99999974E-6 : f32
    %248 = vector.broadcast %cst_88 : f32 to vector<32x1xf32>
    %249 = arith.addf %245, %248 : vector<32x1xf32>
    %250 = math.rsqrt %249 : vector<32x1xf32>
    %251 = vector.broadcast %250 : vector<32x1xf32> to vector<32x128xf32>
    %252 = arith.mulf %247, %251 : vector<32x128xf32>
    %253 = vector.broadcast %233 : vector<1x128xf32> to vector<32x128xf32>
    %254 = arith.mulf %252, %253 : vector<32x128xf32>
    %255 = vector.broadcast %234 : vector<1x128xf32> to vector<32x128xf32>
    %256 = arith.addf %254, %255 : vector<32x128xf32>
    %c0_89 = arith.constant 0 : index
    %c0_90 = arith.constant 0 : index
    %c0_91 = arith.constant 0 : index
    %257 = vector.load %arg17[%c0_89, %c0_90, %c0_91] : memref<1x32x128xf32, #tpu.memory_space<vmem>>, vector<1x32x128xf32>
    %258 = vector.shape_cast %257 : vector<1x32x128xf32> to vector<32x128xf32>
    %259 = vector.shape_cast %256 : vector<32x128xf32> to vector<1x32x128xf32>
    tpu.vector_store %arg17[%c0_89, %c0_90, %c0_91], %259 {strides = array<i32>} : memref<1x32x128xf32, #tpu.memory_space<vmem>>, vector<1x32x128xf32>,
    return
  }
  func.func @transform_0(%arg0: i32, %arg1: i32) -> (i32, i32, i32) {
    %c0_i32 = arith.constant 0 : i32
    %c0_i32_0 = arith.constant 0 : i32
    return %arg0, %arg1, %c0_i32 : i32, i32, i32
  }
  func.func @transform_1(%arg0: i32, %arg1: i32) -> (i32, i32, i32) {
    %c0_i32 = arith.constant 0 : i32
    %c0_i32_0 = arith.constant 0 : i32
    %c0_i32_1 = arith.constant 0 : i32
    return %arg0, %c0_i32, %c0_i32_0 : i32, i32, i32
  }
  func.func @transform_2(%arg0: i32, %arg1: i32) -> (i32, i32, i32) {
    %c0_i32 = arith.constant 0 : i32
    %c0_i32_0 = arith.constant 0 : i32
    %c0_i32_1 = arith.constant 0 : i32
    return %arg0, %c0_i32, %c0_i32_0 : i32, i32, i32
  }
  func.func @transform_3(%arg0: i32, %arg1: i32) -> (i32, i32) {
    %c0_i32 = arith.constant 0 : i32
    %c0_i32_0 = arith.constant 0 : i32
    %c0_i32_1 = arith.constant 0 : i32
    return %c0_i32, %c0_i32_0 : i32, i32
  }
  func.func @transform_4(%arg0: i32, %arg1: i32) -> (i32, i32) {
    %c0_i32 = arith.constant 0 : i32
    %c0_i32_0 = arith.constant 0 : i32
    %c0_i32_1 = arith.constant 0 : i32
    return %c0_i32, %c0_i32_0 : i32, i32
  }
  func.func @transform_5(%arg0: i32, %arg1: i32) -> (i32, i32) {
    %c0_i32 = arith.constant 0 : i32
    %c0_i32_0 = arith.constant 0 : i32
    %c0_i32_1 = arith.constant 0 : i32
    return %c0_i32, %c0_i32_0 : i32, i32
  }
  func.func @transform_6(%arg0: i32, %arg1: i32) -> (i32, i32) {
    %c0_i32 = arith.constant 0 : i32
    %c0_i32_0 = arith.constant 0 : i32
    %c0_i32_1 = arith.constant 0 : i32
    return %c0_i32, %c0_i32_0 : i32, i32
  }
  func.func @transform_7(%arg0: i32, %arg1: i32) -> (i32, i32) {
    %c0_i32 = arith.constant 0 : i32
    %c0_i32_0 = arith.constant 0 : i32
    %c0_i32_1 = arith.constant 0 : i32
    return %c0_i32, %c0_i32_0 : i32, i32
  }
  func.func @transform_8(%arg0: i32, %arg1: i32) -> (i32, i32) {
    %c0_i32 = arith.constant 0 : i32
    %c0_i32_0 = arith.constant 0 : i32
    %c0_i32_1 = arith.constant 0 : i32
    return %c0_i32, %c0_i32_0 : i32, i32
  }
  func.func @transform_9(%arg0: i32, %arg1: i32) -> (i32, i32) {
    %c0_i32 = arith.constant 0 : i32
    %c0_i32_0 = arith.constant 0 : i32
    %c0_i32_1 = arith.constant 0 : i32
    return %c0_i32, %c0_i32_0 : i32, i32
  }
  func.func @transform_10(%arg0: i32, %arg1: i32) -> (i32, i32) {
    %c0_i32 = arith.constant 0 : i32
    %c0_i32_0 = arith.constant 0 : i32
    %c0_i32_1 = arith.constant 0 : i32
    return %c0_i32, %c0_i32_0 : i32, i32
  }
  func.func @transform_11(%arg0: i32, %arg1: i32) -> (i32, i32) {
    %c0_i32 = arith.constant 0 : i32
    %c0_i32_0 = arith.constant 0 : i32
    %c0_i32_1 = arith.constant 0 : i32
    return %c0_i32, %c0_i32_0 : i32, i32
  }
  func.func @transform_12(%arg0: i32, %arg1: i32) -> (i32, i32) {
    %c0_i32 = arith.constant 0 : i32
    %c0_i32_0 = arith.constant 0 : i32
    %c0_i32_1 = arith.constant 0 : i32
    return %c0_i32, %c0_i32_0 : i32, i32
  }
  func.func @transform_13(%arg0: i32, %arg1: i32) -> (i32, i32) {
    %c0_i32 = arith.constant 0 : i32
    %c0_i32_0 = arith.constant 0 : i32
    %c0_i32_1 = arith.constant 0 : i32
    return %c0_i32, %c0_i32_0 : i32, i32
  }
  func.func @transform_14(%arg0: i32, %arg1: i32) -> (i32, i32) {
    %c0_i32 = arith.constant 0 : i32
    %c0_i32_0 = arith.constant 0 : i32
    %c0_i32_1 = arith.constant 0 : i32
    return %c0_i32, %c0_i32_0 : i32, i32
  }
  func.func @transform_15(%arg0: i32, %arg1: i32) -> (i32, i32, i32) {
    %c0_i32 = arith.constant 0 : i32
    %c0_i32_0 = arith.constant 0 : i32
    return %arg0, %arg1, %c0_i32 : i32, i32, i32
  }
}

</mosaic_0001>

<bundles_post_ra>
// kernel: tpu_custom_call.1
= control target key start
LH: loop header
LB: loop body
LE: loop exit
PB: predicated region body
PF: predicated region fallthrough
CT: control target
= control target key end

     0   :  { %s7032_s0 = inlined_call_operand.hbm [shape: f32[2,64,128], index: 0, kind: input, shape index: {}]   ;;  %s7033_s1 = inlined_call_operand.hbm [shape: f32[2,64,128], index: 1, kind: input, shape index: {}]   ;;  %s7034_s2 = inlined_call_operand.hbm [shape: f32[2,1,64], index: 2, kind: input, shape index: {}]   ;;  %s7035_s3 = inlined_call_operand.hbm [shape: bf16[128,384], index: 3, kind: input, shape index: {}]   ;;  %s7036_s4 = inlined_call_operand.hbm [shape: f32[1,384], index: 4, kind: input, shape index: {}]   ;;  %s7037_s5 = inlined_call_operand.hbm [shape: bf16[128,128], index: 5, kind: input, shape index: {}]   ;;  %s7038_s6 = inlined_call_operand.hbm [shape: f32[1,128], index: 6, kind: input, shape index: {}]   ;;  %s7039_s7 = inlined_call_operand.hbm [shape: f32[1,128], index: 7, kind: input, shape index: {}]   ;;  %s7040_s8 = inlined_call_operand.hbm [shape: f32[1,128], index: 8, kind: input, shape index: {}]   ;;  %s7041_s9 = inlined_call_operand.hbm [shape: bf16[128,256], index: 9, kind: input, shape index: {}]   ;;  %s7042_s10 = inlined_call_operand.hbm [shape: f32[1,256], index: 10, kind: input, shape index: {}]   ;;  %s7043_s11 = inlined_call_operand.hbm [shape: bf16[256,128], index: 11, kind: input, shape index: {}]   ;;  %s7044_s12 = inlined_call_operand.hbm [shape: f32[1,128], index: 12, kind: input, shape index: {}]   ;;  %s7045_s13 = inlined_call_operand.hbm [shape: f32[1,128], index: 13, kind: input, shape index: {}]   ;;  %s7046_s14 = inlined_call_operand.hbm [shape: f32[1,128], index: 14, kind: input, shape index: {}]   ;;  %s7047_s15 = inlined_call_operand.hbm [shape: f32[2,64,128], index: 15, kind: output, shape index: {}]  }
   0x1   :  { %7080 = sst [smem:[#allocation44_spill]] %s7032_s0 }
   0x2   :  { %7081 = sst [smem:[#allocation45_spill]] %s7033_s1 }
   0x3   :  { %7082 = sst [smem:[#allocation46_spill]] %s7034_s2 }
   0x4   :  { %7083 = sst [smem:[#allocation47_spill]] %s7035_s3 }
   0x5   :  { %7084 = sst [smem:[#allocation48_spill]] %s7036_s4 }
   0x6   :  { %7085 = sst [smem:[#allocation49_spill]] %s7037_s5 }
   0x7   :  { %7086 = sst [smem:[#allocation50_spill]] %s7038_s6 }
   0x8   :  { %7087 = sst [smem:[#allocation51_spill]] %s7039_s7 }
   0x9   :  { %7088 = sst [smem:[#allocation52_spill]] %s7040_s8 }
   0xa   :  { %7089 = sst [smem:[#allocation53_spill]] %s7041_s9 }
   0xb   :  { %7090 = sst [smem:[#allocation54_spill]] %s7042_s10 }
   0xc   :  { %7091 = sst [smem:[#allocation55_spill]] %s7043_s11 }
   0xd   :  { %7092 = sst [smem:[#allocation56_spill]] %s7044_s12 }
   0xe   :  { %7093 = sst [smem:[#allocation57_spill]] %s7045_s13 }
   0xf   :  { %7094 = sst [smem:[#allocation58_spill]] %s7046_s14 }
  0x10   :  { %7095 = sst [smem:[#allocation59_spill]] %s7047_s15 }
  0x11   :  { %20 = vsyncpa [#allocation4], 0 }
  0x12   :  { %22 = vsyncpa [#allocation4 + $0x1], 0 }
  0x13   :  { %23 = vsyncpa [#allocation7], 0 }
  0x14   :  { %25 = vsyncpa [#allocation7 + $0x1], 0 }
  0x15   :  { %26 = vsyncpa [#allocation10], 0 }
  0x16   :  { %27 = vsyncpa [#allocation13], 0 }
  0x17   :  { %28 = vsyncpa [#allocation16], 0 }
  0x18   :  { %29 = vsyncpa [#allocation19], 0 }
  0x19   :  { %30 = vsyncpa [#allocation22], 0 }
  0x1a   :  { %31 = vsyncpa [#allocation25], 0 }
  0x1b   :  { %32 = vsyncpa [#allocation5], 0 }
  0x1c   :  { %34 = vsyncpa [#allocation5 + $0x1], 0  ;;  %s5820_s18 = smov 0   ;;  %s5822_s19 = smov 0  }
  0x1d   :  { %s5824_s20 = smov 0   ;;  %s5826_s21 = smov 0  }
  0x1e   :  { %s5828_s22 = smov 0   ;;  %s5830_s23 = smov 0  }
  0x1f   :  { %s5832_s24 = smov 0   ;;  %s5834_s25 = smov 0  }
  0x20   :  { %s5836_s26 = smov 0   ;;  %s5838_s27 = smov 0  }
  0x21   :  { %s5840_s28 = smov 0  }
  0x22 LB: > { %7096 = sst [smem:[#allocation37_spill]] %s5677_s21  ;;  %s5876_s29 = sadd.s32 4294967295, %s5705_s28   ;;  %s5705_s28 = sphi %s5840_s28, %s40_s28   ;;  %s5701_s27 = sphi %s5838_s27, %s7182_s27   ;;  %s5697_s26 = sphi %s5836_s26, %s7181_s26   ;;  %s5693_s25 = sphi %s5834_s25, %s7180_s25   ;;  %s5689_s24 = sphi %s5832_s24, %s7174_s24   ;;  %s5685_s23 = sphi %s5830_s23, %s7179_s23   ;;  %s5681_s22 = sphi %s5828_s22, %s7173_s22   ;;  %s5677_s21 = sphi %s5826_s21, %s7172_s21   ;;  %s5673_s20 = sphi %s5824_s20, %s7178_s20   ;;  %s5669_s19 = sphi %s5822_s19, %s7177_s19   ;;  %s5665_s18 = sphi %s5820_s18, %s7176_s18  }
  0x23   : > { %7097 = sst [smem:[#allocation38_spill]] %s5681_s22  ;;  %p3992_p0 = scmp.ge.s32.totalorder %s5705_s28, 1 }
  0x24   : > { %7098 = sst [smem:[#allocation39_spill]] %s5685_s23  ;;  %p7055_p1 = scmp.eq.s32.totalorder %s5876_s29, 0 }
  0x25   : > { %7099 = sst [smem:[#allocation40_spill]] %s5689_s24  ;;  %p417_p2 = scmp.lt.s32.totalorder %s5705_s28, 5 }
  0x26   : > { %7100 = sst [smem:[#allocation41_spill]] %s5693_s25  ;;  %s5707_s16 = smov [#allocation9]  }
  0x27   : > { %7101 = sst [smem:[#allocation42_spill]] %s5697_s26  ;;  %p5881_p3 = pnand %p3992_p0, %p417_p2 }
  0x28   : > { %s429_s17 = sshll.u32 %s5707_s16, 4  ;;  %s5708_s25 = smov [#allocation12]   ;;  %s430_s17 = int_to_ptr.vmem [resolvable:$true] %s429_s17 }
  0x29   : > { %s7102_s30 = scalar_select %p5881_p3, 1, 0 }
  0x2a   : > { %p4700_p4 = pneg %p5881_p3  ;;  %s453_s24 = sshll.u32 %s5708_s25, 4  ;;  %s5893_s24 = int_to_ptr.vmem [resolvable:$true] %s453_s24 }
  0x2b   : > { %7103 = sst [smem:[#allocation43_spill]] %s7102_s30  ;;  %s7105_s3 = sld [smem:[#allocation47_spill]] }
  0x2c   : > { %p5889_p5 = pnand %p4700_p4, %p7055_p1 }
  0x2e   : > { %s7104_s15 = scalar_select %p5889_p5, 1, 0 }
  0x2f   : > { %p5903_p7 = pneg %p5889_p5 }
  0x31   : > { %s5129_s21 = scalar_lea.hbm %s7105_s3, 3072 }
  0x32   : > { %p5130_p6 = scmp.ne.s32.totalorder %s7105_s3, %s5129_s21  ;;  %p5136_p10 = scmp.lt.u32.totalorder %s5129_s21, %s7105_s3 }
  0x34   : > { %p5132_p8 = pnand %p5903_p7, %p5130_p6 }
  0x36   : > { %p5133_p9 = pneg %p5132_p8 }
  0x38   : > { %p5138_p11 = pnand %p5136_p10, %p5133_p9 }
  0x3a   : > { %5141 = shalt.err (!%p5138_p11)
}
  0x3b   : > { %s5142_s0 = scalar_lea.vmem %s430_s17, 3072  ;;  %p5150_p2 = scmp.lt.s32.totalorder %s430_s17, %s430_s17 }
  0x3c   : > { %p5143_p12 = scmp.ne.s32.totalorder %s430_s17, %s5142_s0  ;;  %p5151_p4 = scmp.lt.s32.totalorder %s5142_s0, %s5142_s0 }
  0x3e   : > { %p5145_p13 = pnand %p5143_p12, %p5903_p7  ;;  %p5152_p1 = por %p5151_p4, %p5150_p2 }
  0x40   : > { %p5146_p0 = pneg %p5145_p13 }
  0x42   : > { %p5153_p3 = pnand %p5152_p1, %p5146_p0 }
  0x44   : > { %5156 = shalt.err (!%p5153_p3)
}
  0x45   : > { %s5709_s2 = smov 192   ;;  %s5710_s22 = smov 12  }
  0x46   : > { %4703 = dma.hbm_to_vmem [thread:$0]  (!%p5889_p5), %s7105_s3, 3072, %s430_s17, [#allocation10], %s5709_s2, %s5709_s2, %s5710_s22  }
  0x47   : > { %s7107_s5 = sld [smem:[#allocation49_spill]] }
  0x4d   : > { %s5157_s26 = scalar_lea.hbm %s7107_s5, 1024 }
  0x4e   : > { %p5158_p6 = scmp.ne.s32.totalorder %s7107_s5, %s5157_s26  ;;  %p5164_p8 = scmp.lt.u32.totalorder %s5157_s26, %s7107_s5 }
  0x50   : > { %p5160_p1 = pnand %p5158_p6, %p5903_p7 }
  0x52   : > { %p5161_p3 = pneg %p5160_p1 }
  0x54   : > { %p5166_p9 = pnand %p5164_p8, %p5161_p3 }
  0x56   : > { %5169 = shalt.err (!%p5166_p9)
}
  0x57   : > { %s5170_s17 = scalar_lea.vmem %s5893_s24, 1024  ;;  %p5178_p13 = scmp.lt.s32.totalorder %s5893_s24, %s5893_s24 }
  0x58   : > { %p5171_p10 = scmp.ne.s32.totalorder %s5893_s24, %s5170_s17  ;;  %p5179_p0 = scmp.lt.s32.totalorder %s5170_s17, %s5170_s17 }
  0x5a   : > { %p5173_p11 = pnand %p5171_p10, %p5903_p7  ;;  %p5180_p2 = por %p5179_p0, %p5178_p13 }
  0x5c   : > { %p5174_p12 = pneg %p5173_p11 }
  0x5e   : > { %p5181_p4 = pnand %p5180_p2, %p5174_p12 }
  0x60   : > { %5184 = shalt.err (!%p5181_p4)
}
  0x61   : > { %s7061_s12 = smov 64   ;;  %s7062_s10 = smov 4  }
  0x62   : > { %4709 = dma.hbm_to_vmem [thread:$0]  (!%p5889_p5), %s7107_s5, 1024, %s5893_s24, [#allocation13], %s7061_s12, %s7061_s12, %s7062_s10  }
  0x63   : > { %s5713_s2 = smov [#allocation15]   ;;  %s5714_s23 = smov [#allocation18]  }
  0x64   : > { %s478_s22 = sshll.u32 %s5713_s2, 4  ;;  %s499_s21 = sshll.u32 %s5714_s23, 4  ;;  %s479_s22 = int_to_ptr.vmem [resolvable:$true] %s478_s22  ;;  %s5945_s21 = int_to_ptr.vmem [resolvable:$true] %s499_s21 }
  0x65   : > { %s7108_s7 = sld [smem:[#allocation51_spill]] }
  0x6b   : > { %s5185_s0 = scalar_lea.hbm %s7108_s7, 16 }
  0x6c   : > { %p5186_p6 = scmp.ne.s32.totalorder %s7108_s7, %s5185_s0  ;;  %p5192_p8 = scmp.lt.u32.totalorder %s5185_s0, %s7108_s7 }
  0x6e   : > { %p5188_p1 = pnand %p5186_p6, %p5903_p7 }
  0x70   : > { %p5189_p3 = pneg %p5188_p1 }
  0x72   : > { %p5194_p9 = pnand %p5192_p8, %p5189_p3 }
  0x74   : > { %5197 = shalt.err (!%p5194_p9)
}
  0x75   : > { %s5198_s26 = scalar_lea.vmem %s479_s22, 16  ;;  %s5205_s2 = scalar_lea.vmem %s479_s22, 32 }
  0x76   : > { %p5199_p10 = scmp.ne.s32.totalorder %s479_s22, %s5198_s26  ;;  %p5206_p13 = scmp.lt.s32.totalorder %s479_s22, %s479_s22 }
  0x77   : > { %p5207_p0 = scmp.lt.s32.totalorder %s5205_s2, %s5198_s26 }
  0x78   : > { %p5201_p11 = pnand %p5199_p10, %p5903_p7 }
  0x79   : > { %p5208_p2 = por %p5207_p0, %p5206_p13 }
  0x7a   : > { %p5202_p12 = pneg %p5201_p11 }
  0x7c   : > { %p5209_p4 = pnand %p5208_p2, %p5202_p12 }
  0x7e   : > { %5212 = shalt.err (!%p5209_p4)
}
  0x7f   : > { %4715 = dma.hbm_to_vmem [thread:$0]  (!%p5889_p5), %s7108_s7, 16, %s479_s22, [#allocation16]  }
  0x80   : > { %s7109_s9 = sld [smem:[#allocation53_spill]] }
  0x86   : > { %s5213_s0 = scalar_lea.hbm %s7109_s9, 2048 }
  0x87   : > { %p5214_p6 = scmp.ne.s32.totalorder %s7109_s9, %s5213_s0  ;;  %p5220_p8 = scmp.lt.u32.totalorder %s5213_s0, %s7109_s9 }
  0x89   : > { %p5216_p1 = pnand %p5214_p6, %p5903_p7 }
  0x8b   : > { %p5217_p3 = pneg %p5216_p1 }
  0x8d   : > { %p5222_p9 = pnand %p5220_p8, %p5217_p3 }
  0x8f   : > { %5225 = shalt.err (!%p5222_p9)
}
  0x90   : > { %s5226_s22 = scalar_lea.vmem %s5945_s21, 2048  ;;  %p5234_p13 = scmp.lt.s32.totalorder %s5945_s21, %s5945_s21 }
  0x91   : > { %p5227_p10 = scmp.ne.s32.totalorder %s5945_s21, %s5226_s22  ;;  %p5235_p0 = scmp.lt.s32.totalorder %s5226_s22, %s5226_s22 }
  0x93   : > { %p5229_p11 = pnand %p5227_p10, %p5903_p7  ;;  %p5236_p2 = por %p5235_p0, %p5234_p13 }
  0x95   : > { %p5230_p12 = pneg %p5229_p11 }
  0x97   : > { %p5237_p4 = pnand %p5236_p2, %p5230_p12 }
  0x99   : > { %5240 = shalt.err (!%p5237_p4)
}
  0x9a   : > { %s7063_s2 = smov 128   ;;  %s7072_s3 = smov 8  }
  0x9b   : > { %4721 = dma.hbm_to_vmem [thread:$0]  (!%p5889_p5), %s7109_s9, 2048, %s5945_s21, [#allocation19], %s7063_s2, %s7063_s2, %s7072_s3  }
  0x9c   : > { %s5717_s25 = smov [#allocation21]   ;;  %s5718_s17 = smov [#allocation24]  }
  0x9d   : > { %s523_s0 = sshll.u32 %s5717_s25, 4  ;;  %s548_s14 = sshll.u32 %s5718_s17, 4  ;;  %s524_s0 = int_to_ptr.vmem [resolvable:$true] %s523_s0  ;;  %s5991_s14 = int_to_ptr.vmem [resolvable:$true] %s548_s14 }
  0x9e   : > { %s7110_s11 = sld [smem:[#allocation55_spill]] }
  0xa4   : > { %s5241_s22 = scalar_lea.hbm %s7110_s11, 2048 }
  0xa5   : > { %p5242_p6 = scmp.ne.s32.totalorder %s7110_s11, %s5241_s22  ;;  %p5248_p8 = scmp.lt.u32.totalorder %s5241_s22, %s7110_s11 }
  0xa7   : > { %p5244_p1 = pnand %p5242_p6, %p5903_p7 }
  0xa9   : > { %p5245_p3 = pneg %p5244_p1 }
  0xab   : > { %p5250_p9 = pnand %p5248_p8, %p5245_p3 }
  0xad   : > { %5253 = shalt.err (!%p5250_p9)
}
  0xae   : > { %s5254_s30 = scalar_lea.vmem %s524_s0, 2048  ;;  %p5262_p13 = scmp.lt.s32.totalorder %s524_s0, %s524_s0 }
  0xaf   : > { %p5255_p10 = scmp.ne.s32.totalorder %s524_s0, %s5254_s30  ;;  %p5263_p0 = scmp.lt.s32.totalorder %s5254_s30, %s5254_s30 }
  0xb1   : > { %p5257_p11 = pnand %p5255_p10, %p5903_p7  ;;  %p5264_p2 = por %p5263_p0, %p5262_p13 }
  0xb3   : > { %p5258_p12 = pneg %p5257_p11 }
  0xb5   : > { %p5265_p4 = pnand %p5264_p2, %p5258_p12 }
  0xb7   : > { %5268 = shalt.err (!%p5265_p4)
}
  0xb8   : > { %s7111_s12 = smov 4   ;;  %s7112_s10 = smov 64  }
  0xb9   : > { %4727 = dma.hbm_to_vmem [thread:$0]  (!%p5889_p5), %s7110_s11, 2048, %s524_s0, [#allocation22], %s7112_s10, %s7112_s10, %s7111_s12  }
  0xba   : > { %s7113_s13 = sld [smem:[#allocation57_spill]] }
  0xc0   : > { %s5269_s22 = scalar_lea.hbm %s7113_s13, 16 }
  0xc1   : > { %p5270_p6 = scmp.ne.s32.totalorder %s7113_s13, %s5269_s22  ;;  %p5276_p8 = scmp.lt.u32.totalorder %s5269_s22, %s7113_s13 }
  0xc3   : > { %p5272_p1 = pnand %p5270_p6, %p5903_p7 }
  0xc5   : > { %p5273_p3 = pneg %p5272_p1 }
  0xc7   : > { %p5278_p9 = pnand %p5276_p8, %p5273_p3 }
  0xc9   : > { %5281 = shalt.err (!%p5278_p9)
}
  0xca   : > { %s5282_s0 = scalar_lea.vmem %s5991_s14, 16  ;;  %s5289_s12 = scalar_lea.vmem %s5991_s14, 32 }
  0xcb   : > { %p5283_p10 = scmp.ne.s32.totalorder %s5991_s14, %s5282_s0  ;;  %p5290_p13 = scmp.lt.s32.totalorder %s5991_s14, %s5991_s14 }
  0xcc   : > { %p5291_p0 = scmp.lt.s32.totalorder %s5289_s12, %s5282_s0 }
  0xcd   : > { %p5285_p11 = pnand %p5283_p10, %p5903_p7 }
  0xce   : > { %p5292_p2 = por %p5291_p0, %p5290_p13 }
  0xcf   : > { %p5286_p12 = pneg %p5285_p11 }
  0xd1   : > { %p5293_p4 = pnand %p5292_p2, %p5286_p12 }
  0xd3   : > { %5296 = shalt.err (!%p5293_p4)
}
  0xd4   : > { %4733 = dma.hbm_to_vmem [thread:$0]  (!%p5889_p5), %s7113_s13, 16, %s5991_s14, [#allocation25]  }
  0xd5   : > { %p7067_p6 = scmp.eq.s32.totalorder %s5705_s28, 0  ;;  %p94_p1 = scmp.ne.s32.totalorder %s5673_s20, %s5669_s19 }
  0xd6   : > { %p100_p3 = scmp.ne.s32.totalorder %s5669_s19, %s5665_s18  ;;  %p7066_p8 = scmp.lt.s32.totalorder %s5705_s28, 4 }
  0xd7   : > { %s593_s17 = sand.u32 1, %s5705_s28   ;;  %p96_p9 = por %p94_p1, %p7067_p6 }
  0xd8   : > { %p7114_p10 = scmp.eq.s32.totalorder %s5876_s29, 0  ;;  %s7065_s26 = sand.u32 1, %s5673_s20  }
  0xd9   : > { %s4010_s22 = sshll.u32 %s7065_s26, 6  ;;  %s4158_s23 = sshll.u32 %s5701_s27, 10 }
  0xda   : > { %p6050_p11 = por %p100_p3, %p7114_p10  ;;  %s7116_s1 = sld [smem:[#allocation45_spill]] }
  0xdb   : > { %s597_s18 = scalar_lea.vmem [#allocation6], %s4010_s22  ;;  %p6065_p12 = pnand %p7066_p8, %p96_p9 }
  0xdc   : > { %s7115_s24 = scalar_select %p6050_p11, 1, 0 }
  0xdd   : > { %s604_s0 = sshll.u32 %s597_s18, 4  ;;  %s5719_s2 = smov [#allocation11]   ;;  %s6069_s0 = int_to_ptr.vmem [resolvable:$true] %s604_s0 }
  0xde   : > { %s7117_s12 = scalar_select %p6065_p12, 1, 0 }
  0xdf   : > { %s6071_s10 = sshll.u32 %s5719_s2, 4  ;;  %p7071_p0 = pneg %p6065_p12  ;;  %s444_s10 = int_to_ptr.vmem [resolvable:$true] %s6071_s10 }
  0xe0   : > { %s6061_s14 = scalar_lea.hbm %s7116_s1, %s4158_s23  ;;  %s6073_s23 = scalar_lea.sflag [#allocation7], %s593_s17 }
  0xe1   : > { %s5297_s21 = scalar_lea.hbm %s6061_s14, 1024  ;;  %s5302_s18 = scalar_lea.hbm %s7116_s1, 2048 }
  0xe2   : > { %p5298_p13 = scmp.ne.s32.totalorder %s6061_s14, %s5297_s21  ;;  %p5303_p1 = scmp.lt.u32.totalorder %s6061_s14, %s7116_s1 }
  0xe3   : > { %p5304_p3 = scmp.lt.u32.totalorder %s5302_s18, %s5297_s21  ;;  %p5306_p10 = scmp.lt.u32.totalorder %s5297_s21, %s6061_s14 }
  0xe4   : > { %p5300_p2 = pnand %p7071_p0, %p5298_p13 }
  0xe5   : > { %p5305_p9 = por %p5304_p3, %p5303_p1 }
  0xe6   : > { %p5301_p4 = pneg %p5300_p2 }
  0xe7   : > { %p5307_p8 = por %p5306_p10, %p5305_p9 }
  0xe9   : > { %p5308_p6 = pnand %p5307_p8, %p5301_p4 }
  0xeb   : > { %5311 = shalt.err (!%p5308_p6)
}
  0xec   : > { %s5312_s17 = scalar_lea.vmem %s6069_s0, 1024  ;;  %s5720_s2 = smov [#allocation6]  }
  0xed   : > { %p5313_p13 = scmp.ne.s32.totalorder %s6069_s0, %s5312_s17  ;;  %s5317_s22 = sshll.u32 %s5720_s2, 4  ;;  %s5318_s22 = int_to_ptr.vmem [resolvable:$false] %s5317_s22 }
  0xee   : > { %s5319_s25 = scalar_lea.vmem %s5318_s22, 2048  ;;  %p5320_p5 = scmp.lt.s32.totalorder %s6069_s0, %s5318_s22 }
  0xef   : > { %p5315_p2 = pnand %p5313_p13, %p7071_p0  ;;  %p5321_p1 = scmp.lt.s32.totalorder %s5319_s25, %s5312_s17 }
  0xf1   : > { %p5316_p11 = pneg %p5315_p2  ;;  %p5322_p3 = por %p5321_p1, %p5320_p5 }
  0xf3   : > { %p5323_p9 = pnand %p5322_p3, %p5316_p11 }
  0xf5   : > { %5326 = shalt.err (!%p5323_p9)
}
  0xf6   : > { %s7118_s26 = smov 128   ;;  %s7119_s4 = sld [smem:[#allocation48_spill]] }
  0xf7   : > { %4743 = dma.hbm_to_vmem [thread:$0]  (!%p6065_p12), %s6061_s14, 1024, %s6069_s0, %s6073_s23, %s7118_s26, %s7118_s26, %s7072_s3  }
  0xfc   : > { %s5327_s18 = scalar_lea.hbm %s7119_s4, 48 }
  0xfd   : > { %p5328_p5 = scmp.ne.s32.totalorder %s7119_s4, %s5327_s18  ;;  %p5334_p11 = scmp.lt.u32.totalorder %s5327_s18, %s7119_s4 }
  0xff   : > { %p5330_p6 = pnand %p5328_p5, %p5903_p7 }
 0x101   : > { %p5331_p8 = pneg %p5330_p6 }
 0x103   : > { %p5336_p4 = pnand %p5334_p11, %p5331_p8 }
 0x105   : > { %5339 = shalt.err (!%p5336_p4)
}
 0x106   : > { %s5340_s1 = scalar_lea.vmem %s444_s10, 48  ;;  %s5347_s14 = scalar_lea.vmem %s444_s10, 64 }
 0x107   : > { %p5341_p10 = scmp.ne.s32.totalorder %s444_s10, %s5340_s1  ;;  %p5348_p1 = scmp.lt.s32.totalorder %s444_s10, %s444_s10 }
 0x108   : > { %p5349_p3 = scmp.lt.s32.totalorder %s5347_s14, %s5340_s1 }
 0x109   : > { %p5343_p13 = pnand %p5341_p10, %p5903_p7 }
 0x10a   : > { %p5350_p9 = por %p5349_p3, %p5348_p1 }
 0x10b   : > { %p5344_p2 = pneg %p5343_p13 }
 0x10d   : > { %p5351_p0 = pnand %p5350_p9, %p5344_p2 }
 0x10f   : > { %5354 = shalt.err (!%p5351_p0)
}
 0x110   : > { %p7120_p5 = scmp.ne.s32.totalorder %s7104_s15, 0  ;;  %s5721_s30 = smov [#allocation14]  }
 0x111   : > { %s467_s18 = sshll.u32 %s5721_s30, 4  ;;  %s5722_s17 = smov [#allocation17]   ;;  %s468_s18 = int_to_ptr.vmem [resolvable:$true] %s467_s18 }
 0x112   : > { %4706 = dma.hbm_to_vmem [thread:$0]  (!%p7120_p5), %s7119_s4, 48, %s444_s10, [#allocation10]  }
 0x113   : > { %s489_s2 = sshll.u32 %s5722_s17, 4  ;;  %s7121_s6 = sld [smem:[#allocation50_spill]]  ;;  %s490_s2 = int_to_ptr.vmem [resolvable:$true] %s489_s2 }
 0x119   : > { %s5355_s3 = scalar_lea.hbm %s7121_s6, 16 }
 0x11a   : > { %p5356_p0 = scmp.ne.s32.totalorder %s7121_s6, %s5355_s3  ;;  %p5362_p11 = scmp.lt.u32.totalorder %s5355_s3, %s7121_s6 }
 0x11c   : > { %p5358_p6 = pnand %p5356_p0, %p5903_p7 }
 0x11e   : > { %p5359_p8 = pneg %p5358_p6 }
 0x120   : > { %p5364_p4 = pnand %p5362_p11, %p5359_p8 }
 0x122   : > { %5367 = shalt.err (!%p5364_p4)
}
 0x123   : > { %s5368_s10 = scalar_lea.vmem %s468_s18, 16  ;;  %s5375_s21 = scalar_lea.vmem %s468_s18, 32 }
 0x124   : > { %p5369_p10 = scmp.ne.s32.totalorder %s468_s18, %s5368_s10  ;;  %p5376_p1 = scmp.lt.s32.totalorder %s468_s18, %s468_s18 }
 0x125   : > { %p5377_p3 = scmp.lt.s32.totalorder %s5375_s21, %s5368_s10 }
 0x126   : > { %p5371_p13 = pnand %p5369_p10, %p5903_p7 }
 0x127   : > { %p5378_p9 = por %p5377_p3, %p5376_p1 }
 0x128   : > { %p5372_p2 = pneg %p5371_p13 }
 0x12a   : > { %p5379_p12 = pnand %p5378_p9, %p5372_p2 }
 0x12c   : > { %5382 = shalt.err (!%p5379_p12)
}
 0x12d   : > { %4712 = dma.hbm_to_vmem [thread:$0]  (!%p7120_p5), %s7121_s6, 16, %s468_s18, [#allocation13]  }
 0x12e   : > { %s7122_s8 = sld [smem:[#allocation52_spill]] }
 0x134   : > { %s5383_s22 = scalar_lea.hbm %s7122_s8, 16 }
 0x135   : > { %p5384_p0 = scmp.ne.s32.totalorder %s7122_s8, %s5383_s22  ;;  %p5390_p12 = scmp.lt.u32.totalorder %s5383_s22, %s7122_s8 }
 0x137   : > { %p5386_p6 = pnand %p5384_p0, %p5903_p7 }
 0x139   : > { %p5387_p8 = pneg %p5386_p6 }
 0x13b   : > { %p5392_p11 = pnand %p5390_p12, %p5387_p8 }
 0x13d   : > { %5395 = shalt.err (!%p5392_p11)
}
 0x13e   : > { %s5396_s10 = scalar_lea.vmem %s490_s2, 16  ;;  %s5403_s18 = scalar_lea.vmem %s490_s2, 32 }
 0x13f   : > { %p5397_p4 = scmp.ne.s32.totalorder %s490_s2, %s5396_s10  ;;  %p5404_p2 = scmp.lt.s32.totalorder %s490_s2, %s490_s2 }
 0x140   : > { %p5405_p1 = scmp.lt.s32.totalorder %s5403_s18, %s5396_s10 }
 0x141   : > { %p5399_p10 = pnand %p5397_p4, %p5903_p7 }
 0x142   : > { %p5406_p3 = por %p5405_p1, %p5404_p2 }
 0x143   : > { %p5400_p13 = pneg %p5399_p10 }
 0x145   : > { %p5407_p9 = pnand %p5406_p3, %p5400_p13 }
 0x147   : > { %5410 = shalt.err (!%p5407_p9)
}
 0x148   : > { %4718 = dma.hbm_to_vmem [thread:$0]  (!%p7120_p5), %s7122_s8, 16, %s490_s2, [#allocation16]  }
 0x149   : > { %s5723_s17 = smov [#allocation20]   ;;  %s5724_s3 = smov [#allocation23]  }
 0x14a   : > { %s513_s5 = sshll.u32 %s5723_s17, 4  ;;  %s537_s22 = sshll.u32 %s5724_s3, 4  ;;  %s514_s5 = int_to_ptr.vmem [resolvable:$true] %s513_s5  ;;  %s538_s22 = int_to_ptr.vmem [resolvable:$true] %s537_s22 }
 0x14b   : > { %s7123_s14 = sld [smem:[#allocation54_spill]] }
 0x151   : > { %s5411_s0 = scalar_lea.hbm %s7123_s14, 32 }
 0x152   : > { %p5412_p0 = scmp.ne.s32.totalorder %s7123_s14, %s5411_s0  ;;  %p5418_p12 = scmp.lt.u32.totalorder %s5411_s0, %s7123_s14 }
 0x154   : > { %p5414_p6 = pnand %p5412_p0, %p5903_p7 }
 0x156   : > { %p5415_p8 = pneg %p5414_p6 }
 0x158   : > { %p5420_p11 = pnand %p5418_p12, %p5415_p8 }
 0x15a   : > { %5423 = shalt.err (!%p5420_p11)
}
 0x15b   : > { %s5424_s2 = scalar_lea.vmem %s514_s5, 32  ;;  %p5432_p2 = scmp.lt.s32.totalorder %s514_s5, %s514_s5 }
 0x15c   : > { %p5425_p4 = scmp.ne.s32.totalorder %s514_s5, %s5424_s2  ;;  %p5433_p1 = scmp.lt.s32.totalorder %s5424_s2, %s5424_s2 }
 0x15e   : > { %p5427_p10 = pnand %p5425_p4, %p5903_p7  ;;  %p5434_p3 = por %p5433_p1, %p5432_p2 }
 0x160   : > { %p5428_p13 = pneg %p5427_p10 }
 0x162   : > { %p5435_p9 = pnand %p5434_p3, %p5428_p13 }
 0x164   : > { %5438 = shalt.err (!%p5435_p9)
}
 0x165   : > { %4724 = dma.hbm_to_vmem [thread:$0]  (!%p7120_p5), %s7123_s14, 32, %s514_s5, [#allocation19]  }
 0x166   : > { %s7124_s25 = sld [smem:[#allocation56_spill]] }
 0x16c   : > { %s7125_s1 = smov %s7124_s25  ;;  %s5439_s0 = scalar_lea.hbm %s7124_s25, 16 }
 0x16d   : > { %p5440_p0 = scmp.ne.s32.totalorder %s7125_s1, %s5439_s0  ;;  %p5446_p12 = scmp.lt.u32.totalorder %s5439_s0, %s7125_s1 }
 0x16f   : > { %p5442_p6 = pnand %p5440_p0, %p5903_p7 }
 0x171   : > { %p5443_p8 = pneg %p5442_p6 }
 0x173   : > { %p5448_p11 = pnand %p5446_p12, %p5443_p8 }
 0x175   : > { %5451 = shalt.err (!%p5448_p11)
}
 0x176   : > { %s5452_s30 = scalar_lea.vmem %s538_s22, 16  ;;  %s5459_s5 = scalar_lea.vmem %s538_s22, 32 }
 0x177   : > { %p5453_p4 = scmp.ne.s32.totalorder %s538_s22, %s5452_s30  ;;  %p5460_p2 = scmp.lt.s32.totalorder %s538_s22, %s538_s22 }
 0x178   : > { %p5461_p1 = scmp.lt.s32.totalorder %s5459_s5, %s5452_s30 }
 0x179   : > { %p5455_p10 = pnand %p5453_p4, %p5903_p7 }
 0x17a   : > { %p5462_p3 = por %p5461_p1, %p5460_p2 }
 0x17b   : > { %p5456_p13 = pneg %p5455_p10 }
 0x17d   : > { %p5463_p9 = pnand %p5462_p3, %p5456_p13 }
 0x17f   : > { %5466 = shalt.err (!%p5463_p9)
}
 0x180   : > { %4730 = dma.hbm_to_vmem [thread:$0]  (!%p7120_p5), %s7125_s1, 16, %s538_s22, [#allocation22]  }
 0x181   : > { %s5725_s3 = smov [#allocation26]   ;;  %s7126_s18 = sld [smem:[#allocation58_spill]] }
 0x182   : > { %s559_s25 = sshll.u32 %s5725_s3, 4  ;;  %s560_s25 = int_to_ptr.vmem [resolvable:$true] %s559_s25 }
 0x187   : > { %s7127_s2 = smov %s7126_s18  ;;  %s5467_s21 = scalar_lea.hbm %s7126_s18, 16 }
 0x188   : > { %p5468_p0 = scmp.ne.s32.totalorder %s7127_s2, %s5467_s21  ;;  %p5474_p12 = scmp.lt.u32.totalorder %s5467_s21, %s7127_s2 }
 0x18a   : > { %p5470_p6 = pnand %p5468_p0, %p5903_p7 }
 0x18c   : > { %p5471_p8 = pneg %p5470_p6 }
 0x18e   : > { %p5476_p11 = pnand %p5474_p12, %p5471_p8 }
 0x190   : > { %5479 = shalt.err (!%p5476_p11)
}
 0x191   : > { %s5480_s22 = scalar_lea.vmem %s560_s25, 16  ;;  %s5487_s17 = scalar_lea.vmem %s560_s25, 32 }
 0x192   : > { %p5481_p4 = scmp.ne.s32.totalorder %s560_s25, %s5480_s22  ;;  %p5488_p2 = scmp.lt.s32.totalorder %s560_s25, %s560_s25 }
 0x193   : > { %p5489_p1 = scmp.lt.s32.totalorder %s5487_s17, %s5480_s22 }
 0x194   : > { %p5483_p10 = pnand %p5481_p4, %p5903_p7 }
 0x195   : > { %p5490_p3 = por %p5489_p1, %p5488_p2 }
 0x196   : > { %p5484_p13 = pneg %p5483_p10 }
 0x198   : > { %p5491_p9 = pnand %p5490_p3, %p5484_p13 }
 0x19a   : > { %5494 = shalt.err (!%p5491_p9)
}
 0x19b   : > { %s7128_s4 = sld [smem:[#allocation42_spill]]  ;;  %s7129_s3 = sld [smem:[#allocation39_spill]] }
 0x19c   : > { %s7130_s0 = sld [smem:[#allocation38_spill]]  ;;  %s7131_s16 = sld [smem:[#allocation37_spill]] }
 0x19d   : > { %4736 = dma.hbm_to_vmem [thread:$0]  (!%p7120_p5), %s7127_s2, 16, %s560_s25, [#allocation25]  }
 0x19e   : > { %s3991_s10 = sadd.s32 4294967294, %s5705_s28   ;;  %s52_s15 = sadd.s32 1, %s5701_s27 }
 0x19f   : > { %p7132_p6 = scmp.eq.s32.totalorder %s5705_s28, 0  ;;  %p404_p11 = scmp.eq.s32.totalorder %s5876_s29, 3 }
 0x1a0   : > { %p410_p4 = scmp.eq.s32.totalorder %s3991_s10, 3  ;;  %p7134_p10 = scmp.eq.s32.totalorder %s5876_s29, 0 }
 0x1a1   : > { %s49_s18 = sadd.s32 1, %s7128_s4  ;;  %s61_s21 = sadd.s32 1, %s7129_s3 }
 0x1a2   : > { %p50_p7 = scmp.ge.s32.totalorder %s49_s18, 2  ;;  %p68_p0 = scmp.ne.s32.totalorder %s7129_s3, %s7130_s0 }
 0x1a3   : > { %p74_p12 = scmp.ne.s32.totalorder %s7130_s0, %s7131_s16  ;;  %s570_s0 = sand.u32 1, %s7129_s3  }
 0x1a4   : > { %s7184_s18 = smov (%p50_p7, %s49_s18), 0  ;;  %s7186_s15 = smov (!%p50_p7, %s52_s15), %s5701_s27 }
 0x1a5   : > { %s57_s30 = ssub.s32 %s7128_s4, %s7184_s18  ;;  %p6226_p8 = por %p7132_p6, %p68_p0 }
 0x1a6   : > { %p54_p5 = scmp.ge.s32.totalorder %s7186_s15, 2  ;;  %p6237_p13 = por %p7134_p10, %p74_p12 }
 0x1a7   : > { %p6241_p2 = por %p404_p11, %p68_p0  ;;  %p6247_p1 = por %p410_p4, %p74_p12 }
 0x1a8   : > { %s7188_s15 = smov (%p54_p5, %s7186_s15), 0  ;;  %s7138_s16 = sadd.s32 1, %s5673_s20 }
 0x1a9   : > { %s7135_s5 = scalar_select %p6237_p13, 1, 0 }
 0x1aa   : > { %s7136_s22 = scalar_select %p6241_p2, 1, 0 }
 0x1ab   : > { %s56_s17 = ssub.s32 %s5701_s27, %s7188_s15  ;;  %s4006_s1 = sshll.u32 %s570_s0, 5 }
 0x1ac   : > { %s7137_s6 = scalar_select %p6247_p1, 1, 0 }
 0x1ad   : > { %s58_s7 = sor.u32 %s57_s30, %s56_s17  ;;  %p85_p3 = scmp.eq.s32.totalorder %s56_s17, 0 }
 0x1ae   : > { %p59_p9 = scmp.eq.s32.totalorder %s58_s7, 0  ;;  %s4007_s2 = sshll.u32 %s7128_s4, 2 }
 0x1af   : > { %s6255_s10 = scalar_select %p85_p3, %s5673_s20, %s7138_s16  }
 0x1b0   : > { %s7190_s3 = smov (!%p59_p9, %s7129_s3), %s61_s21  ;;  %s4008_s8 = sshll.u32 %s5701_s27, 3 }
 0x1b1   : > { %s574_s9 = scalar_lea.vmem [#allocation3], %s4006_s1  ;;  %s580_s13 = sadd.s32 %s4008_s8, %s4007_s2 }
 0x1b2   : > { %s583_s11 = sshll.u32 %s574_s9, 4  ;;  %s4009_s14 = sshll.u32 %s580_s13, 7  ;;  %s6262_s11 = int_to_ptr.vmem [resolvable:$true] %s583_s11 }
 0x1b3   : > { %p7139_p7 = scmp.lt.s32.totalorder %s5705_s28, 4  ;;  %s7141_s16 = sld [smem:[#allocation44_spill]] }
 0x1b4   : > { %s4013_s8 = sshll.u32 %s5701_s27, 4  ;;  %s6278_s9 = scalar_lea.sflag [#allocation4], %s570_s0 }
 0x1b5   : > { %p6268_p0 = pnand %p7139_p7, %p6226_p8 }
 0x1b7   : > { %p5497_p8 = pneg %p6268_p0 }
 0x1b9   : > { %s6275_s21 = scalar_lea.hbm %s7141_s16, %s4009_s14  ;;  %s5500_s14 = scalar_lea.hbm %s7141_s16, 2048 }
 0x1ba   : > { %s5495_s13 = scalar_lea.hbm %s6275_s21, 512  ;;  %p5501_p11 = scmp.lt.u32.totalorder %s6275_s21, %s7141_s16 }
 0x1bb   : > { %p5496_p6 = scmp.ne.s32.totalorder %s6275_s21, %s5495_s13  ;;  %p5502_p4 = scmp.lt.u32.totalorder %s5500_s14, %s5495_s13 }
 0x1bc   : > { %p5504_p3 = scmp.lt.u32.totalorder %s5495_s13, %s6275_s21 }
 0x1bd   : > { %p5498_p5 = pnand %p5497_p8, %p5496_p6  ;;  %p5503_p10 = por %p5502_p4, %p5501_p11 }
 0x1bf   : > { %p5499_p12 = pneg %p5498_p5  ;;  %p5505_p9 = por %p5504_p3, %p5503_p10 }
 0x1c1   : > { %p5506_p7 = pnand %p5505_p9, %p5499_p12 }
 0x1c3   : > { %5509 = shalt.err (!%p5506_p7)
}
 0x1c4   : > { %s5510_s0 = scalar_lea.vmem %s6262_s11, 512  ;;  %s5726_s17 = smov [#allocation3]  }
 0x1c5   : > { %p5511_p6 = scmp.ne.s32.totalorder %s6262_s11, %s5510_s0  ;;  %s5515_s7 = sshll.u32 %s5726_s17, 4  ;;  %s5516_s7 = int_to_ptr.vmem [resolvable:$false] %s5515_s7 }
 0x1c6   : > { %s5517_s1 = scalar_lea.vmem %s5516_s7, 1024  ;;  %p5518_p2 = scmp.lt.s32.totalorder %s6262_s11, %s5516_s7 }
 0x1c7   : > { %p5513_p5 = pnand %p5511_p6, %p5497_p8  ;;  %p5519_p11 = scmp.lt.s32.totalorder %s5517_s1, %s5510_s0 }
 0x1c9   : > { %p5514_p1 = pneg %p5513_p5  ;;  %p5520_p4 = por %p5519_p11, %p5518_p2 }
 0x1cb   : > { %p5521_p10 = pnand %p5520_p4, %p5514_p1 }
 0x1cd   : > { %5524 = shalt.err (!%p5521_p10)
}
 0x1ce   : > { %s7142_s13 = smov 8   ;;  %s7143_s4 = sld [smem:[#allocation46_spill]] }
 0x1cf   : > { %4740 = dma.hbm_to_vmem [thread:$0]  (!%p6268_p0), %s6275_s21, 512, %s6262_s11, %s6278_s9, %s7118_s26, %s7118_s26, %s7142_s13  }
 0x1d0   : > { %s7144_s0 = sand.u32 1, %s5673_s20   ;;  %p7145_p1 = scmp.ne.s32.totalorder %s7117_s12, 0 }
 0x1d1   : > { %s617_s30 = scalar_lea.vmem [#allocation8], %s7144_s0 }
 0x1d2   : > { %s624_s17 = sshll.u32 %s617_s30, 4  ;;  %p7146_p8 = pneg %p7145_p1  ;;  %s625_s17 = int_to_ptr.vmem [resolvable:$true] %s624_s17 }
 0x1d4   : > { %s6314_s25 = scalar_lea.hbm %s7143_s4, %s4013_s8  ;;  %s5530_s21 = scalar_lea.hbm %s7143_s4, 32 }
 0x1d5   : > { %s5525_s7 = scalar_lea.hbm %s6314_s25, 16  ;;  %p5531_p3 = scmp.lt.u32.totalorder %s6314_s25, %s7143_s4 }
 0x1d6   : > { %p5526_p2 = scmp.ne.s32.totalorder %s6314_s25, %s5525_s7  ;;  %p5532_p9 = scmp.lt.u32.totalorder %s5530_s21, %s5525_s7 }
 0x1d7   : > { %p5534_p6 = scmp.lt.u32.totalorder %s5525_s7, %s6314_s25 }
 0x1d8   : > { %p5528_p12 = pnand %p5526_p2, %p7146_p8  ;;  %p5533_p7 = por %p5532_p9, %p5531_p3 }
 0x1da   : > { %p5529_p0 = pneg %p5528_p12  ;;  %p5535_p5 = por %p5534_p6, %p5533_p7 }
 0x1dc   : > { %p5536_p11 = pnand %p5535_p5, %p5529_p0 }
 0x1de   : > { %5539 = shalt.err (!%p5536_p11)
}
 0x1df   : > { %s5540_s1 = scalar_lea.vmem %s625_s17, 16  ;;  %p7147_p10 = pmov %p7146_p8 }
 0x1e0   : > { %p5541_p4 = scmp.ne.s32.totalorder %s625_s17, %s5540_s1  ;;  %s5727_s13 = smov [#allocation8]  }
 0x1e1   : > { %s5545_s2 = sshll.u32 %s5727_s13, 4  ;;  %s5546_s2 = int_to_ptr.vmem [resolvable:$false] %s5545_s2 }
 0x1e2   : > { %p5543_p2 = pnand %p5541_p4, %p7147_p10  ;;  %s5547_s14 = scalar_lea.vmem %s5546_s2, 32 }
 0x1e3   : > { %p5548_p12 = scmp.lt.s32.totalorder %s625_s17, %s5546_s2  ;;  %p5549_p13 = scmp.lt.s32.totalorder %s5547_s14, %s5540_s1 }
 0x1e4   : > { %p5544_p8 = pneg %p5543_p2 }
 0x1e5   : > { %p5550_p3 = por %p5549_p13, %p5548_p12 }
 0x1e7   : > { %p5551_p9 = pnand %p5550_p3, %p5544_p8 }
 0x1e9   : > { %5554 = shalt.err (!%p5551_p9)
}
 0x1ea   : > { %4746 = dma.hbm_to_vmem [thread:$0]  (!%p7145_p1), %s6314_s25, 16, %s625_s17, %s6073_s23  }
 0x1eb   : > { %s7148_s0 = sld [smem:[#allocation43_spill]] }
 0x1f1   : > { %p7149_p0 = scmp.ne.s32.totalorder %s7148_s0, 0 }
 0x1f2   : > { %s7150_s30 = sld [smem:[#allocation38_spill]] (!%p7149_p0)  ;;  %p7151_p13 = scmp.ne.s32.totalorder (!%p7149_p0), %s7135_s5, 0 }
 0x1f3   : > { %633 = sbr.rel (%p7149_p0) target bundleno = 5989 (0x1765), region = 80 }
 0x1f8   : > { %s6341_s7 = sand.u32 (!%p7149_p0), 1, %s7150_s30  }
 0x1f9   : > { %s4015_s11 = sshll.u32 (!%p7149_p0), %s6341_s7, 5  ;;  %s636_s26 = scalar_lea.sflag (!%p7149_p0), [#allocation4], %s6341_s7 }
 0x1fa   : > { %s6345_s21 = scalar_lea.vmem [#allocation3], %s4015_s11 }
 0x1fb   : > { %5628 = dma.done.wait (%p7151_p13), %s636_s26, 512  }
 0x1fc   : > { %5630 = vsyncadd (%p7151_p13), %s636_s26, 4294966784  ;;  %s644_s12 = sand.u32 1, %s5876_s29   ;;  %s646_s23 = sand.u32 1, %s5669_s19  }
 0x1fd   : > { %s4016_s25 = sshll.u32 %s646_s23, 6  ;;  %s645_s17 = scalar_lea.sflag [#allocation7], %s644_s12 }
 0x1fe   : > { %s6353_s8 = scalar_lea.vmem [#allocation6], %s4016_s25  ;;  %p7152_p1 = scmp.ne.s32.totalorder %s7115_s24, 0 }
 0x200   : > { %5632 = dma.done.wait (%p7152_p1), %s645_s17, 1040  }
 0x201   : > { %5634 = vsyncadd (%p7152_p1), %s645_s17, 4294966256  ;;  %s6359_s9 = scalar_lea.vmem [#allocation8], %s646_s23  ;;  %p7153_p7 = scmp.eq.s32.totalorder %s5876_s29, 0 }
 0x203   : > { %5636 = dma.done.wait (%p7153_p7), [#allocation10], 3120   ;;  %p7154_p6 = pmov %p7153_p7 }
 0x205   : > { %5638 = vsyncadd (%p7154_p6), [#allocation10], 4294964176  ;;  %p7155_p5 = pmov %p7154_p6 }
 0x207   : > { %5640 = dma.done.wait (%p7155_p5), [#allocation13], 1040   ;;  %p7156_p11 = pmov %p7155_p5 }
 0x208   : > { %p7157_p4 = pmov %p7155_p5 }
 0x209   : > { %5642 = vsyncadd (%p7156_p11), [#allocation13], 4294966256 }
 0x20a   : > { %5644 = dma.done.wait (%p7157_p4), [#allocation16], 32   ;;  %p7158_p10 = pmov %p7157_p4 }
 0x20b   : > { %p7159_p2 = pmov %p7157_p4 }
 0x20c   : > { %5646 = vsyncadd (%p7158_p10), [#allocation16], 4294967264 }
 0x20d   : > { %5648 = dma.done.wait (%p7159_p2), [#allocation19], 2080   ;;  %p7160_p8 = pmov %p7159_p2 }
 0x20e   : > { %p7161_p12 = pmov %p7159_p2 }
 0x20f   : > { %5650 = vsyncadd (%p7160_p8), [#allocation19], 4294965216 }
 0x210   : > { %5652 = dma.done.wait (%p7161_p12), [#allocation22], 2064   ;;  %p7162_p3 = pmov %p7159_p2 }
 0x211   : > { %p7163_p9 = pmov %p7159_p2 }
 0x212   : > { %5654 = vsyncadd (%p7162_p3), [#allocation22], 4294965232 }
 0x213   : > { %5656 = dma.done.wait (%p7163_p9), [#allocation25], 32   ;;  %p7164_p0 = pmov %p7159_p2 }
 0x214   : > { %s6385_s24 = scalar_lea.vmem [#allocation27], %s4015_s11  ;;  %s7165_s5 = sld [smem:[#allocation40_spill]] }
 0x215   : > { %5658 = vsyncadd (%p7164_p0), [#allocation25], 4294967264 }
 0x21a   : > { %p4030_p13 = scmp.ne.s32.totalorder %s7165_s5, 0 }
 0x21b   : > { %v4894_v0 = vld [vmem:[#allocation9 + $0x4] ss:$12 sps:$4 sm:$0xff] (!%p4030_p13)   ;;  %v4896_v1 = vld [vmem:[#allocation9] ss:$12 sps:$4 sm:$0xff] (!%p4030_p13)   ;;  %v5728_v2 = vmov (!%p4030_p13), 0   ;;  %v770_v29 = vld [vmem:[%s6353_s8 + $0x18] sm:$0xff] (!%p4030_p13)  ;;  %v813_v37 = vlaneseq (!%p4030_p13) }
 0x21c   : > { %766 = sbr.rel (%p4030_p13) target bundleno = 816 (0x330), region = 144  ;;  %988 = vmatprep.mubr.bf16.mxu0 (!%p4030_p13), %v5728_v2  ;;  %956 = vmatprep.subr.bf16.mxu0 (!%p4030_p13), %v4894_v0  ;;  %v4897_v3 = vld [vmem:[#allocation9 + $0x1c] ss:$12 sps:$4 sm:$0xff] (!%p4030_p13)   ;;  %v4899_v4 = vld [vmem:[#allocation9 + $0x18] ss:$12 sps:$4 sm:$0xff] (!%p4030_p13)   ;;  %v769_v28 = vld [vmem:[%s6353_s8 + $0x10] sm:$0xff] (!%p4030_p13) }
 0x21d   : > { %957 = vmatpush1.bf16.msra.mxu0 (!%p4030_p13), %v4896_v1  ;;  %v4900_v5 = vld [vmem:[#allocation9 + $0x34] ss:$12 sps:$4 sm:$0xff] (!%p4030_p13)   ;;  %v4902_v7 = vld [vmem:[#allocation9 + $0x30] ss:$12 sps:$4 sm:$0xff] (!%p4030_p13)   ;;  %v4903_v8 = vld [vmem:[#allocation9 + $0x4c] ss:$12 sps:$4 sm:$0xff] (!%p4030_p13)   ;;  %v776_v32 = vpack.c.bf16 (!%p4030_p13), %v770_v29, %v769_v28 }
 0x21e   : > { %958 = vmatprep.subr.bf16.mxu0 (!%p4030_p13), %v4897_v3  ;;  %v4906_v6 = vld [vmem:[#allocation9 + $0x8] ss:$12 sps:$4 sm:$0xff] (!%p4030_p13)   ;;  %v4910_v9 = vld [vmem:[#allocation9 + $0x20] ss:$12 sps:$4 sm:$0xff] (!%p4030_p13)   ;;  %v4914_v10 = vld [vmem:[#allocation9 + $0x38] ss:$12 sps:$4 sm:$0xff] (!%p4030_p13)  }
 0x21f   : > { %4320 = vmatprep.subr.bf16.mxu1 (!%p4030_p13), %v4906_v6  ;;  %v4905_v11 = vld [vmem:[#allocation9 + $0x48] ss:$12 sps:$4 sm:$0xff] (!%p4030_p13)   ;;  %v4907_v12 = vld [vmem:[#allocation9 + $0x64] ss:$12 sps:$4 sm:$0xff] (!%p4030_p13)   ;;  %v4909_v13 = vld [vmem:[#allocation9 + $0x60] ss:$12 sps:$4 sm:$0xff] (!%p4030_p13)  }
 0x220   : > { %4321 = vmatpush3.bf16.msra.mxu1 (!%p4030_p13), %v4906_v6  ;;  %v4918_v14 = vld [vmem:[#allocation9 + $0x50] ss:$12 sps:$4 sm:$0xff] (!%p4030_p13)   ;;  %v768_v17 = vld [vmem:[%s6353_s8 + $0x8] sm:$0xff] (!%p4030_p13)  ;;  %v4915_v21 = vld [vmem:[#allocation9 + $0x94] ss:$12 sps:$4 sm:$0xff] (!%p4030_p13)   ;;  %v814_v38 = vshrl.u32 (!%p4030_p13), %v813_v37, 7 }
 0x221   : > { %959 = vmatpush1.bf16.msra.mxu0 (!%p4030_p13), %v4899_v4  ;;  %4322 = vmatprep.subr.bf16.mxu1 (!%p4030_p13), %v4910_v9  ;;  %v4911_v15 = vld [vmem:[#allocation9 + $0x7c] ss:$12 sps:$4 sm:$0xff] (!%p4030_p13)   ;;  %v4913_v20 = vld [vmem:[#allocation9 + $0x78] ss:$12 sps:$4 sm:$0xff] (!%p4030_p13)   ;;  %v4923_v22 = vld [vmem:[#allocation9 + $0x80] ss:$12 sps:$4 sm:$0xff] (!%p4030_p13)  }
 0x222   : > { %960 = vmatprep.subr.bf16.mxu0 (!%p4030_p13), %v4900_v5  ;;  %v767_v16 = vld [vmem:[%s6353_s8] sm:$0xff] (!%p4030_p13)  ;;  %v4922_v19 = vld [vmem:[#allocation9 + $0x68] ss:$12 sps:$4 sm:$0xff] (!%p4030_p13)   ;;  %v4919_v24 = vld [vmem:[#allocation9 + $0xac] ss:$12 sps:$4 sm:$0xff] (!%p4030_p13)   ;;  %v815_v39 = vsub.s32 (!%p4030_p13), 0, %v814_v38 }
 0x223   : > { %v775_v18 = vpack.c.bf16 %v768_v17, %v767_v16  ;;  %v4917_v23 = vld [vmem:[#allocation9 + $0x90] ss:$12 sps:$4 sm:$0xff]   ;;  %v4924_v25 = vld [vmem:[#allocation9 + $0x98] ss:$12 sps:$4 sm:$0xff]   ;;  %v4921_v26 = vld [vmem:[#allocation9 + $0xa8] ss:$12 sps:$4 sm:$0xff]  }
 0x224   : > { %4323 = vmatpush3.bf16.msra.mxu1 %v4910_v9  ;;  %v4925_v27 = vld [vmem:[#allocation9 + $0xb0] ss:$12 sps:$4 sm:$0xff]   ;;  %v772_v31 = vld [vmem:[%s6353_s8 + $0x28] sm:$0xff]  ;;  %v811_v40 = vld [vmem:[#allocation11] sm:$0x7]  ;;  %v819_v41 = vsub.s32 1, %v814_v38 }
 0x225   : > { %961 = vmatpush1.bf16.msra.mxu0 %v4902_v7  ;;  %4324 = vmatprep.subr.bf16.mxu1 %v4914_v10  ;;  %v771_v30 = vld [vmem:[%s6353_s8 + $0x20] sm:$0xff]  ;;  %v773_v34 = vld [vmem:[%s6353_s8 + $0x30] sm:$0xff]  ;;  %v774_v35 = vld [vmem:[%s6353_s8 + $0x38] sm:$0xff]  ;;  %v6400_v42 = vrot.slane %v811_v40, %v815_v39  ;;  %v823_v43 = vsub.s32 2, %v814_v38 }
 0x226   : > { %962 = vmatprep.subr.bf16.mxu0 %v4903_v8  ;;  %4336 = vmatprep.mubr.bf16.mxu1 %v775_v18  ;;  %v777_v33 = vpack.c.bf16 %v772_v31, %v771_v30  ;;  %v778_v36 = vpack.c.bf16 %v774_v35, %v773_v34  ;;  %v6402_v45 = vrot.slane %v811_v40, %v819_v41 }
 0x227   : > { %v824_v51 = vrot.slane %v811_v40, %v823_v43 }
 0x228   : > { %4325 = vmatpush3.bf16.msra.mxu1 %v4914_v10 }
 0x229   : > { %963 = vmatpush1.bf16.msra.mxu0 %v4905_v11  ;;  %4326 = vmatprep.subr.bf16.mxu1 %v4918_v14 }
 0x22a   : > { %964 = vmatprep.subr.bf16.mxu0 %v4907_v12 }
 0x22c   : > { %4327 = vmatpush3.bf16.msra.mxu1 %v4918_v14 }
 0x22d   : > { %965 = vmatpush1.bf16.msra.mxu0 %v4909_v13  ;;  %4328 = vmatprep.subr.bf16.mxu1 %v4922_v19 }
 0x22e   : > { %966 = vmatprep.subr.bf16.mxu0 %v4911_v15 }
 0x230   : > { %4329 = vmatpush3.bf16.msra.mxu1 %v4922_v19 }
 0x231   : > { %967 = vmatpush1.bf16.msra.mxu0 %v4913_v20  ;;  %4330 = vmatprep.subr.bf16.mxu1 %v4923_v22 }
 0x232   : > { %968 = vmatprep.subr.bf16.mxu0 %v4915_v21 }
 0x234   : > { %4331 = vmatpush3.bf16.msra.mxu1 %v4923_v22 }
 0x235   : > { %969 = vmatpush1.bf16.msra.mxu0 %v4917_v23  ;;  %4332 = vmatprep.subr.bf16.mxu1 %v4924_v25 }
 0x236   : > { %970 = vmatprep.subr.bf16.mxu0 %v4919_v24 }
 0x238   : > { %4333 = vmatpush3.bf16.msra.mxu1 %v4924_v25 }
 0x239   : > { %971 = vmatpush1.bf16.msra.mxu0 %v4921_v26  ;;  %4334 = vmatprep.subr.bf16.mxu1 %v4925_v27 }
 0x23c   : > { %989 = vmatmul.mubr.bf16.vlgmr.msra.gmra.mrb[0].mxu0 %v775_v18  ;;  %4335 = vmatpush3.bf16.msra.mxu1 %v4925_v27 }
 0x23d   : > { %998 = vmatprep.mubr.bf16.mxu0 %v5728_v2 }
 0x23f   : > { %4337 = vmatmul.mubr.bf16.vlgmr.msra.gmra.mrb[0].mxu1 %v776_v32 }
 0x240   : > { %4340 = vmatprep.mubr.bf16.mxu1 %v777_v33 }
 0x244   : > { %999 = vmatmul.mubr.bf16.gmra.mrb[4].mxu0 %v776_v32 }
 0x245   : > { %1008 = vmatprep.mubr.bf16.mxu0 %v5728_v2 }
 0x247   : > { %4341 = vmatmul.mubr.bf16.gmra.mrb[4].mxu1 %v778_v36 }
 0x24c   : > { %1009 = vmatmul.mubr.bf16.gmra.mrb[8].mxu0 %v777_v33 }
 0x24d   : > { %1018 = vmatprep.mubr.bf16.mxu0 %v5728_v2 }
 0x254   : > { %1019 = vmatmul.mubr.bf16.gmra.mrb[12].mxu0 %v778_v36 }
 0x30f   : > { %v990_v44 = vpop.f32.mrb[0].mxu0 }
 0x310   : > { %v992_v46 = vpop.f32.mrb[1].mxu0  ;;  %v991_v48 = vadd.f32 %v990_v44, %v6400_v42 }
 0x311   : > { %v994_v47 = vpop.f32.mrb[2].mxu0  ;;  %v993_v52 = vadd.f32 %v992_v46, %v6402_v45 }
 0x312   : > { %v995_v49 = vadd.f32 %v994_v47, %v6400_v42  ;;  %v996_v50 = vpop.f32.mrb[3].mxu0  ;;  %v4338_v56 = vpop.f32.mrb[0].mxu1 }
 0x313   : > { %v997_v53 = vadd.f32 %v996_v50, %v6402_v45  ;;  %v1072_v57 = vadd.f32 %v4338_v56, %v824_v51  ;;  %v1063_v58 = vpop.f32.mrb[1].mxu1 }
 0x314   : > { %v1094_v54 = vpack.c.bf16 %v995_v49, %v991_v48  ;;  %v1064_v60 = vadd.f32 %v1063_v58, %v824_v51  ;;  %v4339_v61 = vpop.f32.mrb[2].mxu1 }
 0x315   : > { %v1095_v55 = vpack.c.bf16 %v997_v53, %v993_v52  ;;  %v1075_v63 = vadd.f32 %v4339_v61, %v824_v51  ;;  %v1066_v0 = vpop.f32.mrb[3].mxu1 }
 0x316   : > { %1106 = vst [vmem:[#allocation2] sm:$0xff] %v1094_v54  ;;  %v1067_v2 = vadd.f32 %v1066_v0, %v824_v51 }
 0x317   : > { %1107 = vst [vmem:[#allocation2 + $0x8] sm:$0xff] %v1095_v55  ;;  %v1000_v59 = vpop.f32.mrb[4].mxu0  ;;  %v1099_v6 = vpack.c.bf16 %v1075_v63, %v1072_v57 }
 0x318   : > { %v1002_v62 = vpop.f32.mrb[5].mxu0  ;;  %v1001_v3 = vadd.f32 %v1000_v59, %v6400_v42  ;;  %v1096_v9 = vpack.c.bf16 %v1067_v2, %v1064_v60 }
 0x319   : > { %v1004_v1 = vpop.f32.mrb[6].mxu0  ;;  %v1003_v7 = vadd.f32 %v1002_v62, %v6402_v45  ;;  %1111 = vst [vmem:[#allocation2 + $0x28] sm:$0xff] %v1099_v6 }
 0x31a   : > { %v1005_v4 = vadd.f32 %v1004_v1, %v6400_v42  ;;  %v1006_v5 = vpop.f32.mrb[7].mxu0  ;;  %1108 = vst [vmem:[#allocation2 + $0x10] sm:$0xff] %v1096_v9  ;;  %v4342_v12 = vpop.f32.mrb[4].mxu1 }
 0x31b   : > { %v1007_v8 = vadd.f32 %v1006_v5, %v6402_v45  ;;  %v1088_v13 = vadd.f32 %v4342_v12, %v824_v51  ;;  %v1079_v14 = vpop.f32.mrb[5].mxu1 }
 0x31c   : > { %v1097_v10 = vpack.c.bf16 %v1005_v4, %v1001_v3  ;;  %v1080_v16 = vadd.f32 %v1079_v14, %v824_v51  ;;  %v4343_v17 = vpop.f32.mrb[6].mxu1 }
 0x31d   : > { %v1098_v11 = vpack.c.bf16 %v1007_v8, %v1003_v7  ;;  %v1091_v19 = vadd.f32 %v4343_v17, %v824_v51  ;;  %v1082_v20 = vpop.f32.mrb[7].mxu1 }
 0x31e   : > { %1109 = vst [vmem:[#allocation2 + $0x18] sm:$0xff] %v1097_v10  ;;  %v1083_v22 = vadd.f32 %v1082_v20, %v824_v51 }
 0x31f   : > { %1110 = vst [vmem:[#allocation2 + $0x20] sm:$0xff] %v1098_v11  ;;  %v1010_v15 = vpop.f32.mrb[8].mxu0  ;;  %v1105_v26 = vpack.c.bf16 %v1091_v19, %v1088_v13 }
 0x320   : > { %v1012_v18 = vpop.f32.mrb[9].mxu0  ;;  %v1011_v23 = vadd.f32 %v1010_v15, %v6400_v42  ;;  %v1102_v29 = vpack.c.bf16 %v1083_v22, %v1080_v16 }
 0x321   : > { %v1014_v21 = vpop.f32.mrb[10].mxu0  ;;  %v1013_v27 = vadd.f32 %v1012_v18, %v6402_v45  ;;  %1117 = vst [vmem:[#allocation2 + $0x58] sm:$0xff] %v1105_v26 }
 0x322   : > { %v1015_v24 = vadd.f32 %v1014_v21, %v6400_v42  ;;  %v1016_v25 = vpop.f32.mrb[11].mxu0  ;;  %1114 = vst [vmem:[#allocation2 + $0x40] sm:$0xff] %v1102_v29 }
 0x323   : > { %v1017_v28 = vadd.f32 %v1016_v25, %v6402_v45 }
 0x324   : > { %v1100_v30 = vpack.c.bf16 %v1015_v24, %v1011_v23 }
 0x325   : > { %v1101_v31 = vpack.c.bf16 %v1017_v28, %v1013_v27 }
 0x326   : > { %1112 = vst [vmem:[#allocation2 + $0x30] sm:$0xff] %v1100_v30 }
 0x327   : > { %1113 = vst [vmem:[#allocation2 + $0x38] sm:$0xff] %v1101_v31  ;;  %v1020_v32 = vpop.f32.mrb[12].mxu0 }
 0x328   : > { %v1022_v33 = vpop.f32.mrb[13].mxu0  ;;  %v1021_v35 = vadd.f32 %v1020_v32, %v6400_v42 }
 0x329   : > { %v1024_v34 = vpop.f32.mrb[14].mxu0  ;;  %v1023_v38 = vadd.f32 %v1022_v33, %v6402_v45 }
 0x32a   : > { %v1025_v36 = vadd.f32 %v1024_v34, %v6400_v42  ;;  %v1026_v37 = vpop.f32.mrb[15].mxu0 }
 0x32b   : > { %v1027_v39 = vadd.f32 %v1026_v37, %v6402_v45 }
 0x32c   : > { %v1103_v40 = vpack.c.bf16 %v1025_v36, %v1021_v35 }
 0x32d   : > { %v1104_v41 = vpack.c.bf16 %v1027_v39, %v1023_v38 }
 0x32e   : > { %1115 = vst [vmem:[#allocation2 + $0x48] sm:$0xff] %v1103_v40 }
 0x32f   : > { %1116 = vst [vmem:[#allocation2 + $0x50] sm:$0xff] %v1104_v41 }
 0x330 PF: > { %v6420_v43 = vld [vmem:[#allocation2 + $0x8] sm:$0xff]  ;;  %s7166_s29 = sld [smem:[#allocation40_spill]]  ;;  %vm1145_vm0 = vcmask 130048   ;;  %v6422_v44 = vld [vmem:[#allocation2 + $0x20] sm:$0xff]  ;;  %v6438_v47 = vld [vmem:[#allocation2 + $0x38] sm:$0xff]  ;;  %vm1213_vm1 = vcmask 523264  }
 0x331   : > { %4612 = vmatprep.subr.msk.bf16.mxu0 %vm1145_vm0, %v6420_v43  ;;  %v1153_v42 = vsel %vm1145_vm0, %v6420_v43, 0  ;;  %v1156_v45 = vsel %vm1145_vm0, %v6422_v44, 0  ;;  %v1159_v49 = vsel %vm1145_vm0, %v6438_v47, 0  ;;  %v6458_v52 = vld [vmem:[%s6359_s9] ss:$0 sm:$0xff]  ;;  %v6472_v21 = vld [vmem:[#allocation2 + $0x10] sm:$0xff] }
 0x332   : > { %4345 = vmatpush3.bf16.xpose.msra.mxu0 %v1153_v42  ;;  %4356 = vmatprep.subr.bf16.mxu1 %v6472_v21  ;;  %v6476_v22 = vld [vmem:[#allocation2 + $0x28] sm:$0xff]  ;;  %v6480_v23 = vld [vmem:[#allocation2 + $0x40] sm:$0xff]  ;;  %v6483_v24 = vld [vmem:[#allocation2 + $0x58] sm:$0xff]  ;;  %s5729_s0 = smov 112   ;;  %s5730_s30 = smov 96  }
 0x333   : > { %4613 = vmatprep.subr.msk.bf16.mxu0 %vm1145_vm0, %v6422_v44  ;;  %4357 = vmatpush3.bf16.msra.mxu1 %v6472_v21  ;;  %s5731_s11 = smov 80   ;;  %s5732_s26 = smov 64  }
 0x334   : > { %4358 = vmatprep.subr.bf16.mxu1 %v6476_v22  ;;  %s5733_s12 = smov 48   ;;  %s5734_s23 = smov 32  }
 0x335   : > { %s5735_s25 = smov 16   ;;  %p7169_p7 = scmp.ne.s32.totalorder %s7136_s22, 0 }
 0x336   : > { %s4055_s1 = sshll.u32 %s7166_s29, 5  ;;  %v6442_v48 = vld [vmem:[#allocation2 + $0x50] sm:$0xff]  ;;  %s4153_s17 = sshll.u32 %s7166_s29, 2 }
 0x337   : > { %s1124_s13 = sshra.s32 %s4055_s1, 4  ;;  %v1162_v50 = vsel %vm1145_vm0, %v6442_v48, 0  ;;  %4359 = vmatpush3.bf16.msra.mxu1 %v6476_v22  ;;  %s3744_s1 = sshll.u32 %s6385_s24, 4  ;;  %s6967_s1 = int_to_ptr.vmem [resolvable:$true] %s3744_s1 }
 0x338   : > { %s4159_s2 = smul.u32 24, %s1124_s13  ;;  %4360 = vmatprep.subr.bf16.mxu1 %v6480_v23 }
 0x33a   : > { %s6433_s14 = scalar_lea.vmem [#allocation2], %s4159_s2  ;;  %4347 = vmatpush3.bf16.xpose.msra.mxu0 %v1156_v45  ;;  %s7168_s2 = sld [smem:[#allocation59_spill]] }
 0x33b   : > { %v6436_v46 = vld [vmem:[%s6433_s14] sm:$0xff]  ;;  %4614 = vmatprep.subr.msk.bf16.mxu0 %vm1145_vm0, %v6438_v47  ;;  %v6453_v51 = vld [vmem:[%s6433_s14 + $0x18] sm:$0xff]  ;;  %4361 = vmatpush3.bf16.msra.mxu1 %v6480_v23 }
 0x33c   : > { %4352 = vmatprep.mubr.msk.bf16.mxu0 %vm1145_vm0, %v6436_v46  ;;  %4362 = vmatprep.subr.bf16.mxu1 %v6483_v24 }
 0x33f   : > { %4363 = vmatpush3.bf16.msra.mxu1 %v6483_v24 }
 0x342   : > { %4349 = vmatpush3.bf16.xpose.msra.mxu0 %v1159_v49 }
 0x343   : > { %4615 = vmatprep.subr.msk.bf16.mxu0 %vm1145_vm0, %v6442_v48 }
 0x34a   : > { %4351 = vmatpush3.bf16.xpose.msra.mxu0 %v1162_v50 }
 0x351   : > { %4353 = vmatmul.mubr.msk.bf16.vlgmr.msra.gmra.mrb[0].mxu0 %vm1145_vm0, %v6453_v51 }
 0x424   : > { %v4354_v53 = vpop.f32.mrb[0].mxu0 }
 0x425   : > { %v1207_v54 = vadd.f32 %v4354_v53, %v6458_v52  ;;  %v1198_v55 = vpop.f32.mrb[1].mxu0 }
 0x426   : > { %v1199_v56 = vadd.f32 %v6458_v52, %v1198_v55  ;;  %v4355_v57 = vpop.f32.mrb[2].mxu0 }
 0x427   : > { %v1210_v58 = vadd.f32 %v4355_v57, %v6458_v52  ;;  %v1201_v59 = vpop.f32.mrb[3].mxu0  ;;  %v1220_v60 = vsel %vm1213_vm1, %v1207_v54, -inf }
 0x428   : > { %v1202_v61 = vadd.f32 %v6458_v52, %v1201_v59  ;;  %1221 = vmax.xlane.f32.xlu1 %v1220_v60  ;;  %v1214_v62 = vsel %vm1213_vm1, %v1199_v56, -inf }
 0x429   : > { %1215 = vmax.xlane.f32.xlu0 %v1214_v62  ;;  %v1223_v63 = vsel %vm1213_vm1, %v1210_v58, -inf }
 0x42a   : > { %v1217_v0 = vsel %vm1213_vm1, %v1202_v61, -inf }
 0x42c   : > { %1224 = vmax.xlane.f32.xlu1 %v1223_v63 }
 0x42d   : > { %1218 = vmax.xlane.f32.xlu0 %v1217_v0 }
 0x4b5   : > { %v1222_v1 = vpop.xlane.xlu1 %1221 }
 0x4b6   : > { %v1228_v2 = vsub.f32 %v1207_v54, %v1222_v1  ;;  %v1216_v3 = vpop.xlane.xlu0 %1215 }
 0x4b7   : > { %v1226_v4 = vsub.f32 %v1199_v56, %v1216_v3 }
 0x4b8   : > { %v1234_v5 = vmul.f32 1.442695, %v1228_v2 }
 0x4b9   : > { %v1230_v6 = vmul.f32 1.442695, %v1226_v4  ;;  %v1225_v7 = vpop.xlane.xlu1 %1224 }
 0x4ba   : > { %4974 = vpow2.f32 %v1234_v5  ;;  %v1229_v8 = vsub.f32 %v1210_v58, %v1225_v7  ;;  %v1219_v9 = vpop.xlane.xlu0 %1218 }
 0x4bb   : > { %v1227_v10 = vsub.f32 %v1202_v61, %v1219_v9  ;;  %4976 = vpow2.f32 %v1230_v6 }
 0x4bc   : > { %v1236_v11 = vmul.f32 1.442695, %v1229_v8 }
 0x4bd   : > { %v1232_v12 = vmul.f32 1.442695, %v1227_v10 }
 0x4bf   : > { %4978 = vpow2.f32 %v1232_v12 }
 0x4c0   : > { %4980 = vpow2.f32 %v1236_v11 }
 0x4c4   : > { %v4975_v13 = vpop.eup %4974 }
 0x4c5   : > { %v1244_v14 = vsel %vm1213_vm1, %v4975_v13, 0.0  ;;  %v4977_v15 = vpop.eup %4976 }
 0x4c6   : > { %1245 = vadd.xlane.f32.xlu0 %v1244_v14  ;;  %v1238_v17 = vsel %vm1213_vm1, %v4977_v15, 0.0 }
 0x4c9   : > { %v4979_v16 = vpop.eup %4978 }
 0x4ca   : > { %1239 = vadd.xlane.f32.xlu0 %v1238_v17  ;;  %v1241_v18 = vsel %vm1213_vm1, %v4979_v16, 0.0  ;;  %v4981_v19 = vpop.eup %4980 }
 0x4cb   : > { %1242 = vadd.xlane.f32.xlu1 %v1241_v18  ;;  %v1247_v20 = vsel %vm1213_vm1, %v4981_v19, 0.0 }
 0x4cf   : > { %1248 = vadd.xlane.f32.xlu1 %v1247_v20 }
 0x4e0   : > { %1329 = vrot.lane.b32.xlu0 %v6420_v43, %s5729_s0  ;;  %1331 = vrot.lane.b32.xlu1 %v6422_v44, %s5729_s0 }
 0x4e4   : > { %1333 = vrot.lane.b32.xlu1 %v6438_v47, %s5729_s0  ;;  %1321 = vrot.lane.b32.xlu0 %v6436_v46, %s5729_s0 }
 0x4e8   : > { %1335 = vrot.lane.b32.xlu1 %v6442_v48, %s5729_s0  ;;  %1651 = vrot.lane.b32.xlu0 %v6420_v43, %s5730_s30 }
 0x4ec   : > { %1323 = vrot.lane.b32.xlu1 %v6453_v51, %s5729_s0  ;;  %1655 = vrot.lane.b32.xlu0 %v6438_v47, %s5730_s30 }
 0x4f0   : > { %1653 = vrot.lane.b32.xlu1 %v6422_v44, %s5730_s30  ;;  %1647 = vrot.lane.b32.xlu0 %v6436_v46, %s5730_s30 }
 0x4f4   : > { %1657 = vrot.lane.b32.xlu1 %v6442_v48, %s5730_s30 }
 0x4f8   : > { %1649 = vrot.lane.b32.xlu1 %v6453_v51, %s5730_s30 }
 0x553   : > { %v1246_v25 = vpop.xlane.xlu0 %1245 }
 0x557   : > { %v1240_v26 = vpop.xlane.xlu0 %1239 }
 0x558   : > { %4982 = vrcp.f32 %v1240_v26  ;;  %v1243_v27 = vpop.xlane.xlu1 %1242 }
 0x559   : > { %4984 = vrcp.f32 %v1243_v27 }
 0x55a   : > { %4986 = vrcp.f32 %v1246_v25 }
 0x55b   : > { %v1330_v28 = vpop.permute.xlu0 %1329 }
 0x55c   : > { %v1249_v29 = vpop.xlane.xlu1 %1248  ;;  %4616 = vmatprep.subr.msk.bf16.mxu1 %vm1145_vm0, %v1330_v28  ;;  %v1344_v40 = vsel %vm1145_vm0, %v1330_v28, 0 }
 0x55d   : > { %4988 = vrcp.f32 %v1249_v29 }
 0x55f   : > { %v1322_v41 = vpop.permute.xlu0 %1321 }
 0x560   : > { %v1332_v42 = vpop.permute.xlu1 %1331 }
 0x561   : > { %v1347_v45 = vsel %vm1145_vm0, %v1332_v42, 0 }
 0x562   : > { %v4983_v30 = vpop.eup %4982 }
 0x563   : > { %v4985_v31 = vpop.eup %4984  ;;  %v1254_v32 = vmul.f32 %v4983_v30, %v4977_v15  ;;  %v1652_v56 = vpop.permute.xlu0 %1651 }
 0x564   : > { %v1255_v33 = vmul.f32 %v4985_v31, %v4979_v16  ;;  %v4987_v34 = vpop.eup %4986  ;;  %v1334_v49 = vpop.permute.xlu1 %1333  ;;  %v1666_v58 = vsel %vm1145_vm0, %v1652_v56, 0 }
 0x565   : > { %v1256_v37 = vmul.f32 %v4987_v34, %v4975_v13  ;;  %v1350_v50 = vsel %vm1145_vm0, %v1334_v49, 0 }
 0x566   : > { %v1258_v35 = vpack.c.bf16 %v1255_v33, %v1254_v32 }
 0x567   : > { %v4989_v36 = vpop.eup %4988  ;;  %v1656_v60 = vpop.permute.xlu0 %1655 }
 0x568   : > { %4364 = vmatprep.mubr.msk.bf16.mxu1 %vm1213_vm1, %v1258_v35  ;;  %v1257_v38 = vmul.f32 %v4989_v36, %v4981_v19  ;;  %v1336_v53 = vpop.permute.xlu1 %1335  ;;  %v1672_v61 = vsel %vm1145_vm0, %v1656_v60, 0 }
 0x569   : > { %v1353_v54 = vsel %vm1145_vm0, %v1336_v53, 0 }
 0x56a   : > { %v1259_v39 = vpack.c.bf16 %v1257_v38, %v1256_v37 }
 0x56b   : > { %v1648_v0 = vpop.permute.xlu0 %1647 }
 0x56c   : > { %4365 = vmatmul.mubr.msk.bf16.vlgmr.msra.gmra.mrb[0].mxu1 %vm1213_vm1, %v1259_v39  ;;  %v1324_v55 = vpop.permute.xlu1 %1323 }
 0x56d   : > { %4369 = vmatpush3.bf16.xpose.msra.mxu1 %v1344_v40  ;;  %4376 = vmatprep.mubr.msk.bf16.mxu1 %vm1145_vm0, %v1322_v41 }
 0x56e   : > { %4617 = vmatprep.subr.msk.bf16.mxu1 %vm1145_vm0, %v1332_v42 }
 0x570   : > { %v1654_v57 = vpop.permute.xlu1 %1653 }
 0x571   : > { %v1669_v59 = vsel %vm1145_vm0, %v1654_v57, 0 }
 0x574   : > { %v1658_v62 = vpop.permute.xlu1 %1657 }
 0x575   : > { %4371 = vmatpush3.bf16.xpose.msra.mxu1 %v1347_v45  ;;  %v1675_v63 = vsel %vm1145_vm0, %v1658_v62, 0 }
 0x576   : > { %4618 = vmatprep.subr.msk.bf16.mxu1 %vm1145_vm0, %v1334_v49 }
 0x578   : > { %v1650_v1 = vpop.permute.xlu1 %1649 }
 0x57d   : > { %4373 = vmatpush3.bf16.xpose.msra.mxu1 %v1350_v50 }
 0x57e   : > { %4619 = vmatprep.subr.msk.bf16.mxu1 %vm1145_vm0, %v1336_v53 }
 0x585   : > { %4375 = vmatpush3.bf16.xpose.msra.mxu1 %v1353_v54 }
 0x586   : > { %4620 = vmatprep.subr.msk.bf16.mxu1 %vm1145_vm0, %v1652_v56 }
 0x58c   : > { %4377 = vmatmul.mubr.msk.bf16.vlgmr.msra.gmra.mrb[4].mxu1 %vm1145_vm0, %v1324_v55 }
 0x58d   : > { %4405 = vmatpush3.bf16.xpose.msra.mxu1 %v1666_v58  ;;  %4412 = vmatprep.mubr.msk.bf16.mxu1 %vm1145_vm0, %v1648_v0 }
 0x58e   : > { %4621 = vmatprep.subr.msk.bf16.mxu1 %vm1145_vm0, %v1654_v57 }
 0x595   : > { %4407 = vmatpush3.bf16.xpose.msra.mxu1 %v1669_v59 }
 0x596   : > { %4622 = vmatprep.subr.msk.bf16.mxu1 %vm1145_vm0, %v1656_v60 }
 0x59d   : > { %4409 = vmatpush3.bf16.xpose.msra.mxu1 %v1672_v61 }
 0x59e   : > { %4623 = vmatprep.subr.msk.bf16.mxu1 %vm1145_vm0, %v1658_v62 }
 0x5a5   : > { %4411 = vmatpush3.bf16.xpose.msra.mxu1 %v1675_v63 }
 0x5ac   : > { %4413 = vmatmul.mubr.msk.bf16.vlgmr.msra.gmra.mrb[8].mxu1 %vm1145_vm0, %v1650_v1 }
 0x63f   : > { %v6534_v2 = vpop.f32.mrb[0].mxu1 }
 0x640   : > { %v6536_v3 = vpop.f32.mrb[1].mxu1 }
 0x641   : > { %v6538_v4 = vpop.f32.mrb[2].mxu1 }
 0x642   : > { %v1316_v5 = vpack.c.bf16 %v6538_v4, %v6534_v2  ;;  %v6542_v6 = vpop.f32.mrb[3].mxu1 }
 0x643   : > { %v1315_v7 = vpack.c.bf16 %v6542_v6, %v6536_v3 }
 0x65f   : > { %v4378_v8 = vpop.f32.mrb[4].mxu1 }
 0x660   : > { %v1389_v9 = vpop.f32.mrb[5].mxu1  ;;  %v1398_v13 = vadd.f32 %v4378_v8, %v6458_v52 }
 0x661   : > { %v1390_v10 = vadd.f32 %v6458_v52, %v1389_v9  ;;  %v4379_v11 = vpop.f32.mrb[6].mxu1 }
 0x662   : > { %v1392_v12 = vpop.f32.mrb[7].mxu1  ;;  %v1401_v17 = vadd.f32 %v4379_v11, %v6458_v52  ;;  %v1410_v18 = vsel %vm1213_vm1, %v1398_v13, -inf }
 0x663   : > { %v1393_v14 = vadd.f32 %v6458_v52, %v1392_v12  ;;  %v1404_v15 = vsel %vm1213_vm1, %v1390_v10, -inf }
 0x664   : > { %1405 = vmax.xlane.f32.xlu0 %v1404_v15  ;;  %v1413_v19 = vsel %vm1213_vm1, %v1401_v17, -inf }
 0x665   : > { %v1407_v16 = vsel %vm1213_vm1, %v1393_v14, -inf }
 0x666   : > { %1408 = vmax.xlane.f32.xlu1 %v1407_v16 }
 0x668   : > { %1411 = vmax.xlane.f32.xlu0 %v1410_v18 }
 0x66c   : > { %1414 = vmax.xlane.f32.xlu0 %v1413_v19 }
 0x677   : > { %1456 = vrot.lane.b32.xlu1 %v6476_v22, %s5729_s0 }
 0x67b   : > { %1458 = vrot.lane.b32.xlu1 %v6480_v23, %s5729_s0 }
 0x67f   : > { %v4414_v20 = vpop.f32.mrb[8].mxu1 }
 0x680   : > { %v1711_v25 = vpop.f32.mrb[9].mxu1  ;;  %v6588_v56 = vadd.f32 %v4414_v20, %v6458_v52 }
 0x681   : > { %v4415_v26 = vpop.f32.mrb[10].mxu1  ;;  %v6585_v55 = vadd.f32 %v6458_v52, %v1711_v25 }
 0x682   : > { %v1714_v27 = vpop.f32.mrb[11].mxu1  ;;  %v6596_v59 = vadd.f32 %v4415_v26, %v6458_v52  ;;  %v1732_v60 = vsel %vm1213_vm1, %v6588_v56, -inf }
 0x683   : > { %v6591_v57 = vadd.f32 %v6458_v52, %v1714_v27  ;;  %v1726_v58 = vsel %vm1213_vm1, %v6585_v55, -inf }
 0x684   : > { %v1735_v62 = vsel %vm1213_vm1, %v6596_v59, -inf }
 0x685   : > { %v1729_v61 = vsel %vm1213_vm1, %v6591_v57, -inf }
 0x6f1   : > { %v1406_v28 = vpop.xlane.xlu0 %1405 }
 0x6f2   : > { %v1416_v29 = vsub.f32 %v1390_v10, %v1406_v28 }
 0x6f3   : > { %v1409_v30 = vpop.xlane.xlu1 %1408 }
 0x6f4   : > { %v1420_v33 = vmul.f32 1.442695, %v1416_v29  ;;  %v1417_v34 = vsub.f32 %v1393_v14, %v1409_v30 }
 0x6f5   : > { %v1412_v31 = vpop.xlane.xlu0 %1411 }
 0x6f6   : > { %v1418_v32 = vsub.f32 %v1398_v13, %v1412_v31  ;;  %v1422_v38 = vmul.f32 1.442695, %v1417_v34 }
 0x6f7   : > { %v1457_v63 = vpop.permute.xlu1 %1456 }
 0x6f8   : > { %v1424_v35 = vmul.f32 1.442695, %v1418_v32 }
 0x6f9   : > { %v1415_v36 = vpop.xlane.xlu0 %1414 }
 0x6fa   : > { %4990 = vpow2.f32 %v1424_v35  ;;  %v1419_v37 = vsub.f32 %v1401_v17, %v1415_v36 }
 0x6fb   : > { %4992 = vpow2.f32 %v1420_v33  ;;  %v1459_v0 = vpop.permute.xlu1 %1458 }
 0x6fc   : > { %v1426_v39 = vmul.f32 1.442695, %v1419_v37 }
 0x6fe   : > { %4994 = vpow2.f32 %v1426_v39 }
 0x6ff   : > { %4996 = vpow2.f32 %v1422_v38 }
 0x704   : > { %v6558_v40 = vpop.eup %4990 }
 0x705   : > { %v1434_v41 = vsel %vm1213_vm1, %v6558_v40, 0.0  ;;  %v6562_v42 = vpop.eup %4992 }
 0x706   : > { %1435 = vadd.xlane.f32.xlu0 %v1434_v41  ;;  %v1428_v49 = vsel %vm1213_vm1, %v6562_v42, 0.0 }
 0x708   : > { %v4995_v45 = vpop.eup %4994 }
 0x709   : > { %v1437_v50 = vsel %vm1213_vm1, %v4995_v45, 0.0  ;;  %v4997_v53 = vpop.eup %4996 }
 0x70a   : > { %1429 = vadd.xlane.f32.xlu0 %v1428_v49  ;;  %1438 = vadd.xlane.f32.xlu1 %v1437_v50  ;;  %v1431_v54 = vsel %vm1213_vm1, %v4997_v53, 0.0 }
 0x70e   : > { %1432 = vadd.xlane.f32.xlu1 %v1431_v54 }
 0x71f   : > { %1460 = vrot.lane.b32.xlu1 %v6483_v24, %s5729_s0 }
 0x720   : > { %1454 = vrot.lane.b32.xlu0 %v6472_v21, %s5729_s0  ;;  %s3729_s0 = scalar_lea.sflag [#allocation5], %s6341_s7 }
 0x723   : > { %1914 = vrot.lane.b32.xlu1 %v6422_v44, %s5731_s11 }
 0x724   : > { %1912 = vrot.lane.b32.xlu0 %v6420_v43, %s5731_s11 }
 0x727   : > { %1918 = vrot.lane.b32.xlu1 %v6442_v48, %s5731_s11 }
 0x728   : > { %1916 = vrot.lane.b32.xlu0 %v6438_v47, %s5731_s11 }
 0x72b   : > { %1910 = vrot.lane.b32.xlu1 %v6453_v51, %s5731_s11 }
 0x72c   : > { %1908 = vrot.lane.b32.xlu0 %v6436_v46, %s5731_s11 }
 0x74b   : > { %1727 = vmax.xlane.f32.xlu0 %v1726_v58 }
 0x74f   : > { %1733 = vmax.xlane.f32.xlu0 %v1732_v60  ;;  %1730 = vmax.xlane.f32.xlu1 %v1729_v61 }
 0x753   : > { %1736 = vmax.xlane.f32.xlu0 %v1735_v62 }
 0x760   : > { %1774 = vrot.lane.b32.xlu1 %v6476_v22, %s5730_s30 }
 0x764   : > { %1776 = vrot.lane.b32.xlu1 %v6480_v23, %s5730_s30 }
 0x793   : > { %v1436_v1 = vpop.xlane.xlu0 %1435 }
 0x797   : > { %v1439_v8 = vpop.xlane.xlu1 %1438  ;;  %v1430_v9 = vpop.xlane.xlu0 %1429 }
 0x798   : > { %4998 = vrcp.f32 %v1439_v8 }
 0x799   : > { %5000 = vrcp.f32 %v1430_v9 }
 0x79a   : > { %5002 = vrcp.f32 %v1436_v1  ;;  %v4927_v1 = vld [vmem:[#allocation12] sm:$0xff]  }
 0x79b   : > { %v1433_v10 = vpop.xlane.xlu1 %1432  ;;  %v1455_v11 = vpop.permute.xlu0 %1454 }
 0x79c   : > { %5004 = vrcp.f32 %v1433_v10  ;;  %4380 = vmatprep.subr.bf16.mxu0 %v1455_v11 }
 0x79d   : > { %4381 = vmatpush3.bf16.msra.mxu0 %v1455_v11 }
 0x79e   : > { %4382 = vmatprep.subr.bf16.mxu0 %v1457_v63 }
 0x79f   : > { %v1913_v12 = vpop.permute.xlu0 %1912  ;;  %v1461_v13 = vpop.permute.xlu1 %1460 }
 0x7a0   : > { %4624 = vmatprep.subr.msk.bf16.mxu1 %vm1145_vm0, %v1913_v12  ;;  %v1927_v14 = vsel %vm1145_vm0, %v1913_v12, 0 }
 0x7a1   : > { %4383 = vmatpush3.bf16.msra.mxu0 %v1457_v63  ;;  %4435 = vmatpush3.bf16.xpose.msra.mxu1 %v1927_v14 }
 0x7a2   : > { %4384 = vmatprep.subr.bf16.mxu0 %v1459_v0  ;;  %v4999_v15 = vpop.eup %4998 }
 0x7a3   : > { %v1915_v16 = vpop.permute.xlu1 %1914  ;;  %v1917_v17 = vpop.permute.xlu0 %1916  ;;  %v1447_v25 = vmul.f32 %v4999_v15, %v4995_v45 }
 0x7a4   : > { %v5001_v18 = vpop.eup %5000  ;;  %4625 = vmatprep.subr.msk.bf16.mxu1 %vm1145_vm0, %v1915_v16  ;;  %v1930_v26 = vsel %vm1145_vm0, %v1915_v16, 0  ;;  %v1933_v33 = vsel %vm1145_vm0, %v1917_v17, 0 }
 0x7a5   : > { %v5003_v19 = vpop.eup %5002  ;;  %4385 = vmatpush3.bf16.msra.mxu0 %v1459_v0  ;;  %v1444_v27 = vmul.f32 %v5001_v18, %v6562_v42  ;;  %v4926_v0 = vld [vmem:[#allocation12 + $0x8] sm:$0xff]  }
 0x7a6   : > { %v5005_v20 = vpop.eup %5004  ;;  %4386 = vmatprep.subr.bf16.mxu0 %v1461_v13  ;;  %v1446_v30 = vmul.f32 %v5003_v19, %v6558_v40 }
 0x7a7   : > { %v1445_v28 = vmul.f32 %v5005_v20, %v4997_v53  ;;  %v1909_v29 = vpop.permute.xlu0 %1908  ;;  %v1919_v34 = vpop.permute.xlu1 %1918 }
 0x7a8   : > { %4442 = vmatprep.mubr.msk.bf16.mxu1 %vm1145_vm0, %v1909_v29  ;;  %v1449_v32 = vpack.c.bf16 %v1447_v25, %v1446_v30  ;;  %v1936_v35 = vsel %vm1145_vm0, %v1919_v34, 0 }
 0x7a9   : > { %4387 = vmatpush3.bf16.msra.mxu0 %v1461_v13  ;;  %4437 = vmatpush3.bf16.xpose.msra.mxu1 %v1930_v26  ;;  %v1448_v31 = vpack.c.bf16 %v1445_v28, %v1444_v27 }
 0x7aa   : > { %4626 = vmatprep.subr.msk.bf16.mxu1 %vm1145_vm0, %v1917_v17  ;;  %4392 = vmatprep.subr.bf16.mxu0 %v4926_v0 }
 0x7ab   : > { %4388 = vmatprep.mubr.msk.bf16.mxu0 %vm1213_vm1, %v1448_v31  ;;  %v1911_v36 = vpop.permute.xlu1 %1910 }
 0x7ac   : > { %4389 = vmatmul.mubr.msk.bf16.vlgmr.msra.gmra.mrb[4].mxu0 %vm1213_vm1, %v1449_v32 }
 0x7ad   : > { %4393 = vmatpush3.bf16.msra.mxu0 %v4926_v0 }
 0x7ae   : > { %4398 = vmatprep.subr.bf16.mxu0 %v4927_v1 }
 0x7b1   : > { %4439 = vmatpush3.bf16.xpose.msra.mxu1 %v1933_v33 }
 0x7b2   : > { %4627 = vmatprep.subr.msk.bf16.mxu1 %vm1145_vm0, %v1919_v34 }
 0x7b9   : > { %4441 = vmatpush3.bf16.xpose.msra.mxu1 %v1936_v35 }
 0x7c0   : > { %4443 = vmatmul.mubr.msk.bf16.vlgmr.msra.gmra.mrb[12].mxu1 %vm1145_vm0, %v1911_v36 }
 0x7d8   : > { %v1728_v37 = vpop.xlane.xlu0 %1727 }
 0x7d9   : > { %v1738_v38 = vsub.f32 %v6585_v55, %v1728_v37 }
 0x7db   : > { %v1742_v49 = vmul.f32 1.442695, %v1738_v38 }
 0x7dc   : > { %v1731_v39 = vpop.xlane.xlu1 %1730  ;;  %v1734_v40 = vpop.xlane.xlu0 %1733 }
 0x7dd   : > { %v1740_v41 = vsub.f32 %v6588_v56, %v1734_v40  ;;  %v1739_v42 = vsub.f32 %v6591_v57, %v1731_v39 }
 0x7df   : > { %v1746_v45 = vmul.f32 1.442695, %v1740_v41  ;;  %v1744_v54 = vmul.f32 1.442695, %v1739_v42  ;;  %v4928_v42 = vld [vmem:[#allocation12 + $0x10] sm:$0xff]  }
 0x7e0   : > { %v1737_v50 = vpop.xlane.xlu0 %1736  ;;  %v1775_v8 = vpop.permute.xlu1 %1774 }
 0x7e1   : > { %v1741_v53 = vsub.f32 %v6596_v59, %v1737_v50  ;;  %5006 = vpow2.f32 %v1746_v45 }
 0x7e2   : > { %5008 = vpow2.f32 %v1742_v49 }
 0x7e3   : > { %v1748_v58 = vmul.f32 1.442695, %v1741_v53 }
 0x7e4   : > { %v1777_v9 = vpop.permute.xlu1 %1776 }
 0x7e5   : > { %5010 = vpow2.f32 %v1748_v58 }
 0x7e6   : > { %5012 = vpow2.f32 %v1744_v54 }
 0x7eb   : > { %v6626_v60 = vpop.eup %5006 }
 0x7ec   : > { %v1756_v55 = vsel %vm1213_vm1, %v6626_v60, 0.0  ;;  %v5009_v61 = vpop.eup %5008 }
 0x7ed   : > { %1757 = vadd.xlane.f32.xlu0 %v1756_v55  ;;  %v1750_v59 = vsel %vm1213_vm1, %v5009_v61, 0.0 }
 0x7ef   : > { %v6630_v56 = vpop.eup %5010 }
 0x7f0   : > { %v1759_v57 = vsel %vm1213_vm1, %v6630_v56, 0.0  ;;  %v5013_v62 = vpop.eup %5012 }
 0x7f1   : > { %1760 = vadd.xlane.f32.xlu1 %v1759_v57  ;;  %1751 = vadd.xlane.f32.xlu0 %v1750_v59  ;;  %v1753_v63 = vsel %vm1213_vm1, %v5013_v62, 0.0 }
 0x7f5   : > { %1754 = vadd.xlane.f32.xlu1 %v1753_v63 }
 0x806   : > { %1778 = vrot.lane.b32.xlu1 %v6483_v24, %s5730_s30 }
 0x807   : > { %1772 = vrot.lane.b32.xlu0 %v6472_v21, %s5730_s30  ;;  %s5555_s30 = scalar_lea.vmem %s6967_s1, 512 }
 0x808   : > { %p5556_p1 = scmp.ne.s32.totalorder %s6967_s1, %s5555_s30 }
 0x80a   : > { %p5557_p6 = pnand %p5556_p1, %p7169_p7 }
 0x80c   : > { %p5558_p5 = pneg %p5557_p6 }
 0x87a   : > { %v1758_v10 = vpop.xlane.xlu0 %1757 }
 0x87e   : > { %v1761_v11 = vpop.xlane.xlu1 %1760  ;;  %v1752_v12 = vpop.xlane.xlu0 %1751 }
 0x87f   : > { %v4390_v13 = vpop.f32.mrb[4].mxu0  ;;  %5014 = vrcp.f32 %v1752_v12 }
 0x880   : > { %v1506_v14 = vpop.f32.mrb[5].mxu0 }
 0x881   : > { %v4391_v15 = vpop.f32.mrb[6].mxu0 }
 0x882   : > { %v1522_v16 = vpack.c.bf16 %v4391_v15, %v4390_v13  ;;  %v1509_v17 = vpop.f32.mrb[7].mxu0  ;;  %v1755_v18 = vpop.xlane.xlu1 %1754 }
 0x883   : > { %v1521_v19 = vpack.c.bf16 %v1509_v17, %v1506_v14  ;;  %5016 = vrcp.f32 %v1755_v18  ;;  %v1773_v20 = vpop.permute.xlu0 %1772 }
 0x884   : > { %5018 = vrcp.f32 %v1761_v11 }
 0x885   : > { %4394 = vmatprep.mubr.msk.bf16.mxu0 %vm1145_vm0, %v1521_v19  ;;  %5020 = vrcp.f32 %v1758_v10 }
 0x886   : > { %4395 = vmatmul.mubr.msk.bf16.vlgmr.msra.gmra.mrb[8].mxu0 %vm1145_vm0, %v1522_v16 }
 0x887   : > { %4400 = vmatprep.mubr.msk.bf16.mxu0 %vm1145_vm0, %v1315_v7  ;;  %4399 = vmatpush3.bf16.msra.mxu0 %v4927_v1 }
 0x888   : > { %4416 = vmatprep.subr.bf16.mxu0 %v1773_v20 }
 0x889   : > { %v5015_v25 = vpop.eup %5014 }
 0x88a   : > { %v1766_v27 = vmul.f32 %v5015_v25, %v5009_v61 }
 0x88d   : > { %v5017_v26 = vpop.eup %5016 }
 0x88e   : > { %v1767_v28 = vmul.f32 %v5017_v26, %v5013_v62  ;;  %v5019_v2 = vpop.eup %5018 }
 0x88f   : > { %v5021_v35 = vpop.eup %5020  ;;  %v1769_v38 = vmul.f32 %v5019_v2, %v6630_v56 }
 0x890   : > { %v1770_v29 = vpack.c.bf16 %v1767_v28, %v1766_v27  ;;  %v1768_v39 = vmul.f32 %v5021_v35, %v6626_v60 }
 0x892   : > { %4401 = vmatmul.mubr.msk.bf16.vlgmr.msra.gmra.mrb[8].mxu0 %vm1145_vm0, %v1316_v5  ;;  %v1779_v5 = vpop.permute.xlu1 %1778  ;;  %v1771_v41 = vpack.c.bf16 %v1769_v38, %v1768_v39 }
 0x893   : > { %4417 = vmatpush3.bf16.msra.mxu0 %v1773_v20  ;;  %4424 = vmatprep.mubr.msk.bf16.mxu0 %vm1213_vm1, %v1770_v29  ;;  %v4444_v3 = vpop.f32.mrb[12].mxu1  ;;  %v4929_v29 = vld [vmem:[#allocation12 + $0x18] sm:$0xff]  }
 0x894   : > { %v1972_v6 = vpop.f32.mrb[13].mxu1  ;;  %4418 = vmatprep.subr.bf16.mxu0 %v1775_v8  ;;  %v1981_v32 = vadd.f32 %v4444_v3, %v6458_v52 }
 0x895   : > { %v1973_v7 = vadd.f32 %v6458_v52, %v1972_v6  ;;  %v4445_v30 = vpop.f32.mrb[14].mxu1 }
 0x896   : > { %v1975_v31 = vpop.f32.mrb[15].mxu1  ;;  %v1984_v36 = vadd.f32 %v4445_v30, %v6458_v52  ;;  %v1993_v37 = vsel %vm1213_vm1, %v1981_v32, -inf }
 0x897   : > { %4419 = vmatpush3.bf16.msra.mxu0 %v1775_v8  ;;  %v1976_v33 = vadd.f32 %v6458_v52, %v1975_v31  ;;  %v1987_v34 = vsel %vm1213_vm1, %v1973_v7, -inf }
 0x898   : > { %1988 = vmax.xlane.f32.xlu0 %v1987_v34  ;;  %4420 = vmatprep.subr.bf16.mxu0 %v1777_v9  ;;  %v1996_v40 = vsel %vm1213_vm1, %v1984_v36, -inf }
 0x899   : > { %v1990_v4 = vsel %vm1213_vm1, %v1976_v33, -inf }
 0x89a   : > { %1991 = vmax.xlane.f32.xlu1 %v1990_v4 }
 0x89b   : > { %4421 = vmatpush3.bf16.msra.mxu0 %v1777_v9 }
 0x89c   : > { %1994 = vmax.xlane.f32.xlu0 %v1993_v37  ;;  %4422 = vmatprep.subr.bf16.mxu0 %v1779_v5 }
 0x89f   : > { %4423 = vmatpush3.bf16.msra.mxu0 %v1779_v5 }
 0x8a0   : > { %1997 = vmax.xlane.f32.xlu0 %v1996_v40  ;;  %4428 = vmatprep.subr.bf16.mxu0 %v4928_v42 }
 0x8a2   : > { %4425 = vmatmul.mubr.msk.bf16.vlgmr.msra.gmra.mrb[12].mxu0 %vm1213_vm1, %v1771_v41 }
 0x8a3   : > { %4429 = vmatpush3.bf16.msra.mxu0 %v4928_v42 }
 0x8ab   : > { %2035 = vrot.lane.b32.xlu1 %v6476_v22, %s5731_s11 }
 0x8af   : > { %2037 = vrot.lane.b32.xlu1 %v6480_v23, %s5731_s11 }
 0x925   : > { %v1989_v45 = vpop.xlane.xlu0 %1988 }
 0x926   : > { %v1999_v49 = vsub.f32 %v1973_v7, %v1989_v45 }
 0x927   : > { %v1992_v50 = vpop.xlane.xlu1 %1991 }
 0x928   : > { %v2003_v58 = vmul.f32 1.442695, %v1999_v49  ;;  %v2000_v60 = vsub.f32 %v1976_v33, %v1992_v50 }
 0x929   : > { %v1995_v53 = vpop.xlane.xlu0 %1994 }
 0x92a   : > { %v2001_v54 = vsub.f32 %v1981_v32, %v1995_v53  ;;  %v2005_v57 = vmul.f32 1.442695, %v2000_v60 }
 0x92c   : > { %v2007_v55 = vmul.f32 1.442695, %v2001_v54 }
 0x92d   : > { %v1998_v61 = vpop.xlane.xlu0 %1997 }
 0x92e   : > { %5022 = vpow2.f32 %v2007_v55  ;;  %v2002_v56 = vsub.f32 %v1984_v36, %v1998_v61 }
 0x92f   : > { %5024 = vpow2.f32 %v2003_v58 }
 0x930   : > { %v2009_v62 = vmul.f32 1.442695, %v2002_v56 }
 0x932   : > { %5026 = vpow2.f32 %v2009_v62 }
 0x933   : > { %5028 = vpow2.f32 %v2005_v57 }
 0x938   : > { %v5023_v59 = vpop.eup %5022 }
 0x939   : > { %v2017_v63 = vsel %vm1213_vm1, %v5023_v59, 0.0  ;;  %v5025_v0 = vpop.eup %5024 }
 0x93a   : > { %2018 = vadd.xlane.f32.xlu0 %v2017_v63  ;;  %v2011_v8 = vsel %vm1213_vm1, %v5025_v0, 0.0 }
 0x93c   : > { %v5027_v1 = vpop.eup %5026 }
 0x93d   : > { %v2020_v9 = vsel %vm1213_vm1, %v5027_v1, 0.0  ;;  %v5029_v10 = vpop.eup %5028 }
 0x93e   : > { %2012 = vadd.xlane.f32.xlu0 %v2011_v8  ;;  %2021 = vadd.xlane.f32.xlu1 %v2020_v9  ;;  %v2014_v11 = vsel %vm1213_vm1, %v5029_v10, 0.0 }
 0x942   : > { %2015 = vadd.xlane.f32.xlu1 %v2014_v11 }
 0x953   : > { %2039 = vrot.lane.b32.xlu1 %v6483_v24, %s5731_s11 }
 0x954   : > { %2033 = vrot.lane.b32.xlu0 %v6472_v21, %s5731_s11  ;;  %s5737_s11 = smov [#allocation27]  }
 0x957   : > { %2175 = vrot.lane.b32.xlu1 %v6422_v44, %s5732_s26  ;;  %v2036_v44 = vpop.permute.xlu1 %2035 }
 0x958   : > { %2173 = vrot.lane.b32.xlu0 %v6420_v43, %s5732_s26 }
 0x95b   : > { %2179 = vrot.lane.b32.xlu1 %v6442_v48, %s5732_s26 }
 0x95c   : > { %2177 = vrot.lane.b32.xlu0 %v6438_v47, %s5732_s26  ;;  %v2038_v47 = vpop.permute.xlu1 %2037 }
 0x95f   : > { %2171 = vrot.lane.b32.xlu1 %v6453_v51, %s5732_s26 }
 0x960   : > { %2169 = vrot.lane.b32.xlu0 %v6436_v46, %s5732_s26 }
 0x975   : > { %v4426_v12 = vpop.f32.mrb[12].mxu0 }
 0x976   : > { %v1824_v13 = vpop.f32.mrb[13].mxu0 }
 0x977   : > { %v4427_v14 = vpop.f32.mrb[14].mxu0 }
 0x978   : > { %v1840_v15 = vpack.c.bf16 %v4427_v14, %v4426_v12  ;;  %v1827_v43 = vpop.f32.mrb[15].mxu0 }
 0x979   : > { %v1839_v16 = vpack.c.bf16 %v1827_v43, %v1824_v13 }
 0x97b   : > { %4430 = vmatprep.mubr.msk.bf16.mxu0 %vm1145_vm0, %v1839_v16 }
 0x97c   : > { %4431 = vmatmul.mubr.msk.bf16.vlgmr.msra.gmra.mrb[8].mxu0 %vm1145_vm0, %v1840_v15 }
 0x9c7   : > { %v2019_v17 = vpop.xlane.xlu0 %2018 }
 0x9cb   : > { %v2022_v48 = vpop.xlane.xlu1 %2021  ;;  %v2013_v18 = vpop.xlane.xlu0 %2012 }
 0x9cc   : > { %5030 = vrcp.f32 %v2022_v48 }
 0x9cd   : > { %5032 = vrcp.f32 %v2013_v18 }
 0x9ce   : > { %5034 = vrcp.f32 %v2019_v17 }
 0x9cf   : > { %v2016_v46 = vpop.xlane.xlu1 %2015  ;;  %v2034_v51 = vpop.permute.xlu0 %2033 }
 0x9d0   : > { %5036 = vrcp.f32 %v2016_v46  ;;  %4446 = vmatprep.subr.bf16.mxu0 %v2034_v51 }
 0x9d1   : > { %4447 = vmatpush3.bf16.msra.mxu0 %v2034_v51 }
 0x9d2   : > { %4448 = vmatprep.subr.bf16.mxu0 %v2036_v44 }
 0x9d3   : > { %v2040_v20 = vpop.permute.xlu1 %2039  ;;  %v2174_v32 = vpop.permute.xlu0 %2173 }
 0x9d4   : > { %v2188_v37 = vsel %vm1145_vm0, %v2174_v32, 0 }
 0x9d5   : > { %4449 = vmatpush3.bf16.msra.mxu0 %v2036_v44 }
 0x9d6   : > { %4450 = vmatprep.subr.bf16.mxu0 %v2038_v47  ;;  %v5031_v19 = vpop.eup %5030 }
 0x9d7   : > { %v5033_v25 = vpop.eup %5032  ;;  %v2030_v28 = vmul.f32 %v5031_v19, %v5027_v1  ;;  %v2178_v2 = vpop.permute.xlu0 %2177  ;;  %v6722_v19 = vld [vmem:[#allocation2 + $0x8] sm:$0xff] }
 0x9d8   : > { %v5035_v26 = vpop.eup %5034  ;;  %v2027_v3 = vmul.f32 %v5033_v25, %v5025_v0  ;;  %v2176_v39 = vpop.permute.xlu1 %2175  ;;  %v2194_v41 = vsel %vm1145_vm0, %v2178_v2, 0  ;;  %v6730_v25 = vld [vmem:[#allocation2 + $0x38] sm:$0xff] }
 0x9d9   : > { %4451 = vmatpush3.bf16.msra.mxu0 %v2038_v47  ;;  %v2029_v7 = vmul.f32 %v5035_v26, %v5023_v59  ;;  %v2191_v40 = vsel %vm1145_vm0, %v2176_v39, 0  ;;  %v6734_v26 = vld [vmem:[#allocation2 + $0x50] sm:$0xff] }
 0x9da   : > { %v5037_v27 = vpop.eup %5036  ;;  %4452 = vmatprep.subr.bf16.mxu0 %v2040_v20 }
 0x9db   : > { %v2028_v6 = vmul.f32 %v5037_v27, %v5029_v10  ;;  %v2032_v31 = vpack.c.bf16 %v2030_v28, %v2029_v7  ;;  %v2170_v38 = vpop.permute.xlu0 %2169  ;;  %v6744_v27 = vld [vmem:[%s6433_s14 + $0x18] sm:$0xff] }
 0x9dc   : > { %v2180_v42 = vpop.permute.xlu1 %2179 }
 0x9dd   : > { %4453 = vmatpush3.bf16.msra.mxu0 %v2040_v20  ;;  %v2031_v30 = vpack.c.bf16 %v2028_v6, %v2027_v3  ;;  %v2197_v45 = vsel %vm1145_vm0, %v2180_v42, 0  ;;  %v6726_v20 = vld [vmem:[#allocation2 + $0x20] sm:$0xff] }
 0x9de   : > { %4458 = vmatprep.subr.bf16.mxu0 %v4929_v29 }
 0x9df   : > { %4454 = vmatprep.mubr.msk.bf16.mxu0 %vm1213_vm1, %v2031_v30 }
 0x9e0   : > { %4455 = vmatmul.mubr.msk.bf16.vlgmr.msra.gmra.mrb[16].mxu0 %vm1213_vm1, %v2032_v31  ;;  %v2172_v49 = vpop.permute.xlu1 %2171 }
 0x9e1   : > { %4459 = vmatpush3.bf16.msra.mxu0 %v4929_v29 }
 0x9e2   : > { %4628 = vmatprep.subr.msk.bf16.mxu0 %vm1145_vm0, %v2174_v32 }
 0xab3   : > { %v4456_v33 = vpop.f32.mrb[16].mxu0 }
 0xab4   : > { %v2085_v34 = vpop.f32.mrb[17].mxu0 }
 0xab5   : > { %v4457_v4 = vpop.f32.mrb[18].mxu0 }
 0xab6   : > { %v2101_v5 = vpack.c.bf16 %v4457_v4, %v4456_v33  ;;  %v2088_v35 = vpop.f32.mrb[19].mxu0 }
 0xab7   : > { %v2100_v36 = vpack.c.bf16 %v2088_v35, %v2085_v34 }
 0xab9   : > { %4460 = vmatprep.mubr.msk.bf16.mxu0 %vm1145_vm0, %v2100_v36 }
 0xaba   : > { %4461 = vmatmul.mubr.msk.bf16.vlgmr.msra.gmra.mrb[8].mxu0 %vm1145_vm0, %v2101_v5 }
 0xabb   : > { %4465 = vmatpush3.bf16.xpose.msra.mxu0 %v2188_v37  ;;  %4472 = vmatprep.mubr.msk.bf16.mxu0 %vm1145_vm0, %v2170_v38 }
 0xabc   : > { %4629 = vmatprep.subr.msk.bf16.mxu0 %vm1145_vm0, %v2176_v39 }
 0xac3   : > { %4467 = vmatpush3.bf16.xpose.msra.mxu0 %v2191_v40 }
 0xac4   : > { %4630 = vmatprep.subr.msk.bf16.mxu0 %vm1145_vm0, %v2178_v2 }
 0xacb   : > { %4469 = vmatpush3.bf16.xpose.msra.mxu0 %v2194_v41 }
 0xacc   : > { %4631 = vmatprep.subr.msk.bf16.mxu0 %vm1145_vm0, %v2180_v42 }
 0xad3   : > { %4471 = vmatpush3.bf16.xpose.msra.mxu0 %v2197_v45 }
 0xada   : > { %4473 = vmatmul.mubr.msk.bf16.vlgmr.msra.gmra.mrb[20].mxu0 %vm1145_vm0, %v2172_v49 }
 0xbad   : > { %v4474_v50 = vpop.f32.mrb[20].mxu0 }
 0xbae   : > { %v2233_v53 = vpop.f32.mrb[21].mxu0  ;;  %v2242_v55 = vadd.f32 %v4474_v50, %v6458_v52 }
 0xbaf   : > { %v2234_v54 = vadd.f32 %v6458_v52, %v2233_v53  ;;  %v4475_v58 = vpop.f32.mrb[22].mxu0 }
 0xbb0   : > { %v2236_v60 = vpop.f32.mrb[23].mxu0  ;;  %v2245_v62 = vadd.f32 %v4475_v58, %v6458_v52  ;;  %v2254_v59 = vsel %vm1213_vm1, %v2242_v55, -inf }
 0xbb1   : > { %v2237_v61 = vadd.f32 %v6458_v52, %v2236_v60  ;;  %v2248_v56 = vsel %vm1213_vm1, %v2234_v54, -inf }
 0xbb2   : > { %2249 = vmax.xlane.f32.xlu0 %v2248_v56  ;;  %v2257_v63 = vsel %vm1213_vm1, %v2245_v62, -inf }
 0xbb3   : > { %v2251_v57 = vsel %vm1213_vm1, %v2237_v61, -inf }
 0xbb4   : > { %2252 = vmax.xlane.f32.xlu1 %v2251_v57 }
 0xbb6   : > { %2255 = vmax.xlane.f32.xlu0 %v2254_v59 }
 0xbba   : > { %2258 = vmax.xlane.f32.xlu0 %v2257_v63 }
 0xbc5   : > { %2296 = vrot.lane.b32.xlu1 %v6476_v22, %s5732_s26 }
 0xbc9   : > { %2298 = vrot.lane.b32.xlu1 %v6480_v23, %s5732_s26 }
 0xbd0   : > { %2294 = vrot.lane.b32.xlu0 %v6472_v21, %s5732_s26 }
 0xc3f   : > { %v2250_v0 = vpop.xlane.xlu0 %2249 }
 0xc40   : > { %v2260_v1 = vsub.f32 %v2234_v54, %v2250_v0  ;;  %v4930_v54 = vld [vmem:[#allocation12 + $0x20] sm:$0xff]  }
 0xc41   : > { %v2253_v8 = vpop.xlane.xlu1 %2252  ;;  %4488 = vmatprep.subr.bf16.mxu0 %v4930_v54 }
 0xc42   : > { %v2264_v10 = vmul.f32 1.442695, %v2260_v1  ;;  %v2261_v11 = vsub.f32 %v2237_v61, %v2253_v8  ;;  %4489 = vmatpush3.bf16.msra.mxu0 %v4930_v54 }
 0xc43   : > { %v2256_v9 = vpop.xlane.xlu0 %2255 }
 0xc44   : > { %v2262_v52 = vsub.f32 %v2242_v55, %v2256_v9  ;;  %v2266_v22 = vmul.f32 1.442695, %v2261_v11 }
 0xc45   : > { %v2297_v15 = vpop.permute.xlu1 %2296 }
 0xc46   : > { %v2268_v12 = vmul.f32 1.442695, %v2262_v52 }
 0xc47   : > { %v2259_v13 = vpop.xlane.xlu0 %2258 }
 0xc48   : > { %5038 = vpow2.f32 %v2268_v12  ;;  %v2263_v14 = vsub.f32 %v2245_v62, %v2259_v13 }
 0xc49   : > { %5040 = vpow2.f32 %v2264_v10  ;;  %v2299_v21 = vpop.permute.xlu1 %2298 }
 0xc4a   : > { %v2270_v43 = vmul.f32 1.442695, %v2263_v14  ;;  %v6785_v14 = vld [vmem:[%s6359_s9] ss:$0 sm:$0xff] }
 0xc4b   : > { %v2295_v16 = vpop.permute.xlu0 %2294 }
 0xc4c   : > { %5042 = vpow2.f32 %v2270_v43  ;;  %4476 = vmatprep.subr.bf16.mxu1 %v2295_v16 }
 0xc4d   : > { %4477 = vmatpush3.bf16.msra.mxu1 %v2295_v16  ;;  %5044 = vpow2.f32 %v2266_v22 }
 0xc4e   : > { %4478 = vmatprep.subr.bf16.mxu1 %v2297_v15 }
 0xc51   : > { %4479 = vmatpush3.bf16.msra.mxu1 %v2297_v15 }
 0xc52   : > { %v5039_v23 = vpop.eup %5038  ;;  %4480 = vmatprep.subr.bf16.mxu1 %v2299_v21 }
 0xc53   : > { %v2278_v44 = vsel %vm1213_vm1, %v5039_v23, 0.0  ;;  %v5041_v47 = vpop.eup %5040 }
 0xc54   : > { %2279 = vadd.xlane.f32.xlu0 %v2278_v44  ;;  %v2272_v48 = vsel %vm1213_vm1, %v5041_v47, 0.0 }
 0xc55   : > { %4481 = vmatpush3.bf16.msra.mxu1 %v2299_v21 }
 0xc56   : > { %v5043_v17 = vpop.eup %5042 }
 0xc57   : > { %v2281_v18 = vsel %vm1213_vm1, %v5043_v17, 0.0  ;;  %v5045_v46 = vpop.eup %5044 }
 0xc58   : > { %2273 = vadd.xlane.f32.xlu0 %v2272_v48  ;;  %2282 = vadd.xlane.f32.xlu1 %v2281_v18  ;;  %v2275_v51 = vsel %vm1213_vm1, %v5045_v46, 0.0  ;;  %v6795_v18 = vld [vmem:[#allocation2 + $0x28] sm:$0xff] }
 0xc5c   : > { %2276 = vadd.xlane.f32.xlu1 %v2275_v51 }
 0xc6d   : > { %2300 = vrot.lane.b32.xlu1 %v6483_v24, %s5732_s26  ;;  %v6739_v24 = vld [vmem:[%s6433_s14] sm:$0xff]  ;;  %s5559_s26 = sshll.u32 %s5737_s11, 4  ;;  %s5560_s26 = int_to_ptr.vmem [resolvable:$false] %s5559_s26 }
 0xc6e   : > { %2434 = vrot.lane.b32.xlu0 %v6722_v19, %s5733_s12  ;;  %p5562_p11 = scmp.lt.s32.totalorder %s6967_s1, %s5560_s26 }
 0xc71   : > { %2436 = vrot.lane.b32.xlu1 %v6726_v20, %s5733_s12 }
 0xc72   : > { %2438 = vrot.lane.b32.xlu0 %v6730_v25, %s5733_s12 }
 0xc75   : > { %2440 = vrot.lane.b32.xlu1 %v6734_v26, %s5733_s12 }
 0xc76   : > { %2430 = vrot.lane.b32.xlu0 %v6739_v24, %s5733_s12 }
 0xc79   : > { %2432 = vrot.lane.b32.xlu1 %v6744_v27, %s5733_s12 }
 0xc7a   : > { %2695 = vrot.lane.b32.xlu0 %v6722_v19, %s5734_s23 }
 0xc7d   : > { %2697 = vrot.lane.b32.xlu1 %v6726_v20, %s5734_s23 }
 0xc7e   : > { %2699 = vrot.lane.b32.xlu0 %v6730_v25, %s5734_s23 }
 0xc81   : > { %2701 = vrot.lane.b32.xlu1 %v6734_v26, %s5734_s23 }
 0xc82   : > { %2691 = vrot.lane.b32.xlu0 %v6739_v24, %s5734_s23 }
 0xc85   : > { %2693 = vrot.lane.b32.xlu1 %v6744_v27, %s5734_s23 }
 0xce1   : > { %v2280_v28 = vpop.xlane.xlu0 %2279 }
 0xce5   : > { %v2283_v29 = vpop.xlane.xlu1 %2282  ;;  %v2274_v3 = vpop.xlane.xlu0 %2273 }
 0xce6   : > { %5046 = vrcp.f32 %v2283_v29 }
 0xce7   : > { %5048 = vrcp.f32 %v2274_v3 }
 0xce8   : > { %5050 = vrcp.f32 %v2280_v28 }
 0xce9   : > { %v2277_v6 = vpop.xlane.xlu1 %2276  ;;  %v2435_v30 = vpop.permute.xlu0 %2434 }
 0xcea   : > { %5052 = vrcp.f32 %v2277_v6  ;;  %v2449_v38 = vsel %vm1145_vm0, %v2435_v30, 0 }
 0xced   : > { %v2301_v7 = vpop.permute.xlu1 %2300  ;;  %v2439_v4 = vpop.permute.xlu0 %2438 }
 0xcee   : > { %4482 = vmatprep.subr.bf16.mxu1 %v2301_v7  ;;  %v2455_v45 = vsel %vm1145_vm0, %v2439_v4, 0 }
 0xcef   : > { %4483 = vmatpush3.bf16.msra.mxu1 %v2301_v7 }
 0xcf0   : > { %4632 = vmatprep.subr.msk.bf16.mxu1 %vm1145_vm0, %v2435_v30  ;;  %v5047_v31 = vpop.eup %5046 }
 0xcf1   : > { %v5049_v32 = vpop.eup %5048  ;;  %v2291_v2 = vmul.f32 %v5047_v31, %v5043_v17  ;;  %v2431_v40 = vpop.permute.xlu0 %2430 }
 0xcf2   : > { %v5051_v33 = vpop.eup %5050  ;;  %v2288_v5 = vmul.f32 %v5049_v32, %v5041_v47  ;;  %v2437_v41 = vpop.permute.xlu1 %2436 }
 0xcf3   : > { %v2290_v36 = vmul.f32 %v5051_v33, %v5039_v23  ;;  %v2452_v42 = vsel %vm1145_vm0, %v2437_v41, 0 }
 0xcf4   : > { %v5053_v34 = vpop.eup %5052 }
 0xcf5   : > { %v2289_v35 = vmul.f32 %v5053_v34, %v5045_v46  ;;  %v2293_v39 = vpack.c.bf16 %v2291_v2, %v2290_v36  ;;  %v2696_v58 = vpop.permute.xlu0 %2695  ;;  %v6799_v46 = vld [vmem:[#allocation2 + $0x40] sm:$0xff] }
 0xcf6   : > { %v2441_v49 = vpop.permute.xlu1 %2440  ;;  %v2710_v55 = vsel %vm1145_vm0, %v2696_v58, 0 }
 0xcf7   : > { %v2292_v37 = vpack.c.bf16 %v2289_v35, %v2288_v5  ;;  %v2458_v50 = vsel %vm1145_vm0, %v2441_v49, 0 }
 0xcf9   : > { %4484 = vmatprep.mubr.msk.bf16.mxu1 %vm1213_vm1, %v2292_v37  ;;  %v2700_v56 = vpop.permute.xlu0 %2699 }
 0xcfa   : > { %4485 = vmatmul.mubr.msk.bf16.vlgmr.msra.gmra.mrb[16].mxu1 %vm1213_vm1, %v2293_v39  ;;  %v2433_v53 = vpop.permute.xlu1 %2432  ;;  %v2716_v57 = vsel %vm1145_vm0, %v2700_v56, 0 }
 0xcfb   : > { %4495 = vmatpush3.bf16.xpose.msra.mxu1 %v2449_v38  ;;  %4502 = vmatprep.mubr.msk.bf16.mxu1 %vm1145_vm0, %v2431_v40 }
 0xcfc   : > { %4633 = vmatprep.subr.msk.bf16.mxu1 %vm1145_vm0, %v2437_v41 }
 0xcfd   : > { %v2692_v63 = vpop.permute.xlu0 %2691 }
 0xcfe   : > { %v2698_v60 = vpop.permute.xlu1 %2697 }
 0xcff   : > { %v2713_v61 = vsel %vm1145_vm0, %v2698_v60, 0 }
 0xd02   : > { %v2702_v62 = vpop.permute.xlu1 %2701 }
 0xd03   : > { %4497 = vmatpush3.bf16.xpose.msra.mxu1 %v2452_v42  ;;  %v2719_v59 = vsel %vm1145_vm0, %v2702_v62, 0 }
 0xd04   : > { %4634 = vmatprep.subr.msk.bf16.mxu1 %vm1145_vm0, %v2439_v4 }
 0xd06   : > { %v2694_v0 = vpop.permute.xlu1 %2693 }
 0xd0b   : > { %4499 = vmatpush3.bf16.xpose.msra.mxu1 %v2455_v45 }
 0xd0c   : > { %4635 = vmatprep.subr.msk.bf16.mxu1 %vm1145_vm0, %v2441_v49 }
 0xd13   : > { %4501 = vmatpush3.bf16.xpose.msra.mxu1 %v2458_v50  ;;  %v6816_v50 = vld [vmem:[#allocation2 + $0x58] sm:$0xff] }
 0xd14   : > { %4636 = vmatprep.subr.msk.bf16.mxu1 %vm1145_vm0, %v2696_v58 }
 0xd1a   : > { %4503 = vmatmul.mubr.msk.bf16.vlgmr.msra.gmra.mrb[20].mxu1 %vm1145_vm0, %v2433_v53  ;;  %v6820_v53 = vld [vmem:[#allocation2 + $0x10] sm:$0xff] }
 0xd1b   : > { %4525 = vmatpush3.bf16.xpose.msra.mxu1 %v2710_v55  ;;  %4532 = vmatprep.mubr.msk.bf16.mxu1 %vm1145_vm0, %v2692_v63 }
 0xd1c   : > { %4637 = vmatprep.subr.msk.bf16.mxu1 %vm1145_vm0, %v2698_v60 }
 0xd23   : > { %4527 = vmatpush3.bf16.xpose.msra.mxu1 %v2713_v61 }
 0xd24   : > { %4638 = vmatprep.subr.msk.bf16.mxu1 %vm1145_vm0, %v2700_v56 }
 0xd2b   : > { %4529 = vmatpush3.bf16.xpose.msra.mxu1 %v2716_v57 }
 0xd2c   : > { %4639 = vmatprep.subr.msk.bf16.mxu1 %vm1145_vm0, %v2702_v62 }
 0xd33   : > { %4531 = vmatpush3.bf16.xpose.msra.mxu1 %v2719_v59 }
 0xd3a   : > { %4533 = vmatmul.mubr.msk.bf16.vlgmr.msra.gmra.mrb[24].mxu1 %vm1145_vm0, %v2694_v0 }
 0xdcd   : > { %v4486_v1 = vpop.f32.mrb[16].mxu1 }
 0xdce   : > { %v2346_v8 = vpop.f32.mrb[17].mxu1 }
 0xdcf   : > { %v4487_v9 = vpop.f32.mrb[18].mxu1 }
 0xdd0   : > { %v2362_v52 = vpack.c.bf16 %v4487_v9, %v4486_v1  ;;  %v2349_v10 = vpop.f32.mrb[19].mxu1 }
 0xdd1   : > { %v2361_v11 = vpack.c.bf16 %v2349_v10, %v2346_v8 }
 0xdd3   : > { %4490 = vmatprep.mubr.msk.bf16.mxu0 %vm1145_vm0, %v2361_v11 }
 0xdd4   : > { %4491 = vmatmul.mubr.msk.bf16.vlgmr.msra.gmra.mrb[8].mxu0 %vm1145_vm0, %v2362_v52 }
 0xded   : > { %v4504_v12 = vpop.f32.mrb[20].mxu1 }
 0xdee   : > { %v2494_v13 = vpop.f32.mrb[21].mxu1  ;;  %v2503_v16 = vadd.f32 %v6785_v14, %v4504_v12 }
 0xdef   : > { %v2495_v15 = vadd.f32 %v6785_v14, %v2494_v13  ;;  %v4505_v22 = vpop.f32.mrb[22].mxu1 }
 0xdf0   : > { %v2497_v43 = vpop.f32.mrb[23].mxu1  ;;  %v2506_v47 = vadd.f32 %v6785_v14, %v4505_v22  ;;  %v2515_v17 = vsel %vm1213_vm1, %v2503_v16, -inf }
 0xdf1   : > { %v2498_v21 = vadd.f32 %v6785_v14, %v2497_v43  ;;  %v2509_v23 = vsel %vm1213_vm1, %v2495_v15, -inf }
 0xdf2   : > { %2510 = vmax.xlane.f32.xlu0 %v2509_v23  ;;  %v2518_v48 = vsel %vm1213_vm1, %v2506_v47, -inf }
 0xdf3   : > { %v2512_v44 = vsel %vm1213_vm1, %v2498_v21, -inf }
 0xdf4   : > { %2513 = vmax.xlane.f32.xlu1 %v2512_v44 }
 0xdf6   : > { %2516 = vmax.xlane.f32.xlu0 %v2515_v17 }
 0xdfa   : > { %2519 = vmax.xlane.f32.xlu0 %v2518_v48 }
 0xe05   : > { %2557 = vrot.lane.b32.xlu1 %v6795_v18, %s5733_s12 }
 0xe09   : > { %2559 = vrot.lane.b32.xlu1 %v6799_v46, %s5733_s12 }
 0xe0d   : > { %v4534_v51 = vpop.f32.mrb[24].mxu1 }
 0xe0e   : > { %v2755_v28 = vpop.f32.mrb[25].mxu1 }
 0xe0f   : > { %v4535_v29 = vpop.f32.mrb[26].mxu1  ;;  %v6837_v54 = vadd.f32 %v6785_v14, %v2755_v28 }
 0xe10   : > { %v2758_v3 = vpop.f32.mrb[27].mxu1 }
 0xe7f   : > { %v2511_v6 = vpop.xlane.xlu0 %2510 }
 0xe80   : > { %v2521_v7 = vsub.f32 %v2495_v15, %v2511_v6 }
 0xe81   : > { %v2514_v30 = vpop.xlane.xlu1 %2513 }
 0xe82   : > { %v2525_v33 = vmul.f32 1.442695, %v2521_v7  ;;  %v2522_v34 = vsub.f32 %v2498_v21, %v2514_v30 }
 0xe83   : > { %v2517_v31 = vpop.xlane.xlu0 %2516 }
 0xe84   : > { %v2523_v32 = vsub.f32 %v2503_v16, %v2517_v31  ;;  %v2527_v35 = vmul.f32 1.442695, %v2522_v34 }
 0xe85   : > { %v2558_v60 = vpop.permute.xlu1 %2557 }
 0xe86   : > { %v2529_v2 = vmul.f32 1.442695, %v2523_v32 }
 0xe87   : > { %v2520_v4 = vpop.xlane.xlu0 %2519 }
 0xe88   : > { %5054 = vpow2.f32 %v2529_v2  ;;  %v2524_v5 = vsub.f32 %v2506_v47, %v2520_v4 }
 0xe89   : > { %5056 = vpow2.f32 %v2525_v33  ;;  %v2560_v55 = vpop.permute.xlu1 %2559 }
 0xe8a   : > { %v2531_v36 = vmul.f32 1.442695, %v2524_v5 }
 0xe8c   : > { %5058 = vpow2.f32 %v2531_v36 }
 0xe8d   : > { %5060 = vpow2.f32 %v2527_v35 }
 0xe92   : > { %v6803_v37 = vpop.eup %5054 }
 0xe93   : > { %v2539_v38 = vsel %vm1213_vm1, %v6803_v37, 0.0  ;;  %v6807_v39 = vpop.eup %5056 }
 0xe94   : > { %2540 = vadd.xlane.f32.xlu0 %v2539_v38  ;;  %v2533_v41 = vsel %vm1213_vm1, %v6807_v39, 0.0 }
 0xe96   : > { %v5059_v40 = vpop.eup %5058 }
 0xe97   : > { %v2542_v42 = vsel %vm1213_vm1, %v5059_v40, 0.0  ;;  %v6812_v45 = vpop.eup %5060 }
 0xe98   : > { %2534 = vadd.xlane.f32.xlu0 %v2533_v41  ;;  %2543 = vadd.xlane.f32.xlu1 %v2542_v42  ;;  %v2536_v49 = vsel %vm1213_vm1, %v6812_v45, 0.0  ;;  %v4931_v42 = vld [vmem:[#allocation12 + $0x28] sm:$0xff]  }
 0xe9c   : > { %2537 = vadd.xlane.f32.xlu1 %v2536_v49 }
 0xead   : > { %2561 = vrot.lane.b32.xlu1 %v6816_v50, %s5733_s12 }
 0xeae   : > { %2555 = vrot.lane.b32.xlu0 %v6820_v53, %s5733_s12  ;;  %s5561_s12 = scalar_lea.vmem %s5560_s26, 1024 }
 0xeaf   : > { %p5563_p4 = scmp.lt.s32.totalorder %s5561_s12, %s5555_s30 }
 0xeb1   : > { %2958 = vrot.lane.b32.xlu1 %v6726_v20, %s5735_s25  ;;  %v6840_v20 = vadd.f32 %v6785_v14, %v4534_v51  ;;  %p5564_p10 = por %p5563_p4, %p5562_p11 }
 0xeb2   : > { %2956 = vrot.lane.b32.xlu0 %v6722_v19, %s5735_s25  ;;  %v6843_v19 = vadd.f32 %v6785_v14, %v2758_v3 }
 0xeb3   : > { %p5565_p2 = pnand %p5564_p10, %p5558_p5 }
 0xeb5   : > { %2962 = vrot.lane.b32.xlu1 %v6734_v26, %s5735_s25  ;;  %v2770_v26 = vsel %vm1213_vm1, %v6837_v54, -inf }
 0xeb6   : > { %2960 = vrot.lane.b32.xlu0 %v6730_v25, %s5735_s25  ;;  %v6848_v25 = vadd.f32 %v6785_v14, %v4535_v29 }
 0xeb8   : > { %v2779_v58 = vsel %vm1213_vm1, %v6848_v25, -inf }
 0xeb9   : > { %2954 = vrot.lane.b32.xlu1 %v6744_v27, %s5735_s25  ;;  %v2776_v27 = vsel %vm1213_vm1, %v6840_v20, -inf }
 0xeba   : > { %2952 = vrot.lane.b32.xlu0 %v6739_v24, %s5735_s25  ;;  %v2773_v24 = vsel %vm1213_vm1, %v6843_v19, -inf }
 0xed9   : > { %2771 = vmax.xlane.f32.xlu0 %v2770_v26 }
 0xedd   : > { %2777 = vmax.xlane.f32.xlu0 %v2776_v27  ;;  %2774 = vmax.xlane.f32.xlu1 %v2773_v24 }
 0xee1   : > { %2780 = vmax.xlane.f32.xlu0 %v2779_v58 }
 0xeee   : > { %2818 = vrot.lane.b32.xlu1 %v6795_v18, %s5734_s23 }
 0xef2   : > { %2820 = vrot.lane.b32.xlu1 %v6799_v46, %s5734_s23 }
 0xf21   : > { %v2541_v61 = vpop.xlane.xlu0 %2540 }
 0xf25   : > { %v2544_v56 = vpop.xlane.xlu1 %2543  ;;  %v2535_v57 = vpop.xlane.xlu0 %2534 }
 0xf26   : > { %5062 = vrcp.f32 %v2544_v56 }
 0xf27   : > { %5064 = vrcp.f32 %v2535_v57 }
 0xf28   : > { %5066 = vrcp.f32 %v2541_v61 }
 0xf29   : > { %v2538_v62 = vpop.xlane.xlu1 %2537  ;;  %v2556_v59 = vpop.permute.xlu0 %2555 }
 0xf2a   : > { %5068 = vrcp.f32 %v2538_v62  ;;  %4506 = vmatprep.subr.bf16.mxu0 %v2556_v59 }
 0xf2b   : > { %4507 = vmatpush3.bf16.msra.mxu0 %v2556_v59 }
 0xf2c   : > { %4508 = vmatprep.subr.bf16.mxu0 %v2558_v60 }
 0xf2d   : > { %v2957_v63 = vpop.permute.xlu0 %2956  ;;  %v2562_v0 = vpop.permute.xlu1 %2561 }
 0xf2e   : > { %v2971_v1 = vsel %vm1145_vm0, %v2957_v63, 0  ;;  %4640 = vmatprep.subr.msk.bf16.mxu1 %vm1145_vm0, %v2957_v63 }
 0xf2f   : > { %4509 = vmatpush3.bf16.msra.mxu0 %v2558_v60  ;;  %4555 = vmatpush3.bf16.xpose.msra.mxu1 %v2971_v1 }
 0xf30   : > { %4510 = vmatprep.subr.bf16.mxu0 %v2560_v55  ;;  %v5063_v8 = vpop.eup %5062 }
 0xf31   : > { %v2959_v9 = vpop.permute.xlu1 %2958  ;;  %v2961_v52 = vpop.permute.xlu0 %2960  ;;  %v2552_v13 = vmul.f32 %v5063_v8, %v5059_v40 }
 0xf32   : > { %v5065_v10 = vpop.eup %5064  ;;  %4641 = vmatprep.subr.msk.bf16.mxu1 %vm1145_vm0, %v2959_v9  ;;  %v2974_v15 = vsel %vm1145_vm0, %v2959_v9, 0  ;;  %v2977_v47 = vsel %vm1145_vm0, %v2961_v52, 0 }
 0xf33   : > { %v5067_v11 = vpop.eup %5066  ;;  %4511 = vmatpush3.bf16.msra.mxu0 %v2560_v55  ;;  %v2549_v22 = vmul.f32 %v5065_v10, %v6807_v39 }
 0xf34   : > { %v5069_v12 = vpop.eup %5068  ;;  %4512 = vmatprep.subr.bf16.mxu0 %v2562_v0  ;;  %v2551_v21 = vmul.f32 %v5067_v11, %v6803_v37 }
 0xf35   : > { %v2550_v43 = vmul.f32 %v5069_v12, %v6812_v45  ;;  %v2953_v16 = vpop.permute.xlu0 %2952  ;;  %v2963_v17 = vpop.permute.xlu1 %2962 }
 0xf36   : > { %4562 = vmatprep.mubr.msk.bf16.mxu1 %vm1145_vm0, %v2953_v16  ;;  %v2554_v44 = vpack.c.bf16 %v2552_v13, %v2551_v21  ;;  %v2980_v48 = vsel %vm1145_vm0, %v2963_v17, 0 }
 0xf37   : > { %4513 = vmatpush3.bf16.msra.mxu0 %v2562_v0  ;;  %4557 = vmatpush3.bf16.xpose.msra.mxu1 %v2974_v15  ;;  %v2553_v23 = vpack.c.bf16 %v2550_v43, %v2549_v22 }
 0xf38   : > { %4642 = vmatprep.subr.msk.bf16.mxu1 %vm1145_vm0, %v2961_v52  ;;  %4518 = vmatprep.subr.bf16.mxu0 %v4931_v42 }
 0xf39   : > { %4514 = vmatprep.mubr.msk.bf16.mxu0 %vm1213_vm1, %v2553_v23  ;;  %v2955_v51 = vpop.permute.xlu1 %2954 }
 0xf3a   : > { %4515 = vmatmul.mubr.msk.bf16.vlgmr.msra.gmra.mrb[24].mxu0 %vm1213_vm1, %v2554_v44 }
 0xf3b   : > { %4519 = vmatpush3.bf16.msra.mxu0 %v4931_v42 }
 0xf3f   : > { %4559 = vmatpush3.bf16.xpose.msra.mxu1 %v2977_v47 }
 0xf40   : > { %4643 = vmatprep.subr.msk.bf16.mxu1 %vm1145_vm0, %v2963_v17 }
 0xf47   : > { %4561 = vmatpush3.bf16.xpose.msra.mxu1 %v2980_v48  ;;  %v4932_v48 = vld [vmem:[#allocation12 + $0x30] sm:$0xff]  }
 0xf4e   : > { %4563 = vmatmul.mubr.msk.bf16.vlgmr.msra.gmra.mrb[28].mxu1 %vm1145_vm0, %v2955_v51 }
 0xf66   : > { %v2772_v28 = vpop.xlane.xlu0 %2771 }
 0xf67   : > { %v2782_v29 = vsub.f32 %v6837_v54, %v2772_v28 }
 0xf69   : > { %v2786_v32 = vmul.f32 1.442695, %v2782_v29 }
 0xf6a   : > { %v2775_v3 = vpop.xlane.xlu1 %2774  ;;  %v2778_v6 = vpop.xlane.xlu0 %2777 }
 0xf6b   : > { %v2784_v7 = vsub.f32 %v6840_v20, %v2778_v6  ;;  %v2783_v30 = vsub.f32 %v6843_v19, %v2775_v3 }
 0xf6d   : > { %v2790_v31 = vmul.f32 1.442695, %v2784_v7  ;;  %v2788_v2 = vmul.f32 1.442695, %v2783_v30 }
 0xf6e   : > { %v2781_v33 = vpop.xlane.xlu0 %2780  ;;  %v2819_v45 = vpop.permute.xlu1 %2818 }
 0xf6f   : > { %v2785_v34 = vsub.f32 %v6848_v25, %v2781_v33  ;;  %5070 = vpow2.f32 %v2790_v31 }
 0xf70   : > { %5072 = vpow2.f32 %v2786_v32 }
 0xf71   : > { %v2792_v4 = vmul.f32 1.442695, %v2785_v34 }
 0xf72   : > { %v2821_v49 = vpop.permute.xlu1 %2820 }
 0xf73   : > { %5074 = vpow2.f32 %v2792_v4 }
 0xf74   : > { %5076 = vpow2.f32 %v2788_v2 }
 0xf79   : > { %v5071_v5 = vpop.eup %5070 }
 0xf7a   : > { %v2800_v35 = vsel %vm1213_vm1, %v5071_v5, 0.0  ;;  %v5073_v36 = vpop.eup %5072 }
 0xf7b   : > { %2801 = vadd.xlane.f32.xlu0 %v2800_v35  ;;  %v2794_v40 = vsel %vm1213_vm1, %v5073_v36, 0.0 }
 0xf7d   : > { %v5075_v37 = vpop.eup %5074 }
 0xf7e   : > { %v2803_v38 = vsel %vm1213_vm1, %v5075_v37, 0.0  ;;  %v5077_v39 = vpop.eup %5076 }
 0xf7f   : > { %2804 = vadd.xlane.f32.xlu1 %v2803_v38  ;;  %2795 = vadd.xlane.f32.xlu0 %v2794_v40  ;;  %v2797_v41 = vsel %vm1213_vm1, %v5077_v39, 0.0 }
 0xf83   : > { %2798 = vadd.xlane.f32.xlu1 %v2797_v41 }
 0xf94   : > { %2822 = vrot.lane.b32.xlu1 %v6816_v50, %s5734_s23 }
 0xf95   : > { %2816 = vrot.lane.b32.xlu0 %v6820_v53, %s5734_s23 }
0x1008   : > { %v2802_v54 = vpop.xlane.xlu0 %2801 }
0x100c   : > { %v2805_v20 = vpop.xlane.xlu1 %2804  ;;  %v2796_v19 = vpop.xlane.xlu0 %2795 }
0x100d   : > { %v4516_v26 = vpop.f32.mrb[24].mxu0  ;;  %5078 = vrcp.f32 %v2796_v19 }
0x100e   : > { %v2607_v25 = vpop.f32.mrb[25].mxu0  ;;  %5080 = vrcp.f32 %v2805_v20 }
0x100f   : > { %v4517_v27 = vpop.f32.mrb[26].mxu0 }
0x1010   : > { %v2623_v24 = vpack.c.bf16 %v4517_v27, %v4516_v26  ;;  %v2610_v58 = vpop.f32.mrb[27].mxu0  ;;  %v2799_v60 = vpop.xlane.xlu1 %2798 }
0x1011   : > { %v2622_v55 = vpack.c.bf16 %v2610_v58, %v2607_v25  ;;  %5082 = vrcp.f32 %v2799_v60  ;;  %v2817_v61 = vpop.permute.xlu0 %2816 }
0x1012   : > { %4536 = vmatprep.subr.bf16.mxu0 %v2817_v61  ;;  %5084 = vrcp.f32 %v2802_v54 }
0x1013   : > { %4520 = vmatprep.mubr.msk.bf16.mxu0 %vm1145_vm0, %v2622_v55 }
0x1014   : > { %4521 = vmatmul.mubr.msk.bf16.vlgmr.msra.gmra.mrb[8].mxu0 %vm1145_vm0, %v2623_v24  ;;  %v2823_v59 = vpop.permute.xlu1 %2822 }
0x1015   : > { %4537 = vmatpush3.bf16.msra.mxu0 %v2817_v61  ;;  %v4933_v61 = vld [vmem:[#allocation12 + $0x38] sm:$0xff]  }
0x1016   : > { %4538 = vmatprep.subr.bf16.mxu0 %v2819_v45 }
0x1017   : > { %v5079_v56 = vpop.eup %5078 }
0x1018   : > { %v5081_v57 = vpop.eup %5080  ;;  %v2810_v63 = vmul.f32 %v5079_v56, %v5073_v36 }
0x1019   : > { %4539 = vmatpush3.bf16.msra.mxu0 %v2819_v45  ;;  %v2813_v8 = vmul.f32 %v5081_v57, %v5075_v37 }
0x101a   : > { %4540 = vmatprep.subr.bf16.mxu0 %v2821_v49 }
0x101b   : > { %v5083_v62 = vpop.eup %5082 }
0x101c   : > { %v2811_v0 = vmul.f32 %v5083_v62, %v5077_v39  ;;  %v5085_v1 = vpop.eup %5084 }
0x101d   : > { %4541 = vmatpush3.bf16.msra.mxu0 %v2821_v49  ;;  %v2812_v52 = vmul.f32 %v5085_v1, %v5071_v5 }
0x101e   : > { %4542 = vmatprep.subr.bf16.mxu0 %v2823_v59  ;;  %v2814_v9 = vpack.c.bf16 %v2811_v0, %v2810_v63 }
0x101f   : > { %v2815_v12 = vpack.c.bf16 %v2813_v8, %v2812_v52 }
0x1020   : > { %4544 = vmatprep.mubr.msk.bf16.mxu0 %vm1213_vm1, %v2814_v9 }
0x1021   : > { %4543 = vmatpush3.bf16.msra.mxu0 %v2823_v59  ;;  %v4564_v10 = vpop.f32.mrb[28].mxu1 }
0x1022   : > { %v3016_v11 = vpop.f32.mrb[29].mxu1  ;;  %v3025_v43 = vadd.f32 %v6785_v14, %v4564_v10  ;;  %4548 = vmatprep.subr.bf16.mxu0 %v4932_v48 }
0x1023   : > { %v3017_v13 = vadd.f32 %v6785_v14, %v3016_v11  ;;  %v4565_v15 = vpop.f32.mrb[30].mxu1  ;;  %v4114_v11 = vld [vmem:[#allocation14] ss:$0 sm:$0xff] }
0x1024   : > { %4545 = vmatmul.mubr.msk.bf16.vlgmr.msra.gmra.mrb[28].mxu0 %vm1213_vm1, %v2815_v12  ;;  %v3019_v22 = vpop.f32.mrb[31].mxu1  ;;  %v3028_v44 = vadd.f32 %v6785_v14, %v4565_v15  ;;  %v3037_v47 = vsel %vm1213_vm1, %v3025_v43, -inf }
0x1025   : > { %v3020_v16 = vadd.f32 %v6785_v14, %v3019_v22  ;;  %v3031_v21 = vsel %vm1213_vm1, %v3017_v13, -inf  ;;  %4549 = vmatpush3.bf16.msra.mxu0 %v4932_v48 }
0x1026   : > { %3032 = vmax.xlane.f32.xlu0 %v3031_v21  ;;  %v3040_v17 = vsel %vm1213_vm1, %v3028_v44, -inf }
0x1027   : > { %v3034_v23 = vsel %vm1213_vm1, %v3020_v16, -inf }
0x1028   : > { %3035 = vmax.xlane.f32.xlu1 %v3034_v23 }
0x102a   : > { %3038 = vmax.xlane.f32.xlu0 %v3037_v47 }
0x102e   : > { %3041 = vmax.xlane.f32.xlu0 %v3040_v17  ;;  %v1121_v17 = vld [vmem:[%s6345_s21 + $0x10] sm:$0xff] }
0x1039   : > { %3079 = vrot.lane.b32.xlu1 %v6795_v18, %s5735_s25 }
0x103d   : > { %3081 = vrot.lane.b32.xlu1 %v6799_v46, %s5735_s25 }
0x10b3   : > { %v3033_v51 = vpop.xlane.xlu0 %3032 }
0x10b4   : > { %v3043_v28 = vsub.f32 %v3017_v13, %v3033_v51  ;;  %v1119_v13 = vld [vmem:[%s6345_s21] sm:$0xff] }
0x10b5   : > { %v3036_v29 = vpop.xlane.xlu1 %3035 }
0x10b6   : > { %v3047_v6 = vmul.f32 1.442695, %v3043_v28  ;;  %v3044_v7 = vsub.f32 %v3020_v16, %v3036_v29  ;;  %v1120_v16 = vld [vmem:[%s6345_s21 + $0x8] sm:$0xff]  ;;  %v1122_v29 = vld [vmem:[%s6345_s21 + $0x18] sm:$0xff]  ;;  %s7167_s21 = sld [smem:[#allocation41_spill]] }
0x10b7   : > { %v3039_v3 = vpop.xlane.xlu0 %3038 }
0x10b8   : > { %v3045_v14 = vsub.f32 %v3025_v43, %v3039_v3  ;;  %v3049_v33 = vmul.f32 1.442695, %v3044_v7  ;;  %v4939_v7 = vld [vmem:[#allocation18 + $0x14] ss:$8 sps:$4 sm:$0xff]  }
0x10b9   : > { %v3080_v49 = vpop.permute.xlu1 %3079 }
0x10ba   : > { %v3051_v30 = vmul.f32 1.442695, %v3045_v14  ;;  %v4934_v14 = vld [vmem:[#allocation18] ss:$8 sps:$4 sm:$0xff]  }
0x10bb   : > { %v3042_v31 = vpop.xlane.xlu0 %3041 }
0x10bc   : > { %5086 = vpow2.f32 %v3051_v30  ;;  %v3046_v32 = vsub.f32 %v3028_v44, %v3042_v31  ;;  %v4937_v30 = vld [vmem:[#allocation18 + $0x10] ss:$8 sps:$4 sm:$0xff]   ;;  %s4154_s8 = sshll.u32 %s7167_s21, 3 }
0x10bd   : > { %5088 = vpow2.f32 %v3047_v6  ;;  %v3082_v54 = vpop.permute.xlu1 %3081  ;;  %v4936_v6 = vld [vmem:[#allocation18 + $0x4] ss:$8 sps:$4 sm:$0xff]   ;;  %s3741_s9 = sadd.s32 %s4154_s8, %s4153_s17 }
0x10be   : > { %v3053_v18 = vmul.f32 1.442695, %v3046_v32  ;;  %s4155_s5 = sshll.u32 %s3741_s9, 7 }
0x10bf   : > { %s6965_s14 = scalar_lea.hbm %s7168_s2, %s4155_s5 }
0x10c0   : > { %5090 = vpow2.f32 %v3053_v18 }
0x10c1   : > { %5092 = vpow2.f32 %v3049_v33 }
0x10c6   : > { %v5087_v46 = vpop.eup %5086 }
0x10c7   : > { %v3061_v34 = vsel %vm1213_vm1, %v5087_v46, 0.0  ;;  %v5089_v2 = vpop.eup %5088 }
0x10c8   : > { %3062 = vadd.xlane.f32.xlu0 %v3061_v34  ;;  %v3055_v5 = vsel %vm1213_vm1, %v5089_v2, 0.0 }
0x10ca   : > { %v5091_v4 = vpop.eup %5090 }
0x10cb   : > { %v3064_v35 = vsel %vm1213_vm1, %v5091_v4, 0.0  ;;  %v5093_v36 = vpop.eup %5092 }
0x10cc   : > { %3056 = vadd.xlane.f32.xlu0 %v3055_v5  ;;  %3065 = vadd.xlane.f32.xlu1 %v3064_v35  ;;  %v3058_v37 = vsel %vm1213_vm1, %v5093_v36, 0.0 }
0x10d0   : > { %3059 = vadd.xlane.f32.xlu1 %v3058_v37 }
0x10e1   : > { %3083 = vrot.lane.b32.xlu1 %v6816_v50, %s5735_s25 }
0x10e2   : > { %3077 = vrot.lane.b32.xlu0 %v6820_v53, %s5735_s25 }
0x10f7   : > { %v4546_v38 = vpop.f32.mrb[28].mxu0 }
0x10f8   : > { %v2868_v39 = vpop.f32.mrb[29].mxu0 }
0x10f9   : > { %v4547_v40 = vpop.f32.mrb[30].mxu0 }
0x10fa   : > { %v2884_v41 = vpack.c.bf16 %v4547_v40, %v4546_v38  ;;  %v2871_v42 = vpop.f32.mrb[31].mxu0 }
0x10fb   : > { %v2883_v45 = vpack.c.bf16 %v2871_v42, %v2868_v39  ;;  %v4942_v42 = vld [vmem:[#allocation18 + $0x24] ss:$8 sps:$4 sm:$0xff]  }
0x10fd   : > { %4550 = vmatprep.mubr.msk.bf16.mxu0 %vm1145_vm0, %v2883_v45  ;;  %v4940_v45 = vld [vmem:[#allocation18 + $0x20] ss:$8 sps:$4 sm:$0xff]  }
0x10fe   : > { %4551 = vmatmul.mubr.msk.bf16.vlgmr.msra.gmra.mrb[8].mxu0 %vm1145_vm0, %v2884_v41 }
0x1155   : > { %v3063_v20 = vpop.xlane.xlu0 %3062 }
0x1159   : > { %v3066_v19 = vpop.xlane.xlu1 %3065  ;;  %v3057_v26 = vpop.xlane.xlu0 %3056 }
0x115a   : > { %5094 = vrcp.f32 %v3066_v19  ;;  %v4946_v19 = vld [vmem:[#allocation18 + $0x40] ss:$8 sps:$4 sm:$0xff]  }
0x115b   : > { %5096 = vrcp.f32 %v3057_v26  ;;  %v4951_v26 = vld [vmem:[#allocation18 + $0x54] ss:$8 sps:$4 sm:$0xff]  }
0x115c   : > { %5098 = vrcp.f32 %v3063_v20  ;;  %v4948_v20 = vld [vmem:[#allocation18 + $0x44] ss:$8 sps:$4 sm:$0xff]  }
0x115d   : > { %v3060_v50 = vpop.xlane.xlu1 %3059  ;;  %v3078_v53 = vpop.permute.xlu0 %3077 }
0x115e   : > { %5100 = vrcp.f32 %v3060_v50  ;;  %4566 = vmatprep.subr.bf16.mxu0 %v3078_v53  ;;  %v4949_v50 = vld [vmem:[#allocation18 + $0x50] ss:$8 sps:$4 sm:$0xff]  }
0x115f   : > { %4567 = vmatpush3.bf16.msra.mxu0 %v3078_v53  ;;  %v4954_v53 = vld [vmem:[#allocation18 + $0x64] ss:$8 sps:$4 sm:$0xff]  }
0x1160   : > { %4568 = vmatprep.subr.bf16.mxu0 %v3080_v49 }
0x1161   : > { %v3084_v27 = vpop.permute.xlu1 %3083 }
0x1163   : > { %4569 = vmatpush3.bf16.msra.mxu0 %v3080_v49  ;;  %v4945_v49 = vld [vmem:[#allocation18 + $0x34] ss:$8 sps:$4 sm:$0xff]  }
0x1164   : > { %4570 = vmatprep.subr.bf16.mxu0 %v3082_v54  ;;  %v5095_v25 = vpop.eup %5094 }
0x1165   : > { %v5097_v24 = vpop.eup %5096  ;;  %v3074_v55 = vmul.f32 %v5095_v25, %v5091_v4  ;;  %v4952_v25 = vld [vmem:[#allocation18 + $0x60] ss:$8 sps:$4 sm:$0xff]  }
0x1166   : > { %v5099_v58 = vpop.eup %5098  ;;  %v3071_v56 = vmul.f32 %v5097_v24, %v5089_v2  ;;  %v4955_v24 = vld [vmem:[#allocation18 + $0x70] ss:$8 sps:$4 sm:$0xff]  }
0x1167   : > { %4571 = vmatpush3.bf16.msra.mxu0 %v3082_v54  ;;  %v3073_v62 = vmul.f32 %v5099_v58, %v5087_v46  ;;  %v4943_v54 = vld [vmem:[#allocation18 + $0x30] ss:$8 sps:$4 sm:$0xff]   ;;  %v5736_v58 = vmov 0  }
0x1168   : > { %v5101_v60 = vpop.eup %5100  ;;  %4572 = vmatprep.subr.bf16.mxu0 %v3084_v27 }
0x1169   : > { %v3072_v57 = vmul.f32 %v5101_v60, %v5093_v36  ;;  %v3076_v63 = vpack.c.bf16 %v3074_v55, %v3073_v62  ;;  %v4958_v60 = vld [vmem:[#allocation21 + $0x40] sm:$0xff]   ;;  %v4963_v62 = vld [vmem:[#allocation21 + $0x10] sm:$0xff]  }
0x116a   : > { %v4959_v55 = vld [vmem:[#allocation21] sm:$0xff]   ;;  %4292 = vmatprep.subr.bf16.mxu1 %v4958_v60 }
0x116b   : > { %4573 = vmatpush3.bf16.msra.mxu0 %v3084_v27  ;;  %v3075_v59 = vpack.c.bf16 %v3072_v57, %v3071_v56  ;;  %v4957_v27 = vld [vmem:[#allocation18 + $0x74] ss:$8 sps:$4 sm:$0xff]   ;;  %4293 = vmatpush3.bf16.msra.mxu1 %v4959_v55  ;;  %v4961_v56 = vld [vmem:[#allocation21 + $0x8] sm:$0xff]  }
0x116c   : > { %4578 = vmatprep.subr.bf16.mxu0 %v4933_v61  ;;  %v4962_v57 = vld [vmem:[#allocation21 + $0x50] sm:$0xff]  }
0x116d   : > { %4574 = vmatprep.mubr.msk.bf16.mxu0 %vm1213_vm1, %v3075_v59  ;;  %v4964_v59 = vld [vmem:[#allocation21 + $0x58] sm:$0xff]  }
0x116e   : > { %4575 = vmatmul.mubr.msk.bf16.vlgmr.msra.gmra.mrb[32].mxu0 %vm1213_vm1, %v3076_v63  ;;  %v4965_v63 = vld [vmem:[#allocation21 + $0x18] sm:$0xff]  }
0x116f   : > { %4579 = vmatpush3.bf16.msra.mxu0 %v4933_v61  ;;  %v4960_v61 = vld [vmem:[#allocation21 + $0x48] sm:$0xff]  }
0x1170   : > { %3405 = vmatprep.subr.bf16.mxu0 %v4936_v6  ;;  %4294 = vmatprep.subr.bf16.mxu1 %v4960_v61 }
0x1171   : > { %4295 = vmatpush3.bf16.msra.mxu1 %v4961_v56 }
0x1172   : > { %4296 = vmatprep.subr.bf16.mxu1 %v4962_v57 }
0x1175   : > { %4297 = vmatpush3.bf16.msra.mxu1 %v4963_v62 }
0x1176   : > { %4298 = vmatprep.subr.bf16.mxu1 %v4964_v59 }
0x1179   : > { %4299 = vmatpush3.bf16.msra.mxu1 %v4965_v63 }
0x1241   : > { %v4576_v0 = vpop.f32.mrb[32].mxu0 }
0x1242   : > { %v3129_v1 = vpop.f32.mrb[33].mxu0 }
0x1243   : > { %v4577_v8 = vpop.f32.mrb[34].mxu0 }
0x1244   : > { %v3145_v9 = vpack.c.bf16 %v4577_v8, %v4576_v0  ;;  %v3132_v52 = vpop.f32.mrb[35].mxu0  ;;  %v4966_v0 = vld [vmem:[#allocation21 + $0x60] sm:$0xff]   ;;  %v4968_v8 = vld [vmem:[#allocation21 + $0x68] sm:$0xff]  }
0x1245   : > { %v3144_v10 = vpack.c.bf16 %v3132_v52, %v3129_v1  ;;  %v4967_v1 = vld [vmem:[#allocation21 + $0x20] sm:$0xff]   ;;  %4300 = vmatprep.subr.bf16.mxu1 %v4966_v0 }
0x1246   : > { %4301 = vmatpush3.bf16.msra.mxu1 %v4967_v1 }
0x1247   : > { %4580 = vmatprep.mubr.msk.bf16.mxu0 %vm1145_vm0, %v3144_v10  ;;  %4302 = vmatprep.subr.bf16.mxu1 %v4968_v8 }
0x1248   : > { %4581 = vmatmul.mubr.msk.bf16.vlgmr.msra.gmra.mrb[8].mxu0 %vm1145_vm0, %v3145_v9 }
0x1249   : > { %3406 = vmatpush1.bf16.msra.mxu0 %v4934_v14  ;;  %3437 = vmatprep.mubr.bf16.mxu0 %v5736_v58 }
0x124a   : > { %3407 = vmatprep.subr.bf16.mxu0 %v4939_v7 }
0x124d   : > { %3408 = vmatpush1.bf16.msra.mxu0 %v4937_v30 }
0x124e   : > { %3409 = vmatprep.subr.bf16.mxu0 %v4942_v42  ;;  %v3313_v42 = vld [vmem:[#allocation20] sm:$0x3] }
0x1251   : > { %3410 = vmatpush1.bf16.msra.mxu0 %v4940_v45 }
0x1252   : > { %3411 = vmatprep.subr.bf16.mxu0 %v4945_v49 }
0x1255   : > { %3412 = vmatpush1.bf16.msra.mxu0 %v4943_v54 }
0x1256   : > { %3413 = vmatprep.subr.bf16.mxu0 %v4948_v20 }
0x1259   : > { %3414 = vmatpush1.bf16.msra.mxu0 %v4946_v19 }
0x125a   : > { %3415 = vmatprep.subr.bf16.mxu0 %v4951_v26 }
0x125d   : > { %3416 = vmatpush1.bf16.msra.mxu0 %v4949_v50 }
0x125e   : > { %3417 = vmatprep.subr.bf16.mxu0 %v4954_v53 }
0x1261   : > { %3418 = vmatpush1.bf16.msra.mxu0 %v4952_v25 }
0x1262   : > { %3419 = vmatprep.subr.bf16.mxu0 %v4957_v27 }
0x1265   : > { %3420 = vmatpush1.bf16.msra.mxu0 %v4955_v24 }
0x131b   : > { %v4582_v12 = vpop.f32.mrb[8].mxu0 }
0x131c   : > { %v3194_v15 = vpop.f32.mrb[9].mxu0  ;;  %v3222_v23 = vadd.f32 %v4582_v12, %v4114_v11 }
0x131d   : > { %v3220_v22 = vadd.f32 %v4114_v11, %v3194_v15  ;;  %v4583_v43 = vpop.f32.mrb[10].mxu0 }
0x131e   : > { %v3197_v21 = vpop.f32.mrb[11].mxu0  ;;  %v3226_v51 = vadd.f32 %v3222_v23, %v1121_v17  ;;  %v3223_v28 = vadd.f32 %v4583_v43, %v4114_v11 }
0x131f   : > { %v3224_v44 = vadd.f32 %v3220_v22, %v1119_v13  ;;  %v3221_v47 = vadd.f32 %v4114_v11, %v3197_v21 }
0x1320   : > { %v3227_v3 = vadd.f32 %v3223_v28, %v1122_v29 }
0x1321   : > { %v3225_v48 = vadd.f32 %v3221_v47, %v1120_v16  ;;  %3230 = vadd.xlane.f32.xlu0 %v3224_v44  ;;  %v4115_v47 = vld [vmem:[#allocation15] ss:$0 sm:$0xff] }
0x1323   : > { %3232 = vadd.xlane.f32.xlu1 %v3225_v48 }
0x1325   : > { %3234 = vadd.xlane.f32.xlu0 %v3226_v51 }
0x1329   : > { %3236 = vadd.xlane.f32.xlu0 %v3227_v3 }
0x13ae   : > { %v3231_v31 = vpop.xlane.xlu0 %3230 }
0x13af   : > { %v3239_v32 = vmul.f32 0.0078125, %v3231_v31 }
0x13b0   : > { %v3233_v33 = vpop.xlane.xlu1 %3232 }
0x13b1   : > { %v6921_v18 = vsub.f32 %v3224_v44, %v3239_v32  ;;  %v3240_v46 = vmul.f32 0.0078125, %v3233_v33 }
0x13b2   : > { %v3235_v34 = vpop.xlane.xlu0 %3234 }
0x13b3   : > { %v6923_v2 = vsub.f32 %v3225_v48, %v3240_v46  ;;  %v3241_v4 = vmul.f32 0.0078125, %v3235_v34  ;;  %v3247_v5 = vmul.f32 %v6921_v18, %v6921_v18 }
0x13b5   : > { %v6927_v35 = vsub.f32 %v3226_v51, %v3241_v4  ;;  %3251 = vadd.xlane.f32.xlu0 %v3247_v5  ;;  %v3248_v36 = vmul.f32 %v6923_v2, %v6923_v2  ;;  %v4969_v5 = vld [vmem:[#allocation21 + $0x28] sm:$0xff]  }
0x13b6   : > { %v3237_v37 = vpop.xlane.xlu0 %3236  ;;  %4303 = vmatpush3.bf16.msra.mxu1 %v4969_v5 }
0x13b7   : > { %v3242_v38 = vmul.f32 0.0078125, %v3237_v37  ;;  %3253 = vadd.xlane.f32.xlu1 %v3248_v36  ;;  %v3249_v39 = vmul.f32 %v6927_v35, %v6927_v35  ;;  %v4971_v36 = vld [vmem:[#allocation21 + $0x30] sm:$0xff]   ;;  %v4972_v37 = vld [vmem:[#allocation21 + $0x78] sm:$0xff]  }
0x13b9   : > { %v6933_v40 = vsub.f32 %v3227_v3, %v3242_v38  ;;  %3255 = vadd.xlane.f32.xlu0 %v3249_v39  ;;  %v4116_v3 = vld [vmem:[#allocation17] ss:$0 sm:$0xff]  ;;  %v3315_v39 = vlaneseq }
0x13ba   : > { %v4973_v38 = vld [vmem:[#allocation21 + $0x38] sm:$0xff]  }
0x13bb   : > { %v3250_v41 = vmul.f32 %v6933_v40, %v6933_v40 }
0x13bd   : > { %3257 = vadd.xlane.f32.xlu1 %v3250_v41 }
0x1442   : > { %v3252_v9 = vpop.xlane.xlu0 %3251 }
0x1443   : > { %v3259_v52 = vmul.f32 0.0078125, %v3252_v9 }
0x1444   : > { %v3254_v10 = vpop.xlane.xlu1 %3253 }
0x1445   : > { %v3263_v11 = vadd.f32 1e-05, %v3259_v52  ;;  %v3260_v12 = vmul.f32 0.0078125, %v3254_v10 }
0x1446   : > { %v3256_v13 = vpop.xlane.xlu0 %3255 }
0x1447   : > { %5102 = vrsqrt.f32 %v3263_v11  ;;  %v3264_v15 = vadd.f32 1e-05, %v3260_v12  ;;  %v3261_v22 = vmul.f32 0.0078125, %v3256_v13 }
0x1449   : > { %5104 = vrsqrt.f32 %v3264_v15  ;;  %v3265_v43 = vadd.f32 1e-05, %v3261_v22 }
0x144a   : > { %v3258_v16 = vpop.xlane.xlu1 %3257 }
0x144b   : > { %5106 = vrsqrt.f32 %v3265_v43  ;;  %v3262_v21 = vmul.f32 0.0078125, %v3258_v16  ;;  %v4133_v16 = vld [vmem:[#allocation23] ss:$0 sm:$0xff] }
0x144d   : > { %v3266_v23 = vadd.f32 1e-05, %v3262_v21 }
0x144f   : > { %5108 = vrsqrt.f32 %v3266_v23 }
0x1451   : > { %v5103_v44 = vpop.eup %5102 }
0x1452   : > { %v3271_v17 = vmul.f32 %v5103_v44, %v6921_v18 }
0x1453   : > { %v5105_v48 = vpop.eup %5104 }
0x1454   : > { %v3272_v51 = vmul.f32 %v5105_v48, %v6923_v2  ;;  %v3281_v28 = vmul.f32 %v4115_v47, %v3271_v17 }
0x1455   : > { %v5107_v29 = vpop.eup %5106 }
0x1456   : > { %v3282_v14 = vmul.f32 %v4115_v47, %v3272_v51  ;;  %v6939_v6 = vadd.f32 %v4116_v3, %v3281_v28  ;;  %v3273_v30 = vmul.f32 %v5107_v29, %v6927_v35  ;;  %v4970_v35 = vld [vmem:[#allocation21 + $0x70] sm:$0xff]  }
0x1457   : > { %4304 = vmatprep.subr.bf16.mxu1 %v4970_v35 }
0x1458   : > { %v6941_v7 = vadd.f32 %v4116_v3, %v3282_v14  ;;  %v3283_v18 = vmul.f32 %v4115_v47, %v3273_v30  ;;  %4305 = vmatpush3.bf16.msra.mxu1 %v4971_v36 }
0x1459   : > { %v5109_v31 = vpop.eup %5108  ;;  %4306 = vmatprep.subr.bf16.mxu1 %v4972_v37 }
0x145a   : > { %v3295_v32 = vpack.c.bf16 %v6941_v7, %v6939_v6  ;;  %v3274_v33 = vmul.f32 %v5109_v31, %v6933_v40  ;;  %v6949_v2 = vadd.f32 %v4116_v3, %v3283_v18  ;;  %v3316_v40 = vshrl.u32 %v3315_v39, 7 }
0x145c   : > { %3438 = vmatmul.mubr.bf16.vlgmr.msra.gmra.mrb[36].mxu0 %v3295_v32  ;;  %v3284_v46 = vmul.f32 %v4115_v47, %v3274_v33  ;;  %4307 = vmatpush3.bf16.msra.mxu1 %v4973_v38  ;;  %v3317_v41 = vsub.s32 0, %v3316_v40  ;;  %v3321_v45 = vsub.s32 1, %v3316_v40 }
0x145d   : > { %3447 = vmatprep.mubr.bf16.mxu0 %v5736_v58 }
0x145e   : > { %v6947_v34 = vadd.f32 %v4116_v3, %v3284_v46  ;;  %v3318_v49 = vrot.slane %v3313_v42, %v3317_v41  ;;  %v3322_v54 = vrot.slane %v3313_v42, %v3321_v45 }
0x1460   : > { %v3296_v4 = vpack.c.bf16 %v6947_v34, %v6949_v2 }
0x1464   : > { %3448 = vmatmul.mubr.bf16.gmra.mrb[40].mxu0 %v3296_v4 }
0x152f   : > { %v3439_v20 = vpop.f32.mrb[36].mxu0 }
0x1530   : > { %v3440_v19 = vadd.f32 %v3439_v20, %v3318_v49  ;;  %v3441_v26 = vpop.f32.mrb[37].mxu0 }
0x1531   : > { %v3442_v50 = vadd.f32 %v3441_v26, %v3322_v54  ;;  %v3443_v53 = vpop.f32.mrb[38].mxu0 }
0x1532   : > { %v3444_v25 = vadd.f32 %v3443_v53, %v3318_v49  ;;  %v3445_v27 = vpop.f32.mrb[39].mxu0  ;;  %v3458_v58 = vmax.f32 %v3440_v19, 0.0 }
0x1533   : > { %v3446_v24 = vadd.f32 %v3445_v27, %v3322_v54  ;;  %v3459_v55 = vmax.f32 %v3442_v50, 0.0 }
0x1534   : > { %v3460_v60 = vmax.f32 %v3444_v25, 0.0 }
0x1535   : > { %v3461_v61 = vmax.f32 %v3446_v24, 0.0 }
0x1536   : > { %v3466_v56 = vpack.c.bf16 %v3460_v60, %v3458_v58 }
0x1537   : > { %v3467_v57 = vpack.c.bf16 %v3461_v61, %v3459_v55  ;;  %v3449_v62 = vpop.f32.mrb[40].mxu0 }
0x1538   : > { %v3450_v59 = vadd.f32 %v3449_v62, %v3318_v49  ;;  %v3451_v63 = vpop.f32.mrb[41].mxu0  ;;  %v4150_v62 = vld [vmem:[#allocation24] ss:$0 sm:$0xff] }
0x1539   : > { %v3452_v0 = vadd.f32 %v3451_v63, %v3322_v54  ;;  %v3453_v1 = vpop.f32.mrb[42].mxu0  ;;  %3637 = vmatprep.mubr.bf16.mxu1 %v3467_v57 }
0x153a   : > { %v3454_v8 = vadd.f32 %v3453_v1, %v3318_v49  ;;  %v3455_v9 = vpop.f32.mrb[43].mxu0  ;;  %3638 = vmatmul.mubr.bf16.vlgmr.msra.gmra.mrb[32].mxu1 %v3466_v56  ;;  %v3462_v10 = vmax.f32 %v3450_v59, 0.0 }
0x153b   : > { %v3456_v52 = vadd.f32 %v3455_v9, %v3322_v54  ;;  %v3463_v12 = vmax.f32 %v3452_v0, 0.0  ;;  %v4151_v0 = vld [vmem:[#allocation26] ss:$0 sm:$0xff] }
0x153c   : > { %v3464_v11 = vmax.f32 %v3454_v8, 0.0 }
0x153d   : > { %v3465_v13 = vmax.f32 %v3456_v52, 0.0 }
0x153e   : > { %v3468_v15 = vpack.c.bf16 %v3464_v11, %v3462_v10 }
0x153f   : > { %v3469_v22 = vpack.c.bf16 %v3465_v13, %v3463_v12 }
0x1541   : > { %3645 = vmatprep.mubr.bf16.mxu1 %v3469_v22 }
0x1542   : > { %3646 = vmatmul.mubr.bf16.gmra.mrb[36].mxu1 %v3468_v15 }
0x160d   : > { %v4308_v43 = vpop.f32.mrb[32].mxu1 }
0x160e   : > { %v4309_v21 = vpop.f32.mrb[33].mxu1 }
0x160f   : > { %v4310_v23 = vadd.f32 %v4309_v21, %v4308_v43  ;;  %v4311_v44 = vpop.f32.mrb[34].mxu1 }
0x1610   : > { %v4312_v47 = vpop.f32.mrb[35].mxu1 }
0x1611   : > { %v3640_v17 = vadd.f32 %v4310_v23, %v4133_v16  ;;  %v4313_v48 = vadd.f32 %v4312_v47, %v4311_v44 }
0x1613   : > { %v3643_v51 = vadd.f32 %v4313_v48, %v4133_v16  ;;  %v3654_v28 = vadd.f32 %v3640_v17, %v6939_v6 }
0x1615   : > { %3660 = vadd.xlane.f32.xlu0 %v3654_v28  ;;  %v4314_v29 = vpop.f32.mrb[36].mxu1  ;;  %v3655_v3 = vadd.f32 %v3643_v51, %v6941_v7 }
0x1616   : > { %v4315_v14 = vpop.f32.mrb[37].mxu1 }
0x1617   : > { %v4316_v30 = vadd.f32 %v4315_v14, %v4314_v29  ;;  %3662 = vadd.xlane.f32.xlu1 %v3655_v3  ;;  %v4317_v31 = vpop.f32.mrb[38].mxu1 }
0x1618   : > { %v4318_v32 = vpop.f32.mrb[39].mxu1 }
0x1619   : > { %v3648_v33 = vadd.f32 %v4316_v30, %v4133_v16  ;;  %v4319_v18 = vadd.f32 %v4318_v32, %v4317_v31 }
0x161b   : > { %v3651_v46 = vadd.f32 %v4319_v18, %v4133_v16  ;;  %v3656_v4 = vadd.f32 %v3648_v33, %v6949_v2 }
0x161d   : > { %3664 = vadd.xlane.f32.xlu0 %v3656_v4  ;;  %v3657_v5 = vadd.f32 %v3651_v46, %v6947_v34 }
0x161f   : > { %3666 = vadd.xlane.f32.xlu1 %v3657_v5 }
0x16a2   : > { %v3661_v35 = vpop.xlane.xlu0 %3660 }
0x16a3   : > { %v3668_v6 = vmul.f32 0.0078125, %v3661_v35 }
0x16a4   : > { %v3663_v36 = vpop.xlane.xlu1 %3662 }
0x16a5   : > { %v3672_v37 = vsub.f32 %v3654_v28, %v3668_v6  ;;  %v3669_v38 = vmul.f32 0.0078125, %v3663_v36 }
0x16a7   : > { %v3673_v7 = vsub.f32 %v3655_v3, %v3669_v38  ;;  %v3676_v39 = vmul.f32 %v3672_v37, %v3672_v37 }
0x16a9   : > { %3680 = vadd.xlane.f32.xlu0 %v3676_v39  ;;  %v3677_v40 = vmul.f32 %v3673_v7, %v3673_v7 }
0x16aa   : > { %v3665_v41 = vpop.xlane.xlu0 %3664 }
0x16ab   : > { %v3670_v42 = vmul.f32 0.0078125, %v3665_v41  ;;  %3682 = vadd.xlane.f32.xlu1 %v3677_v40 }
0x16ac   : > { %v3667_v45 = vpop.xlane.xlu1 %3666 }
0x16ad   : > { %v3674_v49 = vsub.f32 %v3656_v4, %v3670_v42  ;;  %v3671_v54 = vmul.f32 0.0078125, %v3667_v45 }
0x16af   : > { %v3675_v2 = vsub.f32 %v3657_v5, %v3671_v54  ;;  %v3678_v20 = vmul.f32 %v3674_v49, %v3674_v49 }
0x16b1   : > { %3684 = vadd.xlane.f32.xlu0 %v3678_v20  ;;  %v3679_v34 = vmul.f32 %v3675_v2, %v3675_v2 }
0x16b3   : > { %3686 = vadd.xlane.f32.xlu1 %v3679_v34 }
0x1736   : > { %v3681_v19 = vpop.xlane.xlu0 %3680 }
0x1737   : > { %v3688_v26 = vmul.f32 0.0078125, %v3681_v19 }
0x1738   : > { %v3683_v50 = vpop.xlane.xlu1 %3682 }
0x1739   : > { %v3692_v53 = vadd.f32 1e-05, %v3688_v26  ;;  %v3689_v25 = vmul.f32 0.0078125, %v3683_v50 }
0x173b   : > { %5110 = vrsqrt.f32 %v3692_v53  ;;  %v3693_v27 = vadd.f32 1e-05, %v3689_v25 }
0x173d   : > { %5112 = vrsqrt.f32 %v3693_v27 }
0x173e   : > { %v3685_v24 = vpop.xlane.xlu0 %3684 }
0x173f   : > { %v3690_v58 = vmul.f32 0.0078125, %v3685_v24 }
0x1740   : > { %v3687_v60 = vpop.xlane.xlu1 %3686 }
0x1741   : > { %v3694_v55 = vadd.f32 1e-05, %v3690_v58  ;;  %v3691_v61 = vmul.f32 0.0078125, %v3687_v60 }
0x1743   : > { %5114 = vrsqrt.f32 %v3694_v55  ;;  %v3695_v56 = vadd.f32 1e-05, %v3691_v61 }
0x1745   : > { %v5111_v57 = vpop.eup %5110  ;;  %5116 = vrsqrt.f32 %v3695_v56 }
0x1746   : > { %v3700_v59 = vmul.f32 %v5111_v57, %v3672_v37 }
0x1747   : > { %v5113_v63 = vpop.eup %5112 }
0x1748   : > { %v3710_v1 = vmul.f32 %v4150_v62, %v3700_v59  ;;  %v3701_v8 = vmul.f32 %v5113_v63, %v3673_v7 }
0x174a   : > { %v3720_v9 = vadd.f32 %v4151_v0, %v3710_v1  ;;  %v3711_v52 = vmul.f32 %v4150_v62, %v3701_v8 }
0x174c   : > { %3724 = vst [vmem:[%s6385_s24] sm:$0xff] %v3720_v9  ;;  %v3721_v10 = vadd.f32 %v4151_v0, %v3711_v52 }
0x174d   : > { %v5115_v11 = vpop.eup %5114 }
0x174e   : > { %3725 = vst [vmem:[%s6385_s24 + $0x8] sm:$0xff] %v3721_v10  ;;  %v3702_v12 = vmul.f32 %v5115_v11, %v3674_v49 }
0x174f   : > { %v5117_v13 = vpop.eup %5116 }
0x1750   : > { %v3712_v15 = vmul.f32 %v4150_v62, %v3702_v12  ;;  %v3703_v22 = vmul.f32 %v5117_v13, %v3675_v2 }
0x1752   : > { %v3722_v43 = vadd.f32 %v4151_v0, %v3712_v15  ;;  %v3713_v16 = vmul.f32 %v4150_v62, %v3703_v22 }
0x1754   : > { %3726 = vst [vmem:[%s6385_s24 + $0x10] sm:$0xff] %v3722_v43  ;;  %v3723_v21 = vadd.f32 %v4151_v0, %v3713_v16 }
0x1756   : > { %3727 = vst [vmem:[%s6385_s24 + $0x18] sm:$0xff] %v3723_v21 }
0x1757   : > { %5568 = shalt.err (!%p5565_p2)
}
0x1758   : > { %s5569_s24 = scalar_lea.hbm %s6965_s14, 512  ;;  %s5573_s21 = scalar_lea.hbm %s7168_s2, 2048 }
0x1759   : > { %p5570_p8 = scmp.ne.s32.totalorder %s6965_s14, %s5569_s24  ;;  %p5574_p9 = scmp.lt.u32.totalorder %s6965_s14, %s7168_s2 }
0x175a   : > { %p5575_p0 = scmp.lt.u32.totalorder %s5573_s21, %s5569_s24  ;;  %p5577_p1 = scmp.lt.u32.totalorder %s5569_s24, %s6965_s14 }
0x175b   : > { %p5571_p12 = pnand %p5570_p8, %p7169_p7 }
0x175c   : > { %p5576_p13 = por %p5575_p0, %p5574_p9 }
0x175d   : > { %p5572_p3 = pneg %p5571_p12 }
0x175e   : > { %p5578_p6 = por %p5577_p1, %p5576_p13 }
0x1760   : > { %p5579_p5 = pnand %p5578_p6, %p5572_p3 }
0x1762   : > { %5582 = shalt.err (!%p5579_p5)
}
0x1763   : > { %s5738_s9 = smov 128   ;;  %s5739_s5 = smov 8  }
0x1764   : > { %4698 = dma.vmem_to_hbm [thread:$0]  (%p7169_p7), %s6967_s1, 512, %s6965_s14, %s3729_s0, %s5738_s9, %s5738_s9, %s5739_s5  }
0x1765 PF: > { %s7170_s13 = sld [smem:[#allocation37_spill]]  ;;  %p4776_p11 = scmp.ge.s32.totalorder %s5705_s28, 2 }
0x1766   : > { %p7171_p4 = scmp.ne.s32.totalorder %s7137_s6, 0 }
0x1768   : > { %p4748_p10 = pnand %p4776_p11, %p7171_p4 }
0x176b   : > { %s3759_s29 = sand.u32 1, %s7170_s13  }
0x176c   : > { %s3760_s30 = scalar_lea.sflag [#allocation5], %s3759_s29 }
0x176d   : > { %5660 = dma.done.wait (!%p4748_p10), %s3760_s30, 512  }
0x176e   : > { %5662 = vsyncadd (!%p4748_p10), %s3760_s30, 4294966784  ;;  %s40_s28 = sadd.s32 1, %s5705_s28   ;;  %s7172_s21 = sld [smem:[#allocation38_spill]] }
0x176f   : > { %p37_p2 = scmp.ge.s32.totalorder %s40_s28, 6   ;;  %s7173_s22 = sld [smem:[#allocation39_spill]] }
0x1770   : > { %s7174_s24 = sld [smem:[#allocation42_spill]]  ;;  %s7175_s7 = smov %s7184_s18 }
0x1771   : > { %s7176_s18 = smov %s5669_s19  ;;  %s7177_s19 = smov %s5673_s20 }
0x1772   : > { %s7178_s20 = smov %s6255_s10  ;;  %s7179_s23 = smov %s7190_s3 }
0x1773   : > { %s7180_s25 = smov %s5701_s27  ;;  %s7181_s26 = smov %s7175_s7 }
0x1774   : > { %s7182_s27 = smov %s7188_s15  ;;  %39 = sbr.rel (!%p37_p2) target bundleno = 34 (0x22), region = 202 }
0x177b   :  { %3765 = vsyncpa [#allocation4], 1 }
0x177c   :  { %3767 = vsyncpa [#allocation4 + $0x1], 1 }
0x177d   :  { %3768 = vsyncpa [#allocation7], 1 }
0x177e   :  { %3770 = vsyncpa [#allocation7 + $0x1], 1 }
0x177f   :  { %3771 = vsyncpa [#allocation10], 1 }
0x1780   :  { %3772 = vsyncpa [#allocation13], 1 }
0x1781   :  { %3773 = vsyncpa [#allocation16], 1 }
0x1782   :  { %3774 = vsyncpa [#allocation19], 1 }
0x1783   :  { %3775 = vsyncpa [#allocation22], 1 }
0x1784   :  { %3776 = vsyncpa [#allocation25], 1 }
0x1785   :  { %3777 = vsyncpa [#allocation5], 1 }
0x1786   :  { %3779 = vsyncpa [#allocation5 + $0x1], 1 }

</bundles_post_ra>
